<compile_context>
chip_gen: v5e
topology: v5e:2x2
jax: 0.10.0
libtpu: 0.0.40
codegen_flags: <defaults>
</compile_context>

<pallas_src>
import jax
import jax.numpy as jnp
from jax import lax
from jax.experimental import pallas as pl
from jax.experimental.pallas import tpu as pltpu


def _ceil_to(a, m):
    return -(-a // m) * m


def _pick_pack(qo, cout, max_lanes=128):
    """Pooled pixels packed per output row so the store is lane-dense (P*Cout <= 128)."""
    p = 1
    for d in range(1, qo + 1):
        if qo % d == 0 and d * cout <= max_lanes:
            p = d
    return p


def _vmem_footprint(tn, tpo, Wo, KWC, Qo, P, Cout, KH):
    """Lane-padding-aware per-step VMEM estimate (double-buffered inputs/outputs)."""
    ntaps = 4 * tpo + KH
    taps_b = ntaps * 2 * tn * _ceil_to(Wo, 8) * _ceil_to(KWC, 128) * 2        # bf16 taps
    w_b = _ceil_to(KH * KWC, 8) * _ceil_to(Cout, 128) * 2 * 2                 # resident weights
    b_b = 8 * _ceil_to(Cout, 128) * 4 * 2                                     # resident bias
    out_b = 2 * tn * tpo * _ceil_to(Qo // P, 8) * _ceil_to(P * Cout, 128) * 4
    scr_b = tn * _ceil_to(Wo + 2, 8) * _ceil_to(Cout, 128) * 4                # pool scratch
    y_b = (2 * tpo + 1) * tn * _ceil_to(Wo, 8) * _ceil_to(Cout, 128) * 4      # live conv rows
    lhs_b = 2 * tn * _ceil_to(Wo, 8) * _ceil_to(KH * KWC, 128) * 2            # concat temps
    return taps_b + w_b + b_b + out_b + scr_b + y_b + lhs_b


def _pick_tiles(N, Po, Wo, KWC, Qo, P, Cout, KH,
                budget_bytes=10 * 1024 * 1024, max_rows=2048):
    """Largest (batch tile, pooled rows per step) that fits the VMEM budget."""
    best, best_score = (1, 1), -1
    for tpo in range(1, min(Po, 4) + 1):
        if Po % tpo:
            continue
        for tn in range(1, N + 1):
            if N % tn or tn * Wo > max_rows:
                continue
            if _vmem_footprint(tn, tpo, Wo, KWC, Qo, P, Cout, KH) > budget_bytes:
                continue
            score = tn * tpo * 8 + tpo        # maximize work/step, prefer row reuse on ties
            if score > best_score:
                best_score, best = score, (tn, tpo)
    return best


def _make_fused_stem_kernel(KH, KWC, Wo, Qo, Ho, Cout, TPO, P):
    NTAPS = 4 * TPO + KH          # union of padded input rows needed by this step
    NCONV = 2 * TPO + 1           # conv rows feeding TPO pooled rows (shared row recomputed)
    QP = Qo // P

    def kernel(*refs):
        taps = refs[:NTAPS]                              # (TN,1,Wo,KWC) bf16 each
        w_ref, b_ref, o_ref, wbuf = refs[NTAPS:]
        tn = taps[0].shape[0]
        pb = pl.program_id(1)

        # ---- conv rows: one K = KH*KW*Cin matmul each, + folded-BN bias + ReLU ----
        ys = []
        for jj in range(NCONV):
            lhs = jnp.concatenate(
                [taps[2 * jj + k][...].reshape(tn * Wo, KWC) for k in range(KH)],
                axis=1)                                   # (tn*Wo, KH*KWC) bf16
            y = jnp.dot(lhs, w_ref[...], preferred_element_type=jnp.float32)
            y = jnp.maximum(y + b_ref[...], 0.0)
            ho = 2 * TPO * pb + jj - 1                    # conv row this jj corresponds to
            valid = jnp.logical_and(ho >= 0, ho <= Ho - 1).astype(jnp.float32)
            ys.append(y.reshape(tn, Wo, Cout) * valid)    # phantom edge rows -> 0 (exact, y>=0)

        # ---- 3x3/s2 maxpool: row max, then width max via strided scratch reads ----
        zero_col = jnp.zeros((tn, 1, Cout), jnp.float32)
        for q in range(TPO):
            rowmax = jnp.maximum(jnp.maximum(ys[2 * q], ys[2 * q + 1]), ys[2 * q + 2])
            wbuf[:, 0:1, :] = zero_col                    # width pads (exact, values >= 0)
            wbuf[:, 1:Wo + 1, :] = rowmax
            wbuf[:, Wo + 1:Wo + 2, :] = zero_col
            pieces = []
            for p in range(P):                            # lane-pack P pooled pixels per row
                t0 = wbuf[:, pl.ds(2 * p + 0, QP, stride=2 * P), :]
                t1 = wbuf[:, pl.ds(2 * p + 1, QP, stride=2 * P), :]
                t2 = wbuf[:, pl.ds(2 * p + 2, QP, stride=2 * P), :]
                pieces.append(jnp.maximum(jnp.maximum(t0, t1), t2))
            packed = pieces[0] if P == 1 else jnp.concatenate(pieces, axis=-1)
            o_ref[:, q:q + 1, :, :] = packed.reshape(tn, 1, QP, P * Cout).astype(o_ref.dtype)

    return kernel


def resnext_stem_forward(x_nchw, w, gamma, beta, run_mean, run_var, eps=1e-5):
    N, Cin, H, W = x_nchw.shape
    Cout, _, KH, KW = w.shape
    stride, pad = 2, KH // 2
    Ho = (H + 2 * pad - KH) // stride + 1
    Wo = (W + 2 * pad - KW) // stride + 1
    Po = (Ho + 2 - 3) // 2 + 1
    Qo = (Wo + 2 - 3) // 2 + 1
    Hp = H + 2 * pad
    KWC = KW * Cin

    # ---- layout prep (XLA glue): NHWC, zero-pad, width-unfold only, bf16 operands ----
    x = jnp.transpose(x_nchw, (0, 2, 3, 1)).astype(jnp.bfloat16)
    xp = jnp.pad(x, ((0, 0), (pad, pad), (pad, pad), (0, 0)))
    cols = [xp[:, :, kw: kw + stride * (Wo - 1) + 1: stride, :] for kw in range(KW)]
    xcol = jnp.concatenate(cols, axis=-1)                 # (N, Hp, Wo, KW*Cin) bf16

    # ---- fold eval-BN scale into the conv weights; bias + ReLU live in the kernel ----
    scale = (gamma / jnp.sqrt(run_var + eps)).astype(jnp.float32)
    bias = (beta - run_mean * scale).reshape(1, Cout).astype(jnp.float32)
    wfold = jnp.transpose(w, (2, 3, 1, 0)).astype(jnp.float32) * scale   # (KH,KW,Cin,Cout)
    wfold = wfold.reshape(KH * KWC, Cout).astype(jnp.bfloat16)

    P = _pick_pack(Qo, Cout)
    TN, TPO = _pick_tiles(N, Po, Wo, KWC, Qo, P, Cout, KH)
    NTAPS = 4 * TPO + KH

    def tap_spec(r):
        # block size 1 on the padded-row axis => block index == element row.
        # Clipping only ever fires for rows feeding phantom (masked-out) conv rows.
        return pl.BlockSpec(
            (TN, 1, Wo, KWC),
            lambda nb, pb, r=r: (nb, jnp.clip(4 * TPO * pb - 2 + r, 0, Hp - 1), 0, 0))

    kernel = _make_fused_stem_kernel(KH, KWC, Wo, Qo, Ho, Cout, TPO, P)

    out = pl.pallas_call(
        kernel,
        out_shape=jax.ShapeDtypeStruct((N, Po, Qo // P, P * Cout), jnp.float32),
        grid=(N // TN, Po // TPO),
        in_specs=[tap_spec(r) for r in range(NTAPS)]
        + [pl.BlockSpec((KH * KWC, Cout), lambda nb, pb: (0, 0)),     # resident folded weights
           pl.BlockSpec((1, Cout), lambda nb, pb: (0, 0))],           # resident folded bias
        out_specs=pl.BlockSpec((TN, TPO, Qo // P, P * Cout), lambda nb, pb: (nb, pb, 0, 0)),
        scratch_shapes=[pltpu.VMEM((TN, Wo + 2, Cout), jnp.float32)],
        compiler_params=pltpu.CompilerParams(
            dimension_semantics=("parallel", "parallel"),
            vmem_limit_bytes=32 * 1024 * 1024),
    )(*([xcol] * NTAPS), wfold, bias)

    pooled = out.reshape(N, Po, Qo, Cout)                 # undo lane packing (pure metadata)
    return jnp.transpose(pooled, (0, 3, 1, 2))            # back to NCHW


def _reference(x, w, gamma, beta, rm, rv, eps=1e-5, match_bf16=True):
    scale = gamma / jnp.sqrt(rv + eps)
    bias = beta - rm * scale
    wf = w * scale[:, None, None, None]
    if match_bf16:                                        # same operand rounding as the kernel
        xq, wq = x.astype(jnp.bfloat16), wf.astype(jnp.bfloat16)
    else:
        xq, wq = x, wf
    conv = lax.conv_general_dilated(xq, wq, (2, 2), ((3, 3), (3, 3)),
                                    dimension_numbers=('NCHW', 'OIHW', 'NCHW'),
                                    preferred_element_type=jnp.float32)
    y = jnp.maximum(conv + bias[None, :, None, None], 0.0)
    return lax.reduce_window(y, -jnp.inf, lax.max, (1, 1, 3, 3), (1, 1, 2, 2),
                             ((0, 0), (0, 0), (1, 1), (1, 1)))


if __name__ == "__main__":
    key = jax.random.PRNGKey(0)
    kx, kw_, kg, kb, km, kv = jax.random.split(key, 6)
    N, Cin, H, W = 2, 4, 16, 16
    Cout = 8

    x = jax.random.normal(kx, (N, Cin, H, W), jnp.float32)
    w = 0.1 * jax.random.normal(kw_, (Cout, Cin, 7, 7), jnp.float32)
    gamma = 1.0 + 0.1 * jax.random.normal(kg, (Cout,), jnp.float32)
    beta = 0.1 * jax.random.normal(kb, (Cout,), jnp.float32)
    run_mean = 0.1 * jax.random.normal(km, (Cout,), jnp.float32)
    run_var = jnp.abs(jax.random.normal(kv, (Cout,), jnp.float32)) + 0.5

    out = jax.block_until_ready(
        resnext_stem_forward(x, w, gamma, beta, run_mean, run_var))
    assert out.shape == (N, Cout, 4, 4), out.shape

    # tight check against a reference with identical bf16-operand rounding (algorithm check)
    ref_bf16 = _reference(x, w, gamma, beta, run_mean, run_var, match_bf16=True)
    assert jnp.allclose(out, ref_bf16, atol=2e-3, rtol=2e-3), \
        float(jnp.max(jnp.abs(out - ref_bf16)))
    # looser end-to-end check against the pure-f32 module semantics (bf16 operand precision)
    ref_f32 = _reference(x, w, gamma, beta, run_mean, run_var, match_bf16=False)
    assert jnp.allclose(out, ref_f32, atol=5e-2, rtol=5e-2), \
        float(jnp.max(jnp.abs(out - ref_f32)))

    print("KERNEL_OK")
</pallas_src>

<mosaic_0001>
module attributes {stable_mosaic.version = 11 : i64} {
  func.func @kernel(%arg0: i32, %arg1: i32, %arg2: memref<2x1x8x28xbf16, #tpu.memory_space<vmem>>, %arg3: memref<2x1x8x28xbf16, #tpu.memory_space<vmem>>, %arg4: memref<2x1x8x28xbf16, #tpu.memory_space<vmem>>, %arg5: memref<2x1x8x28xbf16, #tpu.memory_space<vmem>>, %arg6: memref<2x1x8x28xbf16, #tpu.memory_space<vmem>>, %arg7: memref<2x1x8x28xbf16, #tpu.memory_space<vmem>>, %arg8: memref<2x1x8x28xbf16, #tpu.memory_space<vmem>>, %arg9: memref<2x1x8x28xbf16, #tpu.memory_space<vmem>>, %arg10: memref<2x1x8x28xbf16, #tpu.memory_space<vmem>>, %arg11: memref<2x1x8x28xbf16, #tpu.memory_space<vmem>>, %arg12: memref<2x1x8x28xbf16, #tpu.memory_space<vmem>>, %arg13: memref<2x1x8x28xbf16, #tpu.memory_space<vmem>>, %arg14: memref<2x1x8x28xbf16, #tpu.memory_space<vmem>>, %arg15: memref<2x1x8x28xbf16, #tpu.memory_space<vmem>>, %arg16: memref<2x1x8x28xbf16, #tpu.memory_space<vmem>>, %arg17: memref<2x1x8x28xbf16, #tpu.memory_space<vmem>>, %arg18: memref<2x1x8x28xbf16, #tpu.memory_space<vmem>>, %arg19: memref<2x1x8x28xbf16, #tpu.memory_space<vmem>>, %arg20: memref<2x1x8x28xbf16, #tpu.memory_space<vmem>>, %arg21: memref<2x1x8x28xbf16, #tpu.memory_space<vmem>>, %arg22: memref<2x1x8x28xbf16, #tpu.memory_space<vmem>>, %arg23: memref<2x1x8x28xbf16, #tpu.memory_space<vmem>>, %arg24: memref<2x1x8x28xbf16, #tpu.memory_space<vmem>>, %arg25: memref<196x8xbf16, #tpu.memory_space<vmem>>, %arg26: memref<1x8xf32, #tpu.memory_space<vmem>>, %arg27: memref<2x4x1x32xf32, #tpu.memory_space<vmem>>, %arg28: memref<2x10x8xf32, #tpu.memory_space<vmem>>) attributes {dimension_semantics = [#tpu.dimension_semantics<parallel>, #tpu.dimension_semantics<parallel>], iteration_bounds = array<i64: 1, 1>, scalar_prefetch = 0 : i64, scratch_operands = 1 : i64, tpu.core_type = #tpu.core_type<tc>, window_params = [{transform_indices = @transform_0, window_bounds = array<i64: 2, 1, 8, 28>}, {transform_indices = @transform_1, window_bounds = array<i64: 2, 1, 8, 28>}, {transform_indices = @transform_2, window_bounds = array<i64: 2, 1, 8, 28>}, {transform_indices = @transform_3, window_bounds = array<i64: 2, 1, 8, 28>}, {transform_indices = @transform_4, window_bounds = array<i64: 2, 1, 8, 28>}, {transform_indices = @transform_5, window_bounds = array<i64: 2, 1, 8, 28>}, {transform_indices = @transform_6, window_bounds = array<i64: 2, 1, 8, 28>}, {transform_indices = @transform_7, window_bounds = array<i64: 2, 1, 8, 28>}, {transform_indices = @transform_8, window_bounds = array<i64: 2, 1, 8, 28>}, {transform_indices = @transform_9, window_bounds = array<i64: 2, 1, 8, 28>}, {transform_indices = @transform_10, window_bounds = array<i64: 2, 1, 8, 28>}, {transform_indices = @transform_11, window_bounds = array<i64: 2, 1, 8, 28>}, {transform_indices = @transform_12, window_bounds = array<i64: 2, 1, 8, 28>}, {transform_indices = @transform_13, window_bounds = array<i64: 2, 1, 8, 28>}, {transform_indices = @transform_14, window_bounds = array<i64: 2, 1, 8, 28>}, {transform_indices = @transform_15, window_bounds = array<i64: 2, 1, 8, 28>}, {transform_indices = @transform_16, window_bounds = array<i64: 2, 1, 8, 28>}, {transform_indices = @transform_17, window_bounds = array<i64: 2, 1, 8, 28>}, {transform_indices = @transform_18, window_bounds = array<i64: 2, 1, 8, 28>}, {transform_indices = @transform_19, window_bounds = array<i64: 2, 1, 8, 28>}, {transform_indices = @transform_20, window_bounds = array<i64: 2, 1, 8, 28>}, {transform_indices = @transform_21, window_bounds = array<i64: 2, 1, 8, 28>}, {transform_indices = @transform_22, window_bounds = array<i64: 2, 1, 8, 28>}, {pipeline_mode = #tpu.pipeline_mode<synchronous>, transform_indices = @transform_23, window_bounds = array<i64: 196, 8>}, {pipeline_mode = #tpu.pipeline_mode<synchronous>, transform_indices = @transform_24, window_bounds = array<i64: 1, 8>}, {transform_indices = @transform_25, window_bounds = array<i64: 2, 4, 1, 32>}]} {
    %c0 = arith.constant 0 : index
    %c0_0 = arith.constant 0 : index
    %c0_1 = arith.constant 0 : index
    %c0_2 = arith.constant 0 : index
    %0 = vector.load %arg2[%c0, %c0_0, %c0_1, %c0_2] : memref<2x1x8x28xbf16, #tpu.memory_space<vmem>>, vector<2x1x8x28xbf16>
    %1 = vector.shape_cast %0 : vector<2x1x8x28xbf16> to vector<16x28xbf16>
    %c0_3 = arith.constant 0 : index
    %c0_4 = arith.constant 0 : index
    %c0_5 = arith.constant 0 : index
    %c0_6 = arith.constant 0 : index
    %2 = vector.load %arg3[%c0_3, %c0_4, %c0_5, %c0_6] : memref<2x1x8x28xbf16, #tpu.memory_space<vmem>>, vector<2x1x8x28xbf16>
    %3 = vector.shape_cast %2 : vector<2x1x8x28xbf16> to vector<16x28xbf16>
    %c0_7 = arith.constant 0 : index
    %c0_8 = arith.constant 0 : index
    %c0_9 = arith.constant 0 : index
    %c0_10 = arith.constant 0 : index
    %4 = vector.load %arg4[%c0_7, %c0_8, %c0_9, %c0_10] : memref<2x1x8x28xbf16, #tpu.memory_space<vmem>>, vector<2x1x8x28xbf16>
    %5 = vector.shape_cast %4 : vector<2x1x8x28xbf16> to vector<16x28xbf16>
    %c0_11 = arith.constant 0 : index
    %c0_12 = arith.constant 0 : index
    %c0_13 = arith.constant 0 : index
    %c0_14 = arith.constant 0 : index
    %6 = vector.load %arg5[%c0_11, %c0_12, %c0_13, %c0_14] : memref<2x1x8x28xbf16, #tpu.memory_space<vmem>>, vector<2x1x8x28xbf16>
    %7 = vector.shape_cast %6 : vector<2x1x8x28xbf16> to vector<16x28xbf16>
    %c0_15 = arith.constant 0 : index
    %c0_16 = arith.constant 0 : index
    %c0_17 = arith.constant 0 : index
    %c0_18 = arith.constant 0 : index
    %8 = vector.load %arg6[%c0_15, %c0_16, %c0_17, %c0_18] : memref<2x1x8x28xbf16, #tpu.memory_space<vmem>>, vector<2x1x8x28xbf16>
    %9 = vector.shape_cast %8 : vector<2x1x8x28xbf16> to vector<16x28xbf16>
    %c0_19 = arith.constant 0 : index
    %c0_20 = arith.constant 0 : index
    %c0_21 = arith.constant 0 : index
    %c0_22 = arith.constant 0 : index
    %10 = vector.load %arg7[%c0_19, %c0_20, %c0_21, %c0_22] : memref<2x1x8x28xbf16, #tpu.memory_space<vmem>>, vector<2x1x8x28xbf16>
    %11 = vector.shape_cast %10 : vector<2x1x8x28xbf16> to vector<16x28xbf16>
    %c0_23 = arith.constant 0 : index
    %c0_24 = arith.constant 0 : index
    %c0_25 = arith.constant 0 : index
    %c0_26 = arith.constant 0 : index
    %12 = vector.load %arg8[%c0_23, %c0_24, %c0_25, %c0_26] : memref<2x1x8x28xbf16, #tpu.memory_space<vmem>>, vector<2x1x8x28xbf16>
    %13 = vector.shape_cast %12 : vector<2x1x8x28xbf16> to vector<16x28xbf16>
    %14 = tpu.concatenate %1, %3, %5, %7, %9, %11, %13 in 1 : vector<16x28xbf16>, vector<16x28xbf16>, vector<16x28xbf16>, vector<16x28xbf16>, vector<16x28xbf16>, vector<16x28xbf16>, vector<16x28xbf16> -> vector<16x196xbf16>
    %c0_27 = arith.constant 0 : index
    %c0_28 = arith.constant 0 : index
    %15 = vector.load %arg25[%c0_27, %c0_28] : memref<196x8xbf16, #tpu.memory_space<vmem>>, vector<196x8xbf16>
    %cst = arith.constant dense<0.000000e+00> : vector<16x8xf32>
    %16 = tpu.matmul %14, %15, %cst {dimension_numbers = #tpu.dot_dimension_numbers<[1], [0], [0], [1], [0, 0, 1, 1], [], []>} : vector<16x196xbf16>, vector<196x8xbf16>, vector<16x8xf32> -> vector<16x8xf32>
    %c0_29 = arith.constant 0 : index
    %c0_30 = arith.constant 0 : index
    %17 = vector.load %arg26[%c0_29, %c0_30] : memref<1x8xf32, #tpu.memory_space<vmem>>, vector<1x8xf32>
    %18 = vector.broadcast %17 : vector<1x8xf32> to vector<16x8xf32>
    %19 = arith.addf %16, %18 : vector<16x8xf32>
    %cst_31 = arith.constant 0.000000e+00 : f32
    %20 = vector.broadcast %cst_31 : f32 to vector<16x8xf32>
    %21 = arith.maximumf %19, %20 : vector<16x8xf32>
    %c8_i32 = arith.constant 8 : i32
    %22 = arith.muli %c8_i32, %arg1 : i32
    %c0_i32 = arith.constant 0 : i32
    %23 = arith.addi %22, %c0_i32 : i32
    %c1_i32 = arith.constant 1 : i32
    %24 = arith.subi %23, %c1_i32 : i32
    %c0_i32_32 = arith.constant 0 : i32
    %25 = arith.cmpi sge, %24, %c0_i32_32 : i32
    %c7_i32 = arith.constant 7 : i32
    %26 = arith.cmpi sle, %24, %c7_i32 : i32
    %27 = arith.andi %25, %26 : i1
    %28 = arith.extui %27 : i1 to i32
    %29 = arith.sitofp %28 : i32 to f32
    %30 = vector.shape_cast %21 : vector<16x8xf32> to vector<2x8x8xf32>
    %31 = vector.broadcast %29 : f32 to vector<2x8x8xf32>
    %32 = arith.mulf %30, %31 : vector<2x8x8xf32>
    %c0_33 = arith.constant 0 : index
    %c0_34 = arith.constant 0 : index
    %c0_35 = arith.constant 0 : index
    %c0_36 = arith.constant 0 : index
    %33 = vector.load %arg4[%c0_33, %c0_34, %c0_35, %c0_36] : memref<2x1x8x28xbf16, #tpu.memory_space<vmem>>, vector<2x1x8x28xbf16>
    %34 = vector.shape_cast %33 : vector<2x1x8x28xbf16> to vector<16x28xbf16>
    %c0_37 = arith.constant 0 : index
    %c0_38 = arith.constant 0 : index
    %c0_39 = arith.constant 0 : index
    %c0_40 = arith.constant 0 : index
    %35 = vector.load %arg5[%c0_37, %c0_38, %c0_39, %c0_40] : memref<2x1x8x28xbf16, #tpu.memory_space<vmem>>, vector<2x1x8x28xbf16>
    %36 = vector.shape_cast %35 : vector<2x1x8x28xbf16> to vector<16x28xbf16>
    %c0_41 = arith.constant 0 : index
    %c0_42 = arith.constant 0 : index
    %c0_43 = arith.constant 0 : index
    %c0_44 = arith.constant 0 : index
    %37 = vector.load %arg6[%c0_41, %c0_42, %c0_43, %c0_44] : memref<2x1x8x28xbf16, #tpu.memory_space<vmem>>, vector<2x1x8x28xbf16>
    %38 = vector.shape_cast %37 : vector<2x1x8x28xbf16> to vector<16x28xbf16>
    %c0_45 = arith.constant 0 : index
    %c0_46 = arith.constant 0 : index
    %c0_47 = arith.constant 0 : index
    %c0_48 = arith.constant 0 : index
    %39 = vector.load %arg7[%c0_45, %c0_46, %c0_47, %c0_48] : memref<2x1x8x28xbf16, #tpu.memory_space<vmem>>, vector<2x1x8x28xbf16>
    %40 = vector.shape_cast %39 : vector<2x1x8x28xbf16> to vector<16x28xbf16>
    %c0_49 = arith.constant 0 : index
    %c0_50 = arith.constant 0 : index
    %c0_51 = arith.constant 0 : index
    %c0_52 = arith.constant 0 : index
    %41 = vector.load %arg8[%c0_49, %c0_50, %c0_51, %c0_52] : memref<2x1x8x28xbf16, #tpu.memory_space<vmem>>, vector<2x1x8x28xbf16>
    %42 = vector.shape_cast %41 : vector<2x1x8x28xbf16> to vector<16x28xbf16>
    %c0_53 = arith.constant 0 : index
    %c0_54 = arith.constant 0 : index
    %c0_55 = arith.constant 0 : index
    %c0_56 = arith.constant 0 : index
    %43 = vector.load %arg9[%c0_53, %c0_54, %c0_55, %c0_56] : memref<2x1x8x28xbf16, #tpu.memory_space<vmem>>, vector<2x1x8x28xbf16>
    %44 = vector.shape_cast %43 : vector<2x1x8x28xbf16> to vector<16x28xbf16>
    %c0_57 = arith.constant 0 : index
    %c0_58 = arith.constant 0 : index
    %c0_59 = arith.constant 0 : index
    %c0_60 = arith.constant 0 : index
    %45 = vector.load %arg10[%c0_57, %c0_58, %c0_59, %c0_60] : memref<2x1x8x28xbf16, #tpu.memory_space<vmem>>, vector<2x1x8x28xbf16>
    %46 = vector.shape_cast %45 : vector<2x1x8x28xbf16> to vector<16x28xbf16>
    %47 = tpu.concatenate %34, %36, %38, %40, %42, %44, %46 in 1 : vector<16x28xbf16>, vector<16x28xbf16>, vector<16x28xbf16>, vector<16x28xbf16>, vector<16x28xbf16>, vector<16x28xbf16>, vector<16x28xbf16> -> vector<16x196xbf16>
    %c0_61 = arith.constant 0 : index
    %c0_62 = arith.constant 0 : index
    %48 = vector.load %arg25[%c0_61, %c0_62] : memref<196x8xbf16, #tpu.memory_space<vmem>>, vector<196x8xbf16>
    %cst_63 = arith.constant dense<0.000000e+00> : vector<16x8xf32>
    %49 = tpu.matmul %47, %48, %cst_63 {dimension_numbers = #tpu.dot_dimension_numbers<[1], [0], [0], [1], [0, 0, 1, 1], [], []>} : vector<16x196xbf16>, vector<196x8xbf16>, vector<16x8xf32> -> vector<16x8xf32>
    %c0_64 = arith.constant 0 : index
    %c0_65 = arith.constant 0 : index
    %50 = vector.load %arg26[%c0_64, %c0_65] : memref<1x8xf32, #tpu.memory_space<vmem>>, vector<1x8xf32>
    %51 = vector.broadcast %50 : vector<1x8xf32> to vector<16x8xf32>
    %52 = arith.addf %49, %51 : vector<16x8xf32>
    %cst_66 = arith.constant 0.000000e+00 : f32
    %53 = vector.broadcast %cst_66 : f32 to vector<16x8xf32>
    %54 = arith.maximumf %52, %53 : vector<16x8xf32>
    %c8_i32_67 = arith.constant 8 : i32
    %55 = arith.muli %c8_i32_67, %arg1 : i32
    %c1_i32_68 = arith.constant 1 : i32
    %56 = arith.addi %55, %c1_i32_68 : i32
    %c1_i32_69 = arith.constant 1 : i32
    %57 = arith.subi %56, %c1_i32_69 : i32
    %c0_i32_70 = arith.constant 0 : i32
    %58 = arith.cmpi sge, %57, %c0_i32_70 : i32
    %c7_i32_71 = arith.constant 7 : i32
    %59 = arith.cmpi sle, %57, %c7_i32_71 : i32
    %60 = arith.andi %58, %59 : i1
    %61 = arith.extui %60 : i1 to i32
    %62 = arith.sitofp %61 : i32 to f32
    %63 = vector.shape_cast %54 : vector<16x8xf32> to vector<2x8x8xf32>
    %64 = vector.broadcast %62 : f32 to vector<2x8x8xf32>
    %65 = arith.mulf %63, %64 : vector<2x8x8xf32>
    %c0_72 = arith.constant 0 : index
    %c0_73 = arith.constant 0 : index
    %c0_74 = arith.constant 0 : index
    %c0_75 = arith.constant 0 : index
    %66 = vector.load %arg6[%c0_72, %c0_73, %c0_74, %c0_75] : memref<2x1x8x28xbf16, #tpu.memory_space<vmem>>, vector<2x1x8x28xbf16>
    %67 = vector.shape_cast %66 : vector<2x1x8x28xbf16> to vector<16x28xbf16>
    %c0_76 = arith.constant 0 : index
    %c0_77 = arith.constant 0 : index
    %c0_78 = arith.constant 0 : index
    %c0_79 = arith.constant 0 : index
    %68 = vector.load %arg7[%c0_76, %c0_77, %c0_78, %c0_79] : memref<2x1x8x28xbf16, #tpu.memory_space<vmem>>, vector<2x1x8x28xbf16>
    %69 = vector.shape_cast %68 : vector<2x1x8x28xbf16> to vector<16x28xbf16>
    %c0_80 = arith.constant 0 : index
    %c0_81 = arith.constant 0 : index
    %c0_82 = arith.constant 0 : index
    %c0_83 = arith.constant 0 : index
    %70 = vector.load %arg8[%c0_80, %c0_81, %c0_82, %c0_83] : memref<2x1x8x28xbf16, #tpu.memory_space<vmem>>, vector<2x1x8x28xbf16>
    %71 = vector.shape_cast %70 : vector<2x1x8x28xbf16> to vector<16x28xbf16>
    %c0_84 = arith.constant 0 : index
    %c0_85 = arith.constant 0 : index
    %c0_86 = arith.constant 0 : index
    %c0_87 = arith.constant 0 : index
    %72 = vector.load %arg9[%c0_84, %c0_85, %c0_86, %c0_87] : memref<2x1x8x28xbf16, #tpu.memory_space<vmem>>, vector<2x1x8x28xbf16>
    %73 = vector.shape_cast %72 : vector<2x1x8x28xbf16> to vector<16x28xbf16>
    %c0_88 = arith.constant 0 : index
    %c0_89 = arith.constant 0 : index
    %c0_90 = arith.constant 0 : index
    %c0_91 = arith.constant 0 : index
    %74 = vector.load %arg10[%c0_88, %c0_89, %c0_90, %c0_91] : memref<2x1x8x28xbf16, #tpu.memory_space<vmem>>, vector<2x1x8x28xbf16>
    %75 = vector.shape_cast %74 : vector<2x1x8x28xbf16> to vector<16x28xbf16>
    %c0_92 = arith.constant 0 : index
    %c0_93 = arith.constant 0 : index
    %c0_94 = arith.constant 0 : index
    %c0_95 = arith.constant 0 : index
    %76 = vector.load %arg11[%c0_92, %c0_93, %c0_94, %c0_95] : memref<2x1x8x28xbf16, #tpu.memory_space<vmem>>, vector<2x1x8x28xbf16>
    %77 = vector.shape_cast %76 : vector<2x1x8x28xbf16> to vector<16x28xbf16>
    %c0_96 = arith.constant 0 : index
    %c0_97 = arith.constant 0 : index
    %c0_98 = arith.constant 0 : index
    %c0_99 = arith.constant 0 : index
    %78 = vector.load %arg12[%c0_96, %c0_97, %c0_98, %c0_99] : memref<2x1x8x28xbf16, #tpu.memory_space<vmem>>, vector<2x1x8x28xbf16>
    %79 = vector.shape_cast %78 : vector<2x1x8x28xbf16> to vector<16x28xbf16>
    %80 = tpu.concatenate %67, %69, %71, %73, %75, %77, %79 in 1 : vector<16x28xbf16>, vector<16x28xbf16>, vector<16x28xbf16>, vector<16x28xbf16>, vector<16x28xbf16>, vector<16x28xbf16>, vector<16x28xbf16> -> vector<16x196xbf16>
    %c0_100 = arith.constant 0 : index
    %c0_101 = arith.constant 0 : index
    %81 = vector.load %arg25[%c0_100, %c0_101] : memref<196x8xbf16, #tpu.memory_space<vmem>>, vector<196x8xbf16>
    %cst_102 = arith.constant dense<0.000000e+00> : vector<16x8xf32>
    %82 = tpu.matmul %80, %81, %cst_102 {dimension_numbers = #tpu.dot_dimension_numbers<[1], [0], [0], [1], [0, 0, 1, 1], [], []>} : vector<16x196xbf16>, vector<196x8xbf16>, vector<16x8xf32> -> vector<16x8xf32>
    %c0_103 = arith.constant 0 : index
    %c0_104 = arith.constant 0 : index
    %83 = vector.load %arg26[%c0_103, %c0_104] : memref<1x8xf32, #tpu.memory_space<vmem>>, vector<1x8xf32>
    %84 = vector.broadcast %83 : vector<1x8xf32> to vector<16x8xf32>
    %85 = arith.addf %82, %84 : vector<16x8xf32>
    %cst_105 = arith.constant 0.000000e+00 : f32
    %86 = vector.broadcast %cst_105 : f32 to vector<16x8xf32>
    %87 = arith.maximumf %85, %86 : vector<16x8xf32>
    %c8_i32_106 = arith.constant 8 : i32
    %88 = arith.muli %c8_i32_106, %arg1 : i32
    %c2_i32 = arith.constant 2 : i32
    %89 = arith.addi %88, %c2_i32 : i32
    %c1_i32_107 = arith.constant 1 : i32
    %90 = arith.subi %89, %c1_i32_107 : i32
    %c0_i32_108 = arith.constant 0 : i32
    %91 = arith.cmpi sge, %90, %c0_i32_108 : i32
    %c7_i32_109 = arith.constant 7 : i32
    %92 = arith.cmpi sle, %90, %c7_i32_109 : i32
    %93 = arith.andi %91, %92 : i1
    %94 = arith.extui %93 : i1 to i32
    %95 = arith.sitofp %94 : i32 to f32
    %96 = vector.shape_cast %87 : vector<16x8xf32> to vector<2x8x8xf32>
    %97 = vector.broadcast %95 : f32 to vector<2x8x8xf32>
    %98 = arith.mulf %96, %97 : vector<2x8x8xf32>
    %c0_110 = arith.constant 0 : index
    %c0_111 = arith.constant 0 : index
    %c0_112 = arith.constant 0 : index
    %c0_113 = arith.constant 0 : index
    %99 = vector.load %arg8[%c0_110, %c0_111, %c0_112, %c0_113] : memref<2x1x8x28xbf16, #tpu.memory_space<vmem>>, vector<2x1x8x28xbf16>
    %100 = vector.shape_cast %99 : vector<2x1x8x28xbf16> to vector<16x28xbf16>
    %c0_114 = arith.constant 0 : index
    %c0_115 = arith.constant 0 : index
    %c0_116 = arith.constant 0 : index
    %c0_117 = arith.constant 0 : index
    %101 = vector.load %arg9[%c0_114, %c0_115, %c0_116, %c0_117] : memref<2x1x8x28xbf16, #tpu.memory_space<vmem>>, vector<2x1x8x28xbf16>
    %102 = vector.shape_cast %101 : vector<2x1x8x28xbf16> to vector<16x28xbf16>
    %c0_118 = arith.constant 0 : index
    %c0_119 = arith.constant 0 : index
    %c0_120 = arith.constant 0 : index
    %c0_121 = arith.constant 0 : index
    %103 = vector.load %arg10[%c0_118, %c0_119, %c0_120, %c0_121] : memref<2x1x8x28xbf16, #tpu.memory_space<vmem>>, vector<2x1x8x28xbf16>
    %104 = vector.shape_cast %103 : vector<2x1x8x28xbf16> to vector<16x28xbf16>
    %c0_122 = arith.constant 0 : index
    %c0_123 = arith.constant 0 : index
    %c0_124 = arith.constant 0 : index
    %c0_125 = arith.constant 0 : index
    %105 = vector.load %arg11[%c0_122, %c0_123, %c0_124, %c0_125] : memref<2x1x8x28xbf16, #tpu.memory_space<vmem>>, vector<2x1x8x28xbf16>
    %106 = vector.shape_cast %105 : vector<2x1x8x28xbf16> to vector<16x28xbf16>
    %c0_126 = arith.constant 0 : index
    %c0_127 = arith.constant 0 : index
    %c0_128 = arith.constant 0 : index
    %c0_129 = arith.constant 0 : index
    %107 = vector.load %arg12[%c0_126, %c0_127, %c0_128, %c0_129] : memref<2x1x8x28xbf16, #tpu.memory_space<vmem>>, vector<2x1x8x28xbf16>
    %108 = vector.shape_cast %107 : vector<2x1x8x28xbf16> to vector<16x28xbf16>
    %c0_130 = arith.constant 0 : index
    %c0_131 = arith.constant 0 : index
    %c0_132 = arith.constant 0 : index
    %c0_133 = arith.constant 0 : index
    %109 = vector.load %arg13[%c0_130, %c0_131, %c0_132, %c0_133] : memref<2x1x8x28xbf16, #tpu.memory_space<vmem>>, vector<2x1x8x28xbf16>
    %110 = vector.shape_cast %109 : vector<2x1x8x28xbf16> to vector<16x28xbf16>
    %c0_134 = arith.constant 0 : index
    %c0_135 = arith.constant 0 : index
    %c0_136 = arith.constant 0 : index
    %c0_137 = arith.constant 0 : index
    %111 = vector.load %arg14[%c0_134, %c0_135, %c0_136, %c0_137] : memref<2x1x8x28xbf16, #tpu.memory_space<vmem>>, vector<2x1x8x28xbf16>
    %112 = vector.shape_cast %111 : vector<2x1x8x28xbf16> to vector<16x28xbf16>
    %113 = tpu.concatenate %100, %102, %104, %106, %108, %110, %112 in 1 : vector<16x28xbf16>, vector<16x28xbf16>, vector<16x28xbf16>, vector<16x28xbf16>, vector<16x28xbf16>, vector<16x28xbf16>, vector<16x28xbf16> -> vector<16x196xbf16>
    %c0_138 = arith.constant 0 : index
    %c0_139 = arith.constant 0 : index
    %114 = vector.load %arg25[%c0_138, %c0_139] : memref<196x8xbf16, #tpu.memory_space<vmem>>, vector<196x8xbf16>
    %cst_140 = arith.constant dense<0.000000e+00> : vector<16x8xf32>
    %115 = tpu.matmul %113, %114, %cst_140 {dimension_numbers = #tpu.dot_dimension_numbers<[1], [0], [0], [1], [0, 0, 1, 1], [], []>} : vector<16x196xbf16>, vector<196x8xbf16>, vector<16x8xf32> -> vector<16x8xf32>
    %c0_141 = arith.constant 0 : index
    %c0_142 = arith.constant 0 : index
    %116 = vector.load %arg26[%c0_141, %c0_142] : memref<1x8xf32, #tpu.memory_space<vmem>>, vector<1x8xf32>
    %117 = vector.broadcast %116 : vector<1x8xf32> to vector<16x8xf32>
    %118 = arith.addf %115, %117 : vector<16x8xf32>
    %cst_143 = arith.constant 0.000000e+00 : f32
    %119 = vector.broadcast %cst_143 : f32 to vector<16x8xf32>
    %120 = arith.maximumf %118, %119 : vector<16x8xf32>
    %c8_i32_144 = arith.constant 8 : i32
    %121 = arith.muli %c8_i32_144, %arg1 : i32
    %c3_i32 = arith.constant 3 : i32
    %122 = arith.addi %121, %c3_i32 : i32
    %c1_i32_145 = arith.constant 1 : i32
    %123 = arith.subi %122, %c1_i32_145 : i32
    %c0_i32_146 = arith.constant 0 : i32
    %124 = arith.cmpi sge, %123, %c0_i32_146 : i32
    %c7_i32_147 = arith.constant 7 : i32
    %125 = arith.cmpi sle, %123, %c7_i32_147 : i32
    %126 = arith.andi %124, %125 : i1
    %127 = arith.extui %126 : i1 to i32
    %128 = arith.sitofp %127 : i32 to f32
    %129 = vector.shape_cast %120 : vector<16x8xf32> to vector<2x8x8xf32>
    %130 = vector.broadcast %128 : f32 to vector<2x8x8xf32>
    %131 = arith.mulf %129, %130 : vector<2x8x8xf32>
    %c0_148 = arith.constant 0 : index
    %c0_149 = arith.constant 0 : index
    %c0_150 = arith.constant 0 : index
    %c0_151 = arith.constant 0 : index
    %132 = vector.load %arg10[%c0_148, %c0_149, %c0_150, %c0_151] : memref<2x1x8x28xbf16, #tpu.memory_space<vmem>>, vector<2x1x8x28xbf16>
    %133 = vector.shape_cast %132 : vector<2x1x8x28xbf16> to vector<16x28xbf16>
    %c0_152 = arith.constant 0 : index
    %c0_153 = arith.constant 0 : index
    %c0_154 = arith.constant 0 : index
    %c0_155 = arith.constant 0 : index
    %134 = vector.load %arg11[%c0_152, %c0_153, %c0_154, %c0_155] : memref<2x1x8x28xbf16, #tpu.memory_space<vmem>>, vector<2x1x8x28xbf16>
    %135 = vector.shape_cast %134 : vector<2x1x8x28xbf16> to vector<16x28xbf16>
    %c0_156 = arith.constant 0 : index
    %c0_157 = arith.constant 0 : index
    %c0_158 = arith.constant 0 : index
    %c0_159 = arith.constant 0 : index
    %136 = vector.load %arg12[%c0_156, %c0_157, %c0_158, %c0_159] : memref<2x1x8x28xbf16, #tpu.memory_space<vmem>>, vector<2x1x8x28xbf16>
    %137 = vector.shape_cast %136 : vector<2x1x8x28xbf16> to vector<16x28xbf16>
    %c0_160 = arith.constant 0 : index
    %c0_161 = arith.constant 0 : index
    %c0_162 = arith.constant 0 : index
    %c0_163 = arith.constant 0 : index
    %138 = vector.load %arg13[%c0_160, %c0_161, %c0_162, %c0_163] : memref<2x1x8x28xbf16, #tpu.memory_space<vmem>>, vector<2x1x8x28xbf16>
    %139 = vector.shape_cast %138 : vector<2x1x8x28xbf16> to vector<16x28xbf16>
    %c0_164 = arith.constant 0 : index
    %c0_165 = arith.constant 0 : index
    %c0_166 = arith.constant 0 : index
    %c0_167 = arith.constant 0 : index
    %140 = vector.load %arg14[%c0_164, %c0_165, %c0_166, %c0_167] : memref<2x1x8x28xbf16, #tpu.memory_space<vmem>>, vector<2x1x8x28xbf16>
    %141 = vector.shape_cast %140 : vector<2x1x8x28xbf16> to vector<16x28xbf16>
    %c0_168 = arith.constant 0 : index
    %c0_169 = arith.constant 0 : index
    %c0_170 = arith.constant 0 : index
    %c0_171 = arith.constant 0 : index
    %142 = vector.load %arg15[%c0_168, %c0_169, %c0_170, %c0_171] : memref<2x1x8x28xbf16, #tpu.memory_space<vmem>>, vector<2x1x8x28xbf16>
    %143 = vector.shape_cast %142 : vector<2x1x8x28xbf16> to vector<16x28xbf16>
    %c0_172 = arith.constant 0 : index
    %c0_173 = arith.constant 0 : index
    %c0_174 = arith.constant 0 : index
    %c0_175 = arith.constant 0 : index
    %144 = vector.load %arg16[%c0_172, %c0_173, %c0_174, %c0_175] : memref<2x1x8x28xbf16, #tpu.memory_space<vmem>>, vector<2x1x8x28xbf16>
    %145 = vector.shape_cast %144 : vector<2x1x8x28xbf16> to vector<16x28xbf16>
    %146 = tpu.concatenate %133, %135, %137, %139, %141, %143, %145 in 1 : vector<16x28xbf16>, vector<16x28xbf16>, vector<16x28xbf16>, vector<16x28xbf16>, vector<16x28xbf16>, vector<16x28xbf16>, vector<16x28xbf16> -> vector<16x196xbf16>
    %c0_176 = arith.constant 0 : index
    %c0_177 = arith.constant 0 : index
    %147 = vector.load %arg25[%c0_176, %c0_177] : memref<196x8xbf16, #tpu.memory_space<vmem>>, vector<196x8xbf16>
    %cst_178 = arith.constant dense<0.000000e+00> : vector<16x8xf32>
    %148 = tpu.matmul %146, %147, %cst_178 {dimension_numbers = #tpu.dot_dimension_numbers<[1], [0], [0], [1], [0, 0, 1, 1], [], []>} : vector<16x196xbf16>, vector<196x8xbf16>, vector<16x8xf32> -> vector<16x8xf32>
    %c0_179 = arith.constant 0 : index
    %c0_180 = arith.constant 0 : index
    %149 = vector.load %arg26[%c0_179, %c0_180] : memref<1x8xf32, #tpu.memory_space<vmem>>, vector<1x8xf32>
    %150 = vector.broadcast %149 : vector<1x8xf32> to vector<16x8xf32>
    %151 = arith.addf %148, %150 : vector<16x8xf32>
    %cst_181 = arith.constant 0.000000e+00 : f32
    %152 = vector.broadcast %cst_181 : f32 to vector<16x8xf32>
    %153 = arith.maximumf %151, %152 : vector<16x8xf32>
    %c8_i32_182 = arith.constant 8 : i32
    %154 = arith.muli %c8_i32_182, %arg1 : i32
    %c4_i32 = arith.constant 4 : i32
    %155 = arith.addi %154, %c4_i32 : i32
    %c1_i32_183 = arith.constant 1 : i32
    %156 = arith.subi %155, %c1_i32_183 : i32
    %c0_i32_184 = arith.constant 0 : i32
    %157 = arith.cmpi sge, %156, %c0_i32_184 : i32
    %c7_i32_185 = arith.constant 7 : i32
    %158 = arith.cmpi sle, %156, %c7_i32_185 : i32
    %159 = arith.andi %157, %158 : i1
    %160 = arith.extui %159 : i1 to i32
    %161 = arith.sitofp %160 : i32 to f32
    %162 = vector.shape_cast %153 : vector<16x8xf32> to vector<2x8x8xf32>
    %163 = vector.broadcast %161 : f32 to vector<2x8x8xf32>
    %164 = arith.mulf %162, %163 : vector<2x8x8xf32>
    %c0_186 = arith.constant 0 : index
    %c0_187 = arith.constant 0 : index
    %c0_188 = arith.constant 0 : index
    %c0_189 = arith.constant 0 : index
    %165 = vector.load %arg12[%c0_186, %c0_187, %c0_188, %c0_189] : memref<2x1x8x28xbf16, #tpu.memory_space<vmem>>, vector<2x1x8x28xbf16>
    %166 = vector.shape_cast %165 : vector<2x1x8x28xbf16> to vector<16x28xbf16>
    %c0_190 = arith.constant 0 : index
    %c0_191 = arith.constant 0 : index
    %c0_192 = arith.constant 0 : index
    %c0_193 = arith.constant 0 : index
    %167 = vector.load %arg13[%c0_190, %c0_191, %c0_192, %c0_193] : memref<2x1x8x28xbf16, #tpu.memory_space<vmem>>, vector<2x1x8x28xbf16>
    %168 = vector.shape_cast %167 : vector<2x1x8x28xbf16> to vector<16x28xbf16>
    %c0_194 = arith.constant 0 : index
    %c0_195 = arith.constant 0 : index
    %c0_196 = arith.constant 0 : index
    %c0_197 = arith.constant 0 : index
    %169 = vector.load %arg14[%c0_194, %c0_195, %c0_196, %c0_197] : memref<2x1x8x28xbf16, #tpu.memory_space<vmem>>, vector<2x1x8x28xbf16>
    %170 = vector.shape_cast %169 : vector<2x1x8x28xbf16> to vector<16x28xbf16>
    %c0_198 = arith.constant 0 : index
    %c0_199 = arith.constant 0 : index
    %c0_200 = arith.constant 0 : index
    %c0_201 = arith.constant 0 : index
    %171 = vector.load %arg15[%c0_198, %c0_199, %c0_200, %c0_201] : memref<2x1x8x28xbf16, #tpu.memory_space<vmem>>, vector<2x1x8x28xbf16>
    %172 = vector.shape_cast %171 : vector<2x1x8x28xbf16> to vector<16x28xbf16>
    %c0_202 = arith.constant 0 : index
    %c0_203 = arith.constant 0 : index
    %c0_204 = arith.constant 0 : index
    %c0_205 = arith.constant 0 : index
    %173 = vector.load %arg16[%c0_202, %c0_203, %c0_204, %c0_205] : memref<2x1x8x28xbf16, #tpu.memory_space<vmem>>, vector<2x1x8x28xbf16>
    %174 = vector.shape_cast %173 : vector<2x1x8x28xbf16> to vector<16x28xbf16>
    %c0_206 = arith.constant 0 : index
    %c0_207 = arith.constant 0 : index
    %c0_208 = arith.constant 0 : index
    %c0_209 = arith.constant 0 : index
    %175 = vector.load %arg17[%c0_206, %c0_207, %c0_208, %c0_209] : memref<2x1x8x28xbf16, #tpu.memory_space<vmem>>, vector<2x1x8x28xbf16>
    %176 = vector.shape_cast %175 : vector<2x1x8x28xbf16> to vector<16x28xbf16>
    %c0_210 = arith.constant 0 : index
    %c0_211 = arith.constant 0 : index
    %c0_212 = arith.constant 0 : index
    %c0_213 = arith.constant 0 : index
    %177 = vector.load %arg18[%c0_210, %c0_211, %c0_212, %c0_213] : memref<2x1x8x28xbf16, #tpu.memory_space<vmem>>, vector<2x1x8x28xbf16>
    %178 = vector.shape_cast %177 : vector<2x1x8x28xbf16> to vector<16x28xbf16>
    %179 = tpu.concatenate %166, %168, %170, %172, %174, %176, %178 in 1 : vector<16x28xbf16>, vector<16x28xbf16>, vector<16x28xbf16>, vector<16x28xbf16>, vector<16x28xbf16>, vector<16x28xbf16>, vector<16x28xbf16> -> vector<16x196xbf16>
    %c0_214 = arith.constant 0 : index
    %c0_215 = arith.constant 0 : index
    %180 = vector.load %arg25[%c0_214, %c0_215] : memref<196x8xbf16, #tpu.memory_space<vmem>>, vector<196x8xbf16>
    %cst_216 = arith.constant dense<0.000000e+00> : vector<16x8xf32>
    %181 = tpu.matmul %179, %180, %cst_216 {dimension_numbers = #tpu.dot_dimension_numbers<[1], [0], [0], [1], [0, 0, 1, 1], [], []>} : vector<16x196xbf16>, vector<196x8xbf16>, vector<16x8xf32> -> vector<16x8xf32>
    %c0_217 = arith.constant 0 : index
    %c0_218 = arith.constant 0 : index
    %182 = vector.load %arg26[%c0_217, %c0_218] : memref<1x8xf32, #tpu.memory_space<vmem>>, vector<1x8xf32>
    %183 = vector.broadcast %182 : vector<1x8xf32> to vector<16x8xf32>
    %184 = arith.addf %181, %183 : vector<16x8xf32>
    %cst_219 = arith.constant 0.000000e+00 : f32
    %185 = vector.broadcast %cst_219 : f32 to vector<16x8xf32>
    %186 = arith.maximumf %184, %185 : vector<16x8xf32>
    %c8_i32_220 = arith.constant 8 : i32
    %187 = arith.muli %c8_i32_220, %arg1 : i32
    %c5_i32 = arith.constant 5 : i32
    %188 = arith.addi %187, %c5_i32 : i32
    %c1_i32_221 = arith.constant 1 : i32
    %189 = arith.subi %188, %c1_i32_221 : i32
    %c0_i32_222 = arith.constant 0 : i32
    %190 = arith.cmpi sge, %189, %c0_i32_222 : i32
    %c7_i32_223 = arith.constant 7 : i32
    %191 = arith.cmpi sle, %189, %c7_i32_223 : i32
    %192 = arith.andi %190, %191 : i1
    %193 = arith.extui %192 : i1 to i32
    %194 = arith.sitofp %193 : i32 to f32
    %195 = vector.shape_cast %186 : vector<16x8xf32> to vector<2x8x8xf32>
    %196 = vector.broadcast %194 : f32 to vector<2x8x8xf32>
    %197 = arith.mulf %195, %196 : vector<2x8x8xf32>
    %c0_224 = arith.constant 0 : index
    %c0_225 = arith.constant 0 : index
    %c0_226 = arith.constant 0 : index
    %c0_227 = arith.constant 0 : index
    %198 = vector.load %arg14[%c0_224, %c0_225, %c0_226, %c0_227] : memref<2x1x8x28xbf16, #tpu.memory_space<vmem>>, vector<2x1x8x28xbf16>
    %199 = vector.shape_cast %198 : vector<2x1x8x28xbf16> to vector<16x28xbf16>
    %c0_228 = arith.constant 0 : index
    %c0_229 = arith.constant 0 : index
    %c0_230 = arith.constant 0 : index
    %c0_231 = arith.constant 0 : index
    %200 = vector.load %arg15[%c0_228, %c0_229, %c0_230, %c0_231] : memref<2x1x8x28xbf16, #tpu.memory_space<vmem>>, vector<2x1x8x28xbf16>
    %201 = vector.shape_cast %200 : vector<2x1x8x28xbf16> to vector<16x28xbf16>
    %c0_232 = arith.constant 0 : index
    %c0_233 = arith.constant 0 : index
    %c0_234 = arith.constant 0 : index
    %c0_235 = arith.constant 0 : index
    %202 = vector.load %arg16[%c0_232, %c0_233, %c0_234, %c0_235] : memref<2x1x8x28xbf16, #tpu.memory_space<vmem>>, vector<2x1x8x28xbf16>
    %203 = vector.shape_cast %202 : vector<2x1x8x28xbf16> to vector<16x28xbf16>
    %c0_236 = arith.constant 0 : index
    %c0_237 = arith.constant 0 : index
    %c0_238 = arith.constant 0 : index
    %c0_239 = arith.constant 0 : index
    %204 = vector.load %arg17[%c0_236, %c0_237, %c0_238, %c0_239] : memref<2x1x8x28xbf16, #tpu.memory_space<vmem>>, vector<2x1x8x28xbf16>
    %205 = vector.shape_cast %204 : vector<2x1x8x28xbf16> to vector<16x28xbf16>
    %c0_240 = arith.constant 0 : index
    %c0_241 = arith.constant 0 : index
    %c0_242 = arith.constant 0 : index
    %c0_243 = arith.constant 0 : index
    %206 = vector.load %arg18[%c0_240, %c0_241, %c0_242, %c0_243] : memref<2x1x8x28xbf16, #tpu.memory_space<vmem>>, vector<2x1x8x28xbf16>
    %207 = vector.shape_cast %206 : vector<2x1x8x28xbf16> to vector<16x28xbf16>
    %c0_244 = arith.constant 0 : index
    %c0_245 = arith.constant 0 : index
    %c0_246 = arith.constant 0 : index
    %c0_247 = arith.constant 0 : index
    %208 = vector.load %arg19[%c0_244, %c0_245, %c0_246, %c0_247] : memref<2x1x8x28xbf16, #tpu.memory_space<vmem>>, vector<2x1x8x28xbf16>
    %209 = vector.shape_cast %208 : vector<2x1x8x28xbf16> to vector<16x28xbf16>
    %c0_248 = arith.constant 0 : index
    %c0_249 = arith.constant 0 : index
    %c0_250 = arith.constant 0 : index
    %c0_251 = arith.constant 0 : index
    %210 = vector.load %arg20[%c0_248, %c0_249, %c0_250, %c0_251] : memref<2x1x8x28xbf16, #tpu.memory_space<vmem>>, vector<2x1x8x28xbf16>
    %211 = vector.shape_cast %210 : vector<2x1x8x28xbf16> to vector<16x28xbf16>
    %212 = tpu.concatenate %199, %201, %203, %205, %207, %209, %211 in 1 : vector<16x28xbf16>, vector<16x28xbf16>, vector<16x28xbf16>, vector<16x28xbf16>, vector<16x28xbf16>, vector<16x28xbf16>, vector<16x28xbf16> -> vector<16x196xbf16>
    %c0_252 = arith.constant 0 : index
    %c0_253 = arith.constant 0 : index
    %213 = vector.load %arg25[%c0_252, %c0_253] : memref<196x8xbf16, #tpu.memory_space<vmem>>, vector<196x8xbf16>
    %cst_254 = arith.constant dense<0.000000e+00> : vector<16x8xf32>
    %214 = tpu.matmul %212, %213, %cst_254 {dimension_numbers = #tpu.dot_dimension_numbers<[1], [0], [0], [1], [0, 0, 1, 1], [], []>} : vector<16x196xbf16>, vector<196x8xbf16>, vector<16x8xf32> -> vector<16x8xf32>
    %c0_255 = arith.constant 0 : index
    %c0_256 = arith.constant 0 : index
    %215 = vector.load %arg26[%c0_255, %c0_256] : memref<1x8xf32, #tpu.memory_space<vmem>>, vector<1x8xf32>
    %216 = vector.broadcast %215 : vector<1x8xf32> to vector<16x8xf32>
    %217 = arith.addf %214, %216 : vector<16x8xf32>
    %cst_257 = arith.constant 0.000000e+00 : f32
    %218 = vector.broadcast %cst_257 : f32 to vector<16x8xf32>
    %219 = arith.maximumf %217, %218 : vector<16x8xf32>
    %c8_i32_258 = arith.constant 8 : i32
    %220 = arith.muli %c8_i32_258, %arg1 : i32
    %c6_i32 = arith.constant 6 : i32
    %221 = arith.addi %220, %c6_i32 : i32
    %c1_i32_259 = arith.constant 1 : i32
    %222 = arith.subi %221, %c1_i32_259 : i32
    %c0_i32_260 = arith.constant 0 : i32
    %223 = arith.cmpi sge, %222, %c0_i32_260 : i32
    %c7_i32_261 = arith.constant 7 : i32
    %224 = arith.cmpi sle, %222, %c7_i32_261 : i32
    %225 = arith.andi %223, %224 : i1
    %226 = arith.extui %225 : i1 to i32
    %227 = arith.sitofp %226 : i32 to f32
    %228 = vector.shape_cast %219 : vector<16x8xf32> to vector<2x8x8xf32>
    %229 = vector.broadcast %227 : f32 to vector<2x8x8xf32>
    %230 = arith.mulf %228, %229 : vector<2x8x8xf32>
    %c0_262 = arith.constant 0 : index
    %c0_263 = arith.constant 0 : index
    %c0_264 = arith.constant 0 : index
    %c0_265 = arith.constant 0 : index
    %231 = vector.load %arg16[%c0_262, %c0_263, %c0_264, %c0_265] : memref<2x1x8x28xbf16, #tpu.memory_space<vmem>>, vector<2x1x8x28xbf16>
    %232 = vector.shape_cast %231 : vector<2x1x8x28xbf16> to vector<16x28xbf16>
    %c0_266 = arith.constant 0 : index
    %c0_267 = arith.constant 0 : index
    %c0_268 = arith.constant 0 : index
    %c0_269 = arith.constant 0 : index
    %233 = vector.load %arg17[%c0_266, %c0_267, %c0_268, %c0_269] : memref<2x1x8x28xbf16, #tpu.memory_space<vmem>>, vector<2x1x8x28xbf16>
    %234 = vector.shape_cast %233 : vector<2x1x8x28xbf16> to vector<16x28xbf16>
    %c0_270 = arith.constant 0 : index
    %c0_271 = arith.constant 0 : index
    %c0_272 = arith.constant 0 : index
    %c0_273 = arith.constant 0 : index
    %235 = vector.load %arg18[%c0_270, %c0_271, %c0_272, %c0_273] : memref<2x1x8x28xbf16, #tpu.memory_space<vmem>>, vector<2x1x8x28xbf16>
    %236 = vector.shape_cast %235 : vector<2x1x8x28xbf16> to vector<16x28xbf16>
    %c0_274 = arith.constant 0 : index
    %c0_275 = arith.constant 0 : index
    %c0_276 = arith.constant 0 : index
    %c0_277 = arith.constant 0 : index
    %237 = vector.load %arg19[%c0_274, %c0_275, %c0_276, %c0_277] : memref<2x1x8x28xbf16, #tpu.memory_space<vmem>>, vector<2x1x8x28xbf16>
    %238 = vector.shape_cast %237 : vector<2x1x8x28xbf16> to vector<16x28xbf16>
    %c0_278 = arith.constant 0 : index
    %c0_279 = arith.constant 0 : index
    %c0_280 = arith.constant 0 : index
    %c0_281 = arith.constant 0 : index
    %239 = vector.load %arg20[%c0_278, %c0_279, %c0_280, %c0_281] : memref<2x1x8x28xbf16, #tpu.memory_space<vmem>>, vector<2x1x8x28xbf16>
    %240 = vector.shape_cast %239 : vector<2x1x8x28xbf16> to vector<16x28xbf16>
    %c0_282 = arith.constant 0 : index
    %c0_283 = arith.constant 0 : index
    %c0_284 = arith.constant 0 : index
    %c0_285 = arith.constant 0 : index
    %241 = vector.load %arg21[%c0_282, %c0_283, %c0_284, %c0_285] : memref<2x1x8x28xbf16, #tpu.memory_space<vmem>>, vector<2x1x8x28xbf16>
    %242 = vector.shape_cast %241 : vector<2x1x8x28xbf16> to vector<16x28xbf16>
    %c0_286 = arith.constant 0 : index
    %c0_287 = arith.constant 0 : index
    %c0_288 = arith.constant 0 : index
    %c0_289 = arith.constant 0 : index
    %243 = vector.load %arg22[%c0_286, %c0_287, %c0_288, %c0_289] : memref<2x1x8x28xbf16, #tpu.memory_space<vmem>>, vector<2x1x8x28xbf16>
    %244 = vector.shape_cast %243 : vector<2x1x8x28xbf16> to vector<16x28xbf16>
    %245 = tpu.concatenate %232, %234, %236, %238, %240, %242, %244 in 1 : vector<16x28xbf16>, vector<16x28xbf16>, vector<16x28xbf16>, vector<16x28xbf16>, vector<16x28xbf16>, vector<16x28xbf16>, vector<16x28xbf16> -> vector<16x196xbf16>
    %c0_290 = arith.constant 0 : index
    %c0_291 = arith.constant 0 : index
    %246 = vector.load %arg25[%c0_290, %c0_291] : memref<196x8xbf16, #tpu.memory_space<vmem>>, vector<196x8xbf16>
    %cst_292 = arith.constant dense<0.000000e+00> : vector<16x8xf32>
    %247 = tpu.matmul %245, %246, %cst_292 {dimension_numbers = #tpu.dot_dimension_numbers<[1], [0], [0], [1], [0, 0, 1, 1], [], []>} : vector<16x196xbf16>, vector<196x8xbf16>, vector<16x8xf32> -> vector<16x8xf32>
    %c0_293 = arith.constant 0 : index
    %c0_294 = arith.constant 0 : index
    %248 = vector.load %arg26[%c0_293, %c0_294] : memref<1x8xf32, #tpu.memory_space<vmem>>, vector<1x8xf32>
    %249 = vector.broadcast %248 : vector<1x8xf32> to vector<16x8xf32>
    %250 = arith.addf %247, %249 : vector<16x8xf32>
    %cst_295 = arith.constant 0.000000e+00 : f32
    %251 = vector.broadcast %cst_295 : f32 to vector<16x8xf32>
    %252 = arith.maximumf %250, %251 : vector<16x8xf32>
    %c8_i32_296 = arith.constant 8 : i32
    %253 = arith.muli %c8_i32_296, %arg1 : i32
    %c7_i32_297 = arith.constant 7 : i32
    %254 = arith.addi %253, %c7_i32_297 : i32
    %c1_i32_298 = arith.constant 1 : i32
    %255 = arith.subi %254, %c1_i32_298 : i32
    %c0_i32_299 = arith.constant 0 : i32
    %256 = arith.cmpi sge, %255, %c0_i32_299 : i32
    %c7_i32_300 = arith.constant 7 : i32
    %257 = arith.cmpi sle, %255, %c7_i32_300 : i32
    %258 = arith.andi %256, %257 : i1
    %259 = arith.extui %258 : i1 to i32
    %260 = arith.sitofp %259 : i32 to f32
    %261 = vector.shape_cast %252 : vector<16x8xf32> to vector<2x8x8xf32>
    %262 = vector.broadcast %260 : f32 to vector<2x8x8xf32>
    %263 = arith.mulf %261, %262 : vector<2x8x8xf32>
    %c0_301 = arith.constant 0 : index
    %c0_302 = arith.constant 0 : index
    %c0_303 = arith.constant 0 : index
    %c0_304 = arith.constant 0 : index
    %264 = vector.load %arg18[%c0_301, %c0_302, %c0_303, %c0_304] : memref<2x1x8x28xbf16, #tpu.memory_space<vmem>>, vector<2x1x8x28xbf16>
    %265 = vector.shape_cast %264 : vector<2x1x8x28xbf16> to vector<16x28xbf16>
    %c0_305 = arith.constant 0 : index
    %c0_306 = arith.constant 0 : index
    %c0_307 = arith.constant 0 : index
    %c0_308 = arith.constant 0 : index
    %266 = vector.load %arg19[%c0_305, %c0_306, %c0_307, %c0_308] : memref<2x1x8x28xbf16, #tpu.memory_space<vmem>>, vector<2x1x8x28xbf16>
    %267 = vector.shape_cast %266 : vector<2x1x8x28xbf16> to vector<16x28xbf16>
    %c0_309 = arith.constant 0 : index
    %c0_310 = arith.constant 0 : index
    %c0_311 = arith.constant 0 : index
    %c0_312 = arith.constant 0 : index
    %268 = vector.load %arg20[%c0_309, %c0_310, %c0_311, %c0_312] : memref<2x1x8x28xbf16, #tpu.memory_space<vmem>>, vector<2x1x8x28xbf16>
    %269 = vector.shape_cast %268 : vector<2x1x8x28xbf16> to vector<16x28xbf16>
    %c0_313 = arith.constant 0 : index
    %c0_314 = arith.constant 0 : index
    %c0_315 = arith.constant 0 : index
    %c0_316 = arith.constant 0 : index
    %270 = vector.load %arg21[%c0_313, %c0_314, %c0_315, %c0_316] : memref<2x1x8x28xbf16, #tpu.memory_space<vmem>>, vector<2x1x8x28xbf16>
    %271 = vector.shape_cast %270 : vector<2x1x8x28xbf16> to vector<16x28xbf16>
    %c0_317 = arith.constant 0 : index
    %c0_318 = arith.constant 0 : index
    %c0_319 = arith.constant 0 : index
    %c0_320 = arith.constant 0 : index
    %272 = vector.load %arg22[%c0_317, %c0_318, %c0_319, %c0_320] : memref<2x1x8x28xbf16, #tpu.memory_space<vmem>>, vector<2x1x8x28xbf16>
    %273 = vector.shape_cast %272 : vector<2x1x8x28xbf16> to vector<16x28xbf16>
    %c0_321 = arith.constant 0 : index
    %c0_322 = arith.constant 0 : index
    %c0_323 = arith.constant 0 : index
    %c0_324 = arith.constant 0 : index
    %274 = vector.load %arg23[%c0_321, %c0_322, %c0_323, %c0_324] : memref<2x1x8x28xbf16, #tpu.memory_space<vmem>>, vector<2x1x8x28xbf16>
    %275 = vector.shape_cast %274 : vector<2x1x8x28xbf16> to vector<16x28xbf16>
    %c0_325 = arith.constant 0 : index
    %c0_326 = arith.constant 0 : index
    %c0_327 = arith.constant 0 : index
    %c0_328 = arith.constant 0 : index
    %276 = vector.load %arg24[%c0_325, %c0_326, %c0_327, %c0_328] : memref<2x1x8x28xbf16, #tpu.memory_space<vmem>>, vector<2x1x8x28xbf16>
    %277 = vector.shape_cast %276 : vector<2x1x8x28xbf16> to vector<16x28xbf16>
    %278 = tpu.concatenate %265, %267, %269, %271, %273, %275, %277 in 1 : vector<16x28xbf16>, vector<16x28xbf16>, vector<16x28xbf16>, vector<16x28xbf16>, vector<16x28xbf16>, vector<16x28xbf16>, vector<16x28xbf16> -> vector<16x196xbf16>
    %c0_329 = arith.constant 0 : index
    %c0_330 = arith.constant 0 : index
    %279 = vector.load %arg25[%c0_329, %c0_330] : memref<196x8xbf16, #tpu.memory_space<vmem>>, vector<196x8xbf16>
    %cst_331 = arith.constant dense<0.000000e+00> : vector<16x8xf32>
    %280 = tpu.matmul %278, %279, %cst_331 {dimension_numbers = #tpu.dot_dimension_numbers<[1], [0], [0], [1], [0, 0, 1, 1], [], []>} : vector<16x196xbf16>, vector<196x8xbf16>, vector<16x8xf32> -> vector<16x8xf32>
    %c0_332 = arith.constant 0 : index
    %c0_333 = arith.constant 0 : index
    %281 = vector.load %arg26[%c0_332, %c0_333] : memref<1x8xf32, #tpu.memory_space<vmem>>, vector<1x8xf32>
    %282 = vector.broadcast %281 : vector<1x8xf32> to vector<16x8xf32>
    %283 = arith.addf %280, %282 : vector<16x8xf32>
    %cst_334 = arith.constant 0.000000e+00 : f32
    %284 = vector.broadcast %cst_334 : f32 to vector<16x8xf32>
    %285 = arith.maximumf %283, %284 : vector<16x8xf32>
    %c8_i32_335 = arith.constant 8 : i32
    %286 = arith.muli %c8_i32_335, %arg1 : i32
    %c8_i32_336 = arith.constant 8 : i32
    %287 = arith.addi %286, %c8_i32_336 : i32
    %c1_i32_337 = arith.constant 1 : i32
    %288 = arith.subi %287, %c1_i32_337 : i32
    %c0_i32_338 = arith.constant 0 : i32
    %289 = arith.cmpi sge, %288, %c0_i32_338 : i32
    %c7_i32_339 = arith.constant 7 : i32
    %290 = arith.cmpi sle, %288, %c7_i32_339 : i32
    %291 = arith.andi %289, %290 : i1
    %292 = arith.extui %291 : i1 to i32
    %293 = arith.sitofp %292 : i32 to f32
    %294 = vector.shape_cast %285 : vector<16x8xf32> to vector<2x8x8xf32>
    %295 = vector.broadcast %293 : f32 to vector<2x8x8xf32>
    %296 = arith.mulf %294, %295 : vector<2x8x8xf32>
    %cst_340 = arith.constant 0.000000e+00 : f32
    %297 = vector.broadcast %cst_340 : f32 to vector<2x1x8xf32>
    %298 = arith.maximumf %32, %65 : vector<2x8x8xf32>
    %299 = arith.maximumf %298, %98 : vector<2x8x8xf32>
    %c0_341 = arith.constant 0 : index
    %c0_342 = arith.constant 0 : index
    %c0_343 = arith.constant 0 : index
    %300 = vector.load %arg28[%c0_341, %c0_342, %c0_343] : memref<2x10x8xf32, #tpu.memory_space<vmem>>, vector<2x1x8xf32>
    tpu.vector_store %arg28[%c0_341, %c0_342, %c0_343], %297 {strides = array<i32>} : memref<2x10x8xf32, #tpu.memory_space<vmem>>, vector<2x1x8xf32>,
    %c0_344 = arith.constant 0 : index
    %c1 = arith.constant 1 : index
    %c0_345 = arith.constant 0 : index
    %301 = vector.load %arg28[%c0_344, %c1, %c0_345] : memref<2x10x8xf32, #tpu.memory_space<vmem>>, vector<2x8x8xf32>
    tpu.vector_store %arg28[%c0_344, %c1, %c0_345], %299 {strides = array<i32>} : memref<2x10x8xf32, #tpu.memory_space<vmem>>, vector<2x8x8xf32>,
    %c0_346 = arith.constant 0 : index
    %c9 = arith.constant 9 : index
    %c0_347 = arith.constant 0 : index
    %302 = vector.load %arg28[%c0_346, %c9, %c0_347] : memref<2x10x8xf32, #tpu.memory_space<vmem>>, vector<2x1x8xf32>
    tpu.vector_store %arg28[%c0_346, %c9, %c0_347], %297 {strides = array<i32>} : memref<2x10x8xf32, #tpu.memory_space<vmem>>, vector<2x1x8xf32>,
    %c0_348 = arith.constant 0 : index
    %c0_349 = arith.constant 0 : index
    %c0_350 = arith.constant 0 : index
    %303 = tpu.strided_load %arg28[%c0_348, %c0_349, %c0_350] {strides = array<i32: 1, 8, 1>} : memref<2x10x8xf32, #tpu.memory_space<vmem>>, vector<2x1x8xf32>
    %c0_351 = arith.constant 0 : index
    %c1_352 = arith.constant 1 : index
    %c0_353 = arith.constant 0 : index
    %304 = tpu.strided_load %arg28[%c0_351, %c1_352, %c0_353] {strides = array<i32: 1, 8, 1>} : memref<2x10x8xf32, #tpu.memory_space<vmem>>, vector<2x1x8xf32>
    %c0_354 = arith.constant 0 : index
    %c2 = arith.constant 2 : index
    %c0_355 = arith.constant 0 : index
    %305 = tpu.strided_load %arg28[%c0_354, %c2, %c0_355] {strides = array<i32: 1, 8, 1>} : memref<2x10x8xf32, #tpu.memory_space<vmem>>, vector<2x1x8xf32>
    %306 = arith.maximumf %303, %304 : vector<2x1x8xf32>
    %307 = arith.maximumf %306, %305 : vector<2x1x8xf32>
    %c0_356 = arith.constant 0 : index
    %c2_357 = arith.constant 2 : index
    %c0_358 = arith.constant 0 : index
    %308 = tpu.strided_load %arg28[%c0_356, %c2_357, %c0_358] {strides = array<i32: 1, 8, 1>} : memref<2x10x8xf32, #tpu.memory_space<vmem>>, vector<2x1x8xf32>
    %c0_359 = arith.constant 0 : index
    %c3 = arith.constant 3 : index
    %c0_360 = arith.constant 0 : index
    %309 = tpu.strided_load %arg28[%c0_359, %c3, %c0_360] {strides = array<i32: 1, 8, 1>} : memref<2x10x8xf32, #tpu.memory_space<vmem>>, vector<2x1x8xf32>
    %c0_361 = arith.constant 0 : index
    %c4 = arith.constant 4 : index
    %c0_362 = arith.constant 0 : index
    %310 = tpu.strided_load %arg28[%c0_361, %c4, %c0_362] {strides = array<i32: 1, 8, 1>} : memref<2x10x8xf32, #tpu.memory_space<vmem>>, vector<2x1x8xf32>
    %311 = arith.maximumf %308, %309 : vector<2x1x8xf32>
    %312 = arith.maximumf %311, %310 : vector<2x1x8xf32>
    %c0_363 = arith.constant 0 : index
    %c4_364 = arith.constant 4 : index
    %c0_365 = arith.constant 0 : index
    %313 = tpu.strided_load %arg28[%c0_363, %c4_364, %c0_365] {strides = array<i32: 1, 8, 1>} : memref<2x10x8xf32, #tpu.memory_space<vmem>>, vector<2x1x8xf32>
    %c0_366 = arith.constant 0 : index
    %c5 = arith.constant 5 : index
    %c0_367 = arith.constant 0 : index
    %314 = tpu.strided_load %arg28[%c0_366, %c5, %c0_367] {strides = array<i32: 1, 8, 1>} : memref<2x10x8xf32, #tpu.memory_space<vmem>>, vector<2x1x8xf32>
    %c0_368 = arith.constant 0 : index
    %c6 = arith.constant 6 : index
    %c0_369 = arith.constant 0 : index
    %315 = tpu.strided_load %arg28[%c0_368, %c6, %c0_369] {strides = array<i32: 1, 8, 1>} : memref<2x10x8xf32, #tpu.memory_space<vmem>>, vector<2x1x8xf32>
    %316 = arith.maximumf %313, %314 : vector<2x1x8xf32>
    %317 = arith.maximumf %316, %315 : vector<2x1x8xf32>
    %c0_370 = arith.constant 0 : index
    %c6_371 = arith.constant 6 : index
    %c0_372 = arith.constant 0 : index
    %318 = tpu.strided_load %arg28[%c0_370, %c6_371, %c0_372] {strides = array<i32: 1, 8, 1>} : memref<2x10x8xf32, #tpu.memory_space<vmem>>, vector<2x1x8xf32>
    %c0_373 = arith.constant 0 : index
    %c7 = arith.constant 7 : index
    %c0_374 = arith.constant 0 : index
    %319 = tpu.strided_load %arg28[%c0_373, %c7, %c0_374] {strides = array<i32: 1, 8, 1>} : memref<2x10x8xf32, #tpu.memory_space<vmem>>, vector<2x1x8xf32>
    %c0_375 = arith.constant 0 : index
    %c8 = arith.constant 8 : index
    %c0_376 = arith.constant 0 : index
    %320 = tpu.strided_load %arg28[%c0_375, %c8, %c0_376] {strides = array<i32: 1, 8, 1>} : memref<2x10x8xf32, #tpu.memory_space<vmem>>, vector<2x1x8xf32>
    %321 = arith.maximumf %318, %319 : vector<2x1x8xf32>
    %322 = arith.maximumf %321, %320 : vector<2x1x8xf32>
    %323 = tpu.concatenate %307, %312, %317, %322 in 2 : vector<2x1x8xf32>, vector<2x1x8xf32>, vector<2x1x8xf32>, vector<2x1x8xf32> -> vector<2x1x32xf32>
    %324 = vector.shape_cast %323 : vector<2x1x32xf32> to vector<2x1x1x32xf32>
    %c0_377 = arith.constant 0 : index
    %c0_378 = arith.constant 0 : index
    %c0_379 = arith.constant 0 : index
    %c0_380 = arith.constant 0 : index
    %325 = vector.load %arg27[%c0_377, %c0_378, %c0_379, %c0_380] : memref<2x4x1x32xf32, #tpu.memory_space<vmem>>, vector<2x1x1x32xf32>
    tpu.vector_store %arg27[%c0_377, %c0_378, %c0_379, %c0_380], %324 {strides = array<i32>} : memref<2x4x1x32xf32, #tpu.memory_space<vmem>>, vector<2x1x1x32xf32>,
    %326 = arith.maximumf %98, %131 : vector<2x8x8xf32>
    %327 = arith.maximumf %326, %164 : vector<2x8x8xf32>
    %c0_381 = arith.constant 0 : index
    %c0_382 = arith.constant 0 : index
    %c0_383 = arith.constant 0 : index
    %328 = vector.load %arg28[%c0_381, %c0_382, %c0_383] : memref<2x10x8xf32, #tpu.memory_space<vmem>>, vector<2x1x8xf32>
    tpu.vector_store %arg28[%c0_381, %c0_382, %c0_383], %297 {strides = array<i32>} : memref<2x10x8xf32, #tpu.memory_space<vmem>>, vector<2x1x8xf32>,
    %c0_384 = arith.constant 0 : index
    %c1_385 = arith.constant 1 : index
    %c0_386 = arith.constant 0 : index
    %329 = vector.load %arg28[%c0_384, %c1_385, %c0_386] : memref<2x10x8xf32, #tpu.memory_space<vmem>>, vector<2x8x8xf32>
    tpu.vector_store %arg28[%c0_384, %c1_385, %c0_386], %327 {strides = array<i32>} : memref<2x10x8xf32, #tpu.memory_space<vmem>>, vector<2x8x8xf32>,
    %c0_387 = arith.constant 0 : index
    %c9_388 = arith.constant 9 : index
    %c0_389 = arith.constant 0 : index
    %330 = vector.load %arg28[%c0_387, %c9_388, %c0_389] : memref<2x10x8xf32, #tpu.memory_space<vmem>>, vector<2x1x8xf32>
    tpu.vector_store %arg28[%c0_387, %c9_388, %c0_389], %297 {strides = array<i32>} : memref<2x10x8xf32, #tpu.memory_space<vmem>>, vector<2x1x8xf32>,
    %c0_390 = arith.constant 0 : index
    %c0_391 = arith.constant 0 : index
    %c0_392 = arith.constant 0 : index
    %331 = tpu.strided_load %arg28[%c0_390, %c0_391, %c0_392] {strides = array<i32: 1, 8, 1>} : memref<2x10x8xf32, #tpu.memory_space<vmem>>, vector<2x1x8xf32>
    %c0_393 = arith.constant 0 : index
    %c1_394 = arith.constant 1 : index
    %c0_395 = arith.constant 0 : index
    %332 = tpu.strided_load %arg28[%c0_393, %c1_394, %c0_395] {strides = array<i32: 1, 8, 1>} : memref<2x10x8xf32, #tpu.memory_space<vmem>>, vector<2x1x8xf32>
    %c0_396 = arith.constant 0 : index
    %c2_397 = arith.constant 2 : index
    %c0_398 = arith.constant 0 : index
    %333 = tpu.strided_load %arg28[%c0_396, %c2_397, %c0_398] {strides = array<i32: 1, 8, 1>} : memref<2x10x8xf32, #tpu.memory_space<vmem>>, vector<2x1x8xf32>
    %334 = arith.maximumf %331, %332 : vector<2x1x8xf32>
    %335 = arith.maximumf %334, %333 : vector<2x1x8xf32>
    %c0_399 = arith.constant 0 : index
    %c2_400 = arith.constant 2 : index
    %c0_401 = arith.constant 0 : index
    %336 = tpu.strided_load %arg28[%c0_399, %c2_400, %c0_401] {strides = array<i32: 1, 8, 1>} : memref<2x10x8xf32, #tpu.memory_space<vmem>>, vector<2x1x8xf32>
    %c0_402 = arith.constant 0 : index
    %c3_403 = arith.constant 3 : index
    %c0_404 = arith.constant 0 : index
    %337 = tpu.strided_load %arg28[%c0_402, %c3_403, %c0_404] {strides = array<i32: 1, 8, 1>} : memref<2x10x8xf32, #tpu.memory_space<vmem>>, vector<2x1x8xf32>
    %c0_405 = arith.constant 0 : index
    %c4_406 = arith.constant 4 : index
    %c0_407 = arith.constant 0 : index
    %338 = tpu.strided_load %arg28[%c0_405, %c4_406, %c0_407] {strides = array<i32: 1, 8, 1>} : memref<2x10x8xf32, #tpu.memory_space<vmem>>, vector<2x1x8xf32>
    %339 = arith.maximumf %336, %337 : vector<2x1x8xf32>
    %340 = arith.maximumf %339, %338 : vector<2x1x8xf32>
    %c0_408 = arith.constant 0 : index
    %c4_409 = arith.constant 4 : index
    %c0_410 = arith.constant 0 : index
    %341 = tpu.strided_load %arg28[%c0_408, %c4_409, %c0_410] {strides = array<i32: 1, 8, 1>} : memref<2x10x8xf32, #tpu.memory_space<vmem>>, vector<2x1x8xf32>
    %c0_411 = arith.constant 0 : index
    %c5_412 = arith.constant 5 : index
    %c0_413 = arith.constant 0 : index
    %342 = tpu.strided_load %arg28[%c0_411, %c5_412, %c0_413] {strides = array<i32: 1, 8, 1>} : memref<2x10x8xf32, #tpu.memory_space<vmem>>, vector<2x1x8xf32>
    %c0_414 = arith.constant 0 : index
    %c6_415 = arith.constant 6 : index
    %c0_416 = arith.constant 0 : index
    %343 = tpu.strided_load %arg28[%c0_414, %c6_415, %c0_416] {strides = array<i32: 1, 8, 1>} : memref<2x10x8xf32, #tpu.memory_space<vmem>>, vector<2x1x8xf32>
    %344 = arith.maximumf %341, %342 : vector<2x1x8xf32>
    %345 = arith.maximumf %344, %343 : vector<2x1x8xf32>
    %c0_417 = arith.constant 0 : index
    %c6_418 = arith.constant 6 : index
    %c0_419 = arith.constant 0 : index
    %346 = tpu.strided_load %arg28[%c0_417, %c6_418, %c0_419] {strides = array<i32: 1, 8, 1>} : memref<2x10x8xf32, #tpu.memory_space<vmem>>, vector<2x1x8xf32>
    %c0_420 = arith.constant 0 : index
    %c7_421 = arith.constant 7 : index
    %c0_422 = arith.constant 0 : index
    %347 = tpu.strided_load %arg28[%c0_420, %c7_421, %c0_422] {strides = array<i32: 1, 8, 1>} : memref<2x10x8xf32, #tpu.memory_space<vmem>>, vector<2x1x8xf32>
    %c0_423 = arith.constant 0 : index
    %c8_424 = arith.constant 8 : index
    %c0_425 = arith.constant 0 : index
    %348 = tpu.strided_load %arg28[%c0_423, %c8_424, %c0_425] {strides = array<i32: 1, 8, 1>} : memref<2x10x8xf32, #tpu.memory_space<vmem>>, vector<2x1x8xf32>
    %349 = arith.maximumf %346, %347 : vector<2x1x8xf32>
    %350 = arith.maximumf %349, %348 : vector<2x1x8xf32>
    %351 = tpu.concatenate %335, %340, %345, %350 in 2 : vector<2x1x8xf32>, vector<2x1x8xf32>, vector<2x1x8xf32>, vector<2x1x8xf32> -> vector<2x1x32xf32>
    %352 = vector.shape_cast %351 : vector<2x1x32xf32> to vector<2x1x1x32xf32>
    %c0_426 = arith.constant 0 : index
    %c1_427 = arith.constant 1 : index
    %c0_428 = arith.constant 0 : index
    %c0_429 = arith.constant 0 : index
    %353 = vector.load %arg27[%c0_426, %c1_427, %c0_428, %c0_429] : memref<2x4x1x32xf32, #tpu.memory_space<vmem>>, vector<2x1x1x32xf32>
    tpu.vector_store %arg27[%c0_426, %c1_427, %c0_428, %c0_429], %352 {strides = array<i32>} : memref<2x4x1x32xf32, #tpu.memory_space<vmem>>, vector<2x1x1x32xf32>,
    %354 = arith.maximumf %164, %197 : vector<2x8x8xf32>
    %355 = arith.maximumf %354, %230 : vector<2x8x8xf32>
    %c0_430 = arith.constant 0 : index
    %c0_431 = arith.constant 0 : index
    %c0_432 = arith.constant 0 : index
    %356 = vector.load %arg28[%c0_430, %c0_431, %c0_432] : memref<2x10x8xf32, #tpu.memory_space<vmem>>, vector<2x1x8xf32>
    tpu.vector_store %arg28[%c0_430, %c0_431, %c0_432], %297 {strides = array<i32>} : memref<2x10x8xf32, #tpu.memory_space<vmem>>, vector<2x1x8xf32>,
    %c0_433 = arith.constant 0 : index
    %c1_434 = arith.constant 1 : index
    %c0_435 = arith.constant 0 : index
    %357 = vector.load %arg28[%c0_433, %c1_434, %c0_435] : memref<2x10x8xf32, #tpu.memory_space<vmem>>, vector<2x8x8xf32>
    tpu.vector_store %arg28[%c0_433, %c1_434, %c0_435], %355 {strides = array<i32>} : memref<2x10x8xf32, #tpu.memory_space<vmem>>, vector<2x8x8xf32>,
    %c0_436 = arith.constant 0 : index
    %c9_437 = arith.constant 9 : index
    %c0_438 = arith.constant 0 : index
    %358 = vector.load %arg28[%c0_436, %c9_437, %c0_438] : memref<2x10x8xf32, #tpu.memory_space<vmem>>, vector<2x1x8xf32>
    tpu.vector_store %arg28[%c0_436, %c9_437, %c0_438], %297 {strides = array<i32>} : memref<2x10x8xf32, #tpu.memory_space<vmem>>, vector<2x1x8xf32>,
    %c0_439 = arith.constant 0 : index
    %c0_440 = arith.constant 0 : index
    %c0_441 = arith.constant 0 : index
    %359 = tpu.strided_load %arg28[%c0_439, %c0_440, %c0_441] {strides = array<i32: 1, 8, 1>} : memref<2x10x8xf32, #tpu.memory_space<vmem>>, vector<2x1x8xf32>
    %c0_442 = arith.constant 0 : index
    %c1_443 = arith.constant 1 : index
    %c0_444 = arith.constant 0 : index
    %360 = tpu.strided_load %arg28[%c0_442, %c1_443, %c0_444] {strides = array<i32: 1, 8, 1>} : memref<2x10x8xf32, #tpu.memory_space<vmem>>, vector<2x1x8xf32>
    %c0_445 = arith.constant 0 : index
    %c2_446 = arith.constant 2 : index
    %c0_447 = arith.constant 0 : index
    %361 = tpu.strided_load %arg28[%c0_445, %c2_446, %c0_447] {strides = array<i32: 1, 8, 1>} : memref<2x10x8xf32, #tpu.memory_space<vmem>>, vector<2x1x8xf32>
    %362 = arith.maximumf %359, %360 : vector<2x1x8xf32>
    %363 = arith.maximumf %362, %361 : vector<2x1x8xf32>
    %c0_448 = arith.constant 0 : index
    %c2_449 = arith.constant 2 : index
    %c0_450 = arith.constant 0 : index
    %364 = tpu.strided_load %arg28[%c0_448, %c2_449, %c0_450] {strides = array<i32: 1, 8, 1>} : memref<2x10x8xf32, #tpu.memory_space<vmem>>, vector<2x1x8xf32>
    %c0_451 = arith.constant 0 : index
    %c3_452 = arith.constant 3 : index
    %c0_453 = arith.constant 0 : index
    %365 = tpu.strided_load %arg28[%c0_451, %c3_452, %c0_453] {strides = array<i32: 1, 8, 1>} : memref<2x10x8xf32, #tpu.memory_space<vmem>>, vector<2x1x8xf32>
    %c0_454 = arith.constant 0 : index
    %c4_455 = arith.constant 4 : index
    %c0_456 = arith.constant 0 : index
    %366 = tpu.strided_load %arg28[%c0_454, %c4_455, %c0_456] {strides = array<i32: 1, 8, 1>} : memref<2x10x8xf32, #tpu.memory_space<vmem>>, vector<2x1x8xf32>
    %367 = arith.maximumf %364, %365 : vector<2x1x8xf32>
    %368 = arith.maximumf %367, %366 : vector<2x1x8xf32>
    %c0_457 = arith.constant 0 : index
    %c4_458 = arith.constant 4 : index
    %c0_459 = arith.constant 0 : index
    %369 = tpu.strided_load %arg28[%c0_457, %c4_458, %c0_459] {strides = array<i32: 1, 8, 1>} : memref<2x10x8xf32, #tpu.memory_space<vmem>>, vector<2x1x8xf32>
    %c0_460 = arith.constant 0 : index
    %c5_461 = arith.constant 5 : index
    %c0_462 = arith.constant 0 : index
    %370 = tpu.strided_load %arg28[%c0_460, %c5_461, %c0_462] {strides = array<i32: 1, 8, 1>} : memref<2x10x8xf32, #tpu.memory_space<vmem>>, vector<2x1x8xf32>
    %c0_463 = arith.constant 0 : index
    %c6_464 = arith.constant 6 : index
    %c0_465 = arith.constant 0 : index
    %371 = tpu.strided_load %arg28[%c0_463, %c6_464, %c0_465] {strides = array<i32: 1, 8, 1>} : memref<2x10x8xf32, #tpu.memory_space<vmem>>, vector<2x1x8xf32>
    %372 = arith.maximumf %369, %370 : vector<2x1x8xf32>
    %373 = arith.maximumf %372, %371 : vector<2x1x8xf32>
    %c0_466 = arith.constant 0 : index
    %c6_467 = arith.constant 6 : index
    %c0_468 = arith.constant 0 : index
    %374 = tpu.strided_load %arg28[%c0_466, %c6_467, %c0_468] {strides = array<i32: 1, 8, 1>} : memref<2x10x8xf32, #tpu.memory_space<vmem>>, vector<2x1x8xf32>
    %c0_469 = arith.constant 0 : index
    %c7_470 = arith.constant 7 : index
    %c0_471 = arith.constant 0 : index
    %375 = tpu.strided_load %arg28[%c0_469, %c7_470, %c0_471] {strides = array<i32: 1, 8, 1>} : memref<2x10x8xf32, #tpu.memory_space<vmem>>, vector<2x1x8xf32>
    %c0_472 = arith.constant 0 : index
    %c8_473 = arith.constant 8 : index
    %c0_474 = arith.constant 0 : index
    %376 = tpu.strided_load %arg28[%c0_472, %c8_473, %c0_474] {strides = array<i32: 1, 8, 1>} : memref<2x10x8xf32, #tpu.memory_space<vmem>>, vector<2x1x8xf32>
    %377 = arith.maximumf %374, %375 : vector<2x1x8xf32>
    %378 = arith.maximumf %377, %376 : vector<2x1x8xf32>
    %379 = tpu.concatenate %363, %368, %373, %378 in 2 : vector<2x1x8xf32>, vector<2x1x8xf32>, vector<2x1x8xf32>, vector<2x1x8xf32> -> vector<2x1x32xf32>
    %380 = vector.shape_cast %379 : vector<2x1x32xf32> to vector<2x1x1x32xf32>
    %c0_475 = arith.constant 0 : index
    %c2_476 = arith.constant 2 : index
    %c0_477 = arith.constant 0 : index
    %c0_478 = arith.constant 0 : index
    %381 = vector.load %arg27[%c0_475, %c2_476, %c0_477, %c0_478] : memref<2x4x1x32xf32, #tpu.memory_space<vmem>>, vector<2x1x1x32xf32>
    tpu.vector_store %arg27[%c0_475, %c2_476, %c0_477, %c0_478], %380 {strides = array<i32>} : memref<2x4x1x32xf32, #tpu.memory_space<vmem>>, vector<2x1x1x32xf32>,
    %382 = arith.maximumf %230, %263 : vector<2x8x8xf32>
    %383 = arith.maximumf %382, %296 : vector<2x8x8xf32>
    %c0_479 = arith.constant 0 : index
    %c0_480 = arith.constant 0 : index
    %c0_481 = arith.constant 0 : index
    %384 = vector.load %arg28[%c0_479, %c0_480, %c0_481] : memref<2x10x8xf32, #tpu.memory_space<vmem>>, vector<2x1x8xf32>
    tpu.vector_store %arg28[%c0_479, %c0_480, %c0_481], %297 {strides = array<i32>} : memref<2x10x8xf32, #tpu.memory_space<vmem>>, vector<2x1x8xf32>,
    %c0_482 = arith.constant 0 : index
    %c1_483 = arith.constant 1 : index
    %c0_484 = arith.constant 0 : index
    %385 = vector.load %arg28[%c0_482, %c1_483, %c0_484] : memref<2x10x8xf32, #tpu.memory_space<vmem>>, vector<2x8x8xf32>
    tpu.vector_store %arg28[%c0_482, %c1_483, %c0_484], %383 {strides = array<i32>} : memref<2x10x8xf32, #tpu.memory_space<vmem>>, vector<2x8x8xf32>,
    %c0_485 = arith.constant 0 : index
    %c9_486 = arith.constant 9 : index
    %c0_487 = arith.constant 0 : index
    %386 = vector.load %arg28[%c0_485, %c9_486, %c0_487] : memref<2x10x8xf32, #tpu.memory_space<vmem>>, vector<2x1x8xf32>
    tpu.vector_store %arg28[%c0_485, %c9_486, %c0_487], %297 {strides = array<i32>} : memref<2x10x8xf32, #tpu.memory_space<vmem>>, vector<2x1x8xf32>,
    %c0_488 = arith.constant 0 : index
    %c0_489 = arith.constant 0 : index
    %c0_490 = arith.constant 0 : index
    %387 = tpu.strided_load %arg28[%c0_488, %c0_489, %c0_490] {strides = array<i32: 1, 8, 1>} : memref<2x10x8xf32, #tpu.memory_space<vmem>>, vector<2x1x8xf32>
    %c0_491 = arith.constant 0 : index
    %c1_492 = arith.constant 1 : index
    %c0_493 = arith.constant 0 : index
    %388 = tpu.strided_load %arg28[%c0_491, %c1_492, %c0_493] {strides = array<i32: 1, 8, 1>} : memref<2x10x8xf32, #tpu.memory_space<vmem>>, vector<2x1x8xf32>
    %c0_494 = arith.constant 0 : index
    %c2_495 = arith.constant 2 : index
    %c0_496 = arith.constant 0 : index
    %389 = tpu.strided_load %arg28[%c0_494, %c2_495, %c0_496] {strides = array<i32: 1, 8, 1>} : memref<2x10x8xf32, #tpu.memory_space<vmem>>, vector<2x1x8xf32>
    %390 = arith.maximumf %387, %388 : vector<2x1x8xf32>
    %391 = arith.maximumf %390, %389 : vector<2x1x8xf32>
    %c0_497 = arith.constant 0 : index
    %c2_498 = arith.constant 2 : index
    %c0_499 = arith.constant 0 : index
    %392 = tpu.strided_load %arg28[%c0_497, %c2_498, %c0_499] {strides = array<i32: 1, 8, 1>} : memref<2x10x8xf32, #tpu.memory_space<vmem>>, vector<2x1x8xf32>
    %c0_500 = arith.constant 0 : index
    %c3_501 = arith.constant 3 : index
    %c0_502 = arith.constant 0 : index
    %393 = tpu.strided_load %arg28[%c0_500, %c3_501, %c0_502] {strides = array<i32: 1, 8, 1>} : memref<2x10x8xf32, #tpu.memory_space<vmem>>, vector<2x1x8xf32>
    %c0_503 = arith.constant 0 : index
    %c4_504 = arith.constant 4 : index
    %c0_505 = arith.constant 0 : index
    %394 = tpu.strided_load %arg28[%c0_503, %c4_504, %c0_505] {strides = array<i32: 1, 8, 1>} : memref<2x10x8xf32, #tpu.memory_space<vmem>>, vector<2x1x8xf32>
    %395 = arith.maximumf %392, %393 : vector<2x1x8xf32>
    %396 = arith.maximumf %395, %394 : vector<2x1x8xf32>
    %c0_506 = arith.constant 0 : index
    %c4_507 = arith.constant 4 : index
    %c0_508 = arith.constant 0 : index
    %397 = tpu.strided_load %arg28[%c0_506, %c4_507, %c0_508] {strides = array<i32: 1, 8, 1>} : memref<2x10x8xf32, #tpu.memory_space<vmem>>, vector<2x1x8xf32>
    %c0_509 = arith.constant 0 : index
    %c5_510 = arith.constant 5 : index
    %c0_511 = arith.constant 0 : index
    %398 = tpu.strided_load %arg28[%c0_509, %c5_510, %c0_511] {strides = array<i32: 1, 8, 1>} : memref<2x10x8xf32, #tpu.memory_space<vmem>>, vector<2x1x8xf32>
    %c0_512 = arith.constant 0 : index
    %c6_513 = arith.constant 6 : index
    %c0_514 = arith.constant 0 : index
    %399 = tpu.strided_load %arg28[%c0_512, %c6_513, %c0_514] {strides = array<i32: 1, 8, 1>} : memref<2x10x8xf32, #tpu.memory_space<vmem>>, vector<2x1x8xf32>
    %400 = arith.maximumf %397, %398 : vector<2x1x8xf32>
    %401 = arith.maximumf %400, %399 : vector<2x1x8xf32>
    %c0_515 = arith.constant 0 : index
    %c6_516 = arith.constant 6 : index
    %c0_517 = arith.constant 0 : index
    %402 = tpu.strided_load %arg28[%c0_515, %c6_516, %c0_517] {strides = array<i32: 1, 8, 1>} : memref<2x10x8xf32, #tpu.memory_space<vmem>>, vector<2x1x8xf32>
    %c0_518 = arith.constant 0 : index
    %c7_519 = arith.constant 7 : index
    %c0_520 = arith.constant 0 : index
    %403 = tpu.strided_load %arg28[%c0_518, %c7_519, %c0_520] {strides = array<i32: 1, 8, 1>} : memref<2x10x8xf32, #tpu.memory_space<vmem>>, vector<2x1x8xf32>
    %c0_521 = arith.constant 0 : index
    %c8_522 = arith.constant 8 : index
    %c0_523 = arith.constant 0 : index
    %404 = tpu.strided_load %arg28[%c0_521, %c8_522, %c0_523] {strides = array<i32: 1, 8, 1>} : memref<2x10x8xf32, #tpu.memory_space<vmem>>, vector<2x1x8xf32>
    %405 = arith.maximumf %402, %403 : vector<2x1x8xf32>
    %406 = arith.maximumf %405, %404 : vector<2x1x8xf32>
    %407 = tpu.concatenate %391, %396, %401, %406 in 2 : vector<2x1x8xf32>, vector<2x1x8xf32>, vector<2x1x8xf32>, vector<2x1x8xf32> -> vector<2x1x32xf32>
    %408 = vector.shape_cast %407 : vector<2x1x32xf32> to vector<2x1x1x32xf32>
    %c0_524 = arith.constant 0 : index
    %c3_525 = arith.constant 3 : index
    %c0_526 = arith.constant 0 : index
    %c0_527 = arith.constant 0 : index
    %409 = vector.load %arg27[%c0_524, %c3_525, %c0_526, %c0_527] : memref<2x4x1x32xf32, #tpu.memory_space<vmem>>, vector<2x1x1x32xf32>
    tpu.vector_store %arg27[%c0_524, %c3_525, %c0_526, %c0_527], %408 {strides = array<i32>} : memref<2x4x1x32xf32, #tpu.memory_space<vmem>>, vector<2x1x1x32xf32>,
    return
  }
  func.func @transform_0(%arg0: i32, %arg1: i32) -> (i32, i32, i32, i32) {
    %c16_i32 = arith.constant 16 : i32
    %0 = arith.muli %c16_i32, %arg1 : i32
    %c2_i32 = arith.constant 2 : i32
    %1 = arith.subi %0, %c2_i32 : i32
    %c0_i32 = arith.constant 0 : i32
    %2 = arith.addi %1, %c0_i32 : i32
    %c0_i32_0 = arith.constant 0 : i32
    %c21_i32 = arith.constant 21 : i32
    %3 = arith.maxsi %c0_i32_0, %2 : i32
    %4 = arith.minsi %c21_i32, %3 : i32
    %c0_i32_1 = arith.constant 0 : i32
    %c0_i32_2 = arith.constant 0 : i32
    %c0_i32_3 = arith.constant 0 : i32
    return %arg0, %4, %c0_i32_1, %c0_i32_2 : i32, i32, i32, i32
  }
  func.func @transform_1(%arg0: i32, %arg1: i32) -> (i32, i32, i32, i32) {
    %c16_i32 = arith.constant 16 : i32
    %0 = arith.muli %c16_i32, %arg1 : i32
    %c2_i32 = arith.constant 2 : i32
    %1 = arith.subi %0, %c2_i32 : i32
    %c1_i32 = arith.constant 1 : i32
    %2 = arith.addi %1, %c1_i32 : i32
    %c0_i32 = arith.constant 0 : i32
    %c21_i32 = arith.constant 21 : i32
    %3 = arith.maxsi %c0_i32, %2 : i32
    %4 = arith.minsi %c21_i32, %3 : i32
    %c0_i32_0 = arith.constant 0 : i32
    %c0_i32_1 = arith.constant 0 : i32
    %c0_i32_2 = arith.constant 0 : i32
    return %arg0, %4, %c0_i32_0, %c0_i32_1 : i32, i32, i32, i32
  }
  func.func @transform_2(%arg0: i32, %arg1: i32) -> (i32, i32, i32, i32) {
    %c16_i32 = arith.constant 16 : i32
    %0 = arith.muli %c16_i32, %arg1 : i32
    %c2_i32 = arith.constant 2 : i32
    %1 = arith.subi %0, %c2_i32 : i32
    %c2_i32_0 = arith.constant 2 : i32
    %2 = arith.addi %1, %c2_i32_0 : i32
    %c0_i32 = arith.constant 0 : i32
    %c21_i32 = arith.constant 21 : i32
    %3 = arith.maxsi %c0_i32, %2 : i32
    %4 = arith.minsi %c21_i32, %3 : i32
    %c0_i32_1 = arith.constant 0 : i32
    %c0_i32_2 = arith.constant 0 : i32
    %c0_i32_3 = arith.constant 0 : i32
    return %arg0, %4, %c0_i32_1, %c0_i32_2 : i32, i32, i32, i32
  }
  func.func @transform_3(%arg0: i32, %arg1: i32) -> (i32, i32, i32, i32) {
    %c16_i32 = arith.constant 16 : i32
    %0 = arith.muli %c16_i32, %arg1 : i32
    %c2_i32 = arith.constant 2 : i32
    %1 = arith.subi %0, %c2_i32 : i32
    %c3_i32 = arith.constant 3 : i32
    %2 = arith.addi %1, %c3_i32 : i32
    %c0_i32 = arith.constant 0 : i32
    %c21_i32 = arith.constant 21 : i32
    %3 = arith.maxsi %c0_i32, %2 : i32
    %4 = arith.minsi %c21_i32, %3 : i32
    %c0_i32_0 = arith.constant 0 : i32
    %c0_i32_1 = arith.constant 0 : i32
    %c0_i32_2 = arith.constant 0 : i32
    return %arg0, %4, %c0_i32_0, %c0_i32_1 : i32, i32, i32, i32
  }
  func.func @transform_4(%arg0: i32, %arg1: i32) -> (i32, i32, i32, i32) {
    %c16_i32 = arith.constant 16 : i32
    %0 = arith.muli %c16_i32, %arg1 : i32
    %c2_i32 = arith.constant 2 : i32
    %1 = arith.subi %0, %c2_i32 : i32
    %c4_i32 = arith.constant 4 : i32
    %2 = arith.addi %1, %c4_i32 : i32
    %c0_i32 = arith.constant 0 : i32
    %c21_i32 = arith.constant 21 : i32
    %3 = arith.maxsi %c0_i32, %2 : i32
    %4 = arith.minsi %c21_i32, %3 : i32
    %c0_i32_0 = arith.constant 0 : i32
    %c0_i32_1 = arith.constant 0 : i32
    %c0_i32_2 = arith.constant 0 : i32
    return %arg0, %4, %c0_i32_0, %c0_i32_1 : i32, i32, i32, i32
  }
  func.func @transform_5(%arg0: i32, %arg1: i32) -> (i32, i32, i32, i32) {
    %c16_i32 = arith.constant 16 : i32
    %0 = arith.muli %c16_i32, %arg1 : i32
    %c2_i32 = arith.constant 2 : i32
    %1 = arith.subi %0, %c2_i32 : i32
    %c5_i32 = arith.constant 5 : i32
    %2 = arith.addi %1, %c5_i32 : i32
    %c0_i32 = arith.constant 0 : i32
    %c21_i32 = arith.constant 21 : i32
    %3 = arith.maxsi %c0_i32, %2 : i32
    %4 = arith.minsi %c21_i32, %3 : i32
    %c0_i32_0 = arith.constant 0 : i32
    %c0_i32_1 = arith.constant 0 : i32
    %c0_i32_2 = arith.constant 0 : i32
    return %arg0, %4, %c0_i32_0, %c0_i32_1 : i32, i32, i32, i32
  }
  func.func @transform_6(%arg0: i32, %arg1: i32) -> (i32, i32, i32, i32) {
    %c16_i32 = arith.constant 16 : i32
    %0 = arith.muli %c16_i32, %arg1 : i32
    %c2_i32 = arith.constant 2 : i32
    %1 = arith.subi %0, %c2_i32 : i32
    %c6_i32 = arith.constant 6 : i32
    %2 = arith.addi %1, %c6_i32 : i32
    %c0_i32 = arith.constant 0 : i32
    %c21_i32 = arith.constant 21 : i32
    %3 = arith.maxsi %c0_i32, %2 : i32
    %4 = arith.minsi %c21_i32, %3 : i32
    %c0_i32_0 = arith.constant 0 : i32
    %c0_i32_1 = arith.constant 0 : i32
    %c0_i32_2 = arith.constant 0 : i32
    return %arg0, %4, %c0_i32_0, %c0_i32_1 : i32, i32, i32, i32
  }
  func.func @transform_7(%arg0: i32, %arg1: i32) -> (i32, i32, i32, i32) {
    %c16_i32 = arith.constant 16 : i32
    %0 = arith.muli %c16_i32, %arg1 : i32
    %c2_i32 = arith.constant 2 : i32
    %1 = arith.subi %0, %c2_i32 : i32
    %c7_i32 = arith.constant 7 : i32
    %2 = arith.addi %1, %c7_i32 : i32
    %c0_i32 = arith.constant 0 : i32
    %c21_i32 = arith.constant 21 : i32
    %3 = arith.maxsi %c0_i32, %2 : i32
    %4 = arith.minsi %c21_i32, %3 : i32
    %c0_i32_0 = arith.constant 0 : i32
    %c0_i32_1 = arith.constant 0 : i32
    %c0_i32_2 = arith.constant 0 : i32
    return %arg0, %4, %c0_i32_0, %c0_i32_1 : i32, i32, i32, i32
  }
  func.func @transform_8(%arg0: i32, %arg1: i32) -> (i32, i32, i32, i32) {
    %c16_i32 = arith.constant 16 : i32
    %0 = arith.muli %c16_i32, %arg1 : i32
    %c2_i32 = arith.constant 2 : i32
    %1 = arith.subi %0, %c2_i32 : i32
    %c8_i32 = arith.constant 8 : i32
    %2 = arith.addi %1, %c8_i32 : i32
    %c0_i32 = arith.constant 0 : i32
    %c21_i32 = arith.constant 21 : i32
    %3 = arith.maxsi %c0_i32, %2 : i32
    %4 = arith.minsi %c21_i32, %3 : i32
    %c0_i32_0 = arith.constant 0 : i32
    %c0_i32_1 = arith.constant 0 : i32
    %c0_i32_2 = arith.constant 0 : i32
    return %arg0, %4, %c0_i32_0, %c0_i32_1 : i32, i32, i32, i32
  }
  func.func @transform_9(%arg0: i32, %arg1: i32) -> (i32, i32, i32, i32) {
    %c16_i32 = arith.constant 16 : i32
    %0 = arith.muli %c16_i32, %arg1 : i32
    %c2_i32 = arith.constant 2 : i32
    %1 = arith.subi %0, %c2_i32 : i32
    %c9_i32 = arith.constant 9 : i32
    %2 = arith.addi %1, %c9_i32 : i32
    %c0_i32 = arith.constant 0 : i32
    %c21_i32 = arith.constant 21 : i32
    %3 = arith.maxsi %c0_i32, %2 : i32
    %4 = arith.minsi %c21_i32, %3 : i32
    %c0_i32_0 = arith.constant 0 : i32
    %c0_i32_1 = arith.constant 0 : i32
    %c0_i32_2 = arith.constant 0 : i32
    return %arg0, %4, %c0_i32_0, %c0_i32_1 : i32, i32, i32, i32
  }
  func.func @transform_10(%arg0: i32, %arg1: i32) -> (i32, i32, i32, i32) {
    %c16_i32 = arith.constant 16 : i32
    %0 = arith.muli %c16_i32, %arg1 : i32
    %c2_i32 = arith.constant 2 : i32
    %1 = arith.subi %0, %c2_i32 : i32
    %c10_i32 = arith.constant 10 : i32
    %2 = arith.addi %1, %c10_i32 : i32
    %c0_i32 = arith.constant 0 : i32
    %c21_i32 = arith.constant 21 : i32
    %3 = arith.maxsi %c0_i32, %2 : i32
    %4 = arith.minsi %c21_i32, %3 : i32
    %c0_i32_0 = arith.constant 0 : i32
    %c0_i32_1 = arith.constant 0 : i32
    %c0_i32_2 = arith.constant 0 : i32
    return %arg0, %4, %c0_i32_0, %c0_i32_1 : i32, i32, i32, i32
  }
  func.func @transform_11(%arg0: i32, %arg1: i32) -> (i32, i32, i32, i32) {
    %c16_i32 = arith.constant 16 : i32
    %0 = arith.muli %c16_i32, %arg1 : i32
    %c2_i32 = arith.constant 2 : i32
    %1 = arith.subi %0, %c2_i32 : i32
    %c11_i32 = arith.constant 11 : i32
    %2 = arith.addi %1, %c11_i32 : i32
    %c0_i32 = arith.constant 0 : i32
    %c21_i32 = arith.constant 21 : i32
    %3 = arith.maxsi %c0_i32, %2 : i32
    %4 = arith.minsi %c21_i32, %3 : i32
    %c0_i32_0 = arith.constant 0 : i32
    %c0_i32_1 = arith.constant 0 : i32
    %c0_i32_2 = arith.constant 0 : i32
    return %arg0, %4, %c0_i32_0, %c0_i32_1 : i32, i32, i32, i32
  }
  func.func @transform_12(%arg0: i32, %arg1: i32) -> (i32, i32, i32, i32) {
    %c16_i32 = arith.constant 16 : i32
    %0 = arith.muli %c16_i32, %arg1 : i32
    %c2_i32 = arith.constant 2 : i32
    %1 = arith.subi %0, %c2_i32 : i32
    %c12_i32 = arith.constant 12 : i32
    %2 = arith.addi %1, %c12_i32 : i32
    %c0_i32 = arith.constant 0 : i32
    %c21_i32 = arith.constant 21 : i32
    %3 = arith.maxsi %c0_i32, %2 : i32
    %4 = arith.minsi %c21_i32, %3 : i32
    %c0_i32_0 = arith.constant 0 : i32
    %c0_i32_1 = arith.constant 0 : i32
    %c0_i32_2 = arith.constant 0 : i32
    return %arg0, %4, %c0_i32_0, %c0_i32_1 : i32, i32, i32, i32
  }
  func.func @transform_13(%arg0: i32, %arg1: i32) -> (i32, i32, i32, i32) {
    %c16_i32 = arith.constant 16 : i32
    %0 = arith.muli %c16_i32, %arg1 : i32
    %c2_i32 = arith.constant 2 : i32
    %1 = arith.subi %0, %c2_i32 : i32
    %c13_i32 = arith.constant 13 : i32
    %2 = arith.addi %1, %c13_i32 : i32
    %c0_i32 = arith.constant 0 : i32
    %c21_i32 = arith.constant 21 : i32
    %3 = arith.maxsi %c0_i32, %2 : i32
    %4 = arith.minsi %c21_i32, %3 : i32
    %c0_i32_0 = arith.constant 0 : i32
    %c0_i32_1 = arith.constant 0 : i32
    %c0_i32_2 = arith.constant 0 : i32
    return %arg0, %4, %c0_i32_0, %c0_i32_1 : i32, i32, i32, i32
  }
  func.func @transform_14(%arg0: i32, %arg1: i32) -> (i32, i32, i32, i32) {
    %c16_i32 = arith.constant 16 : i32
    %0 = arith.muli %c16_i32, %arg1 : i32
    %c2_i32 = arith.constant 2 : i32
    %1 = arith.subi %0, %c2_i32 : i32
    %c14_i32 = arith.constant 14 : i32
    %2 = arith.addi %1, %c14_i32 : i32
    %c0_i32 = arith.constant 0 : i32
    %c21_i32 = arith.constant 21 : i32
    %3 = arith.maxsi %c0_i32, %2 : i32
    %4 = arith.minsi %c21_i32, %3 : i32
    %c0_i32_0 = arith.constant 0 : i32
    %c0_i32_1 = arith.constant 0 : i32
    %c0_i32_2 = arith.constant 0 : i32
    return %arg0, %4, %c0_i32_0, %c0_i32_1 : i32, i32, i32, i32
  }
  func.func @transform_15(%arg0: i32, %arg1: i32) -> (i32, i32, i32, i32) {
    %c16_i32 = arith.constant 16 : i32
    %0 = arith.muli %c16_i32, %arg1 : i32
    %c2_i32 = arith.constant 2 : i32
    %1 = arith.subi %0, %c2_i32 : i32
    %c15_i32 = arith.constant 15 : i32
    %2 = arith.addi %1, %c15_i32 : i32
    %c0_i32 = arith.constant 0 : i32
    %c21_i32 = arith.constant 21 : i32
    %3 = arith.maxsi %c0_i32, %2 : i32
    %4 = arith.minsi %c21_i32, %3 : i32
    %c0_i32_0 = arith.constant 0 : i32
    %c0_i32_1 = arith.constant 0 : i32
    %c0_i32_2 = arith.constant 0 : i32
    return %arg0, %4, %c0_i32_0, %c0_i32_1 : i32, i32, i32, i32
  }
  func.func @transform_16(%arg0: i32, %arg1: i32) -> (i32, i32, i32, i32) {
    %c16_i32 = arith.constant 16 : i32
    %0 = arith.muli %c16_i32, %arg1 : i32
    %c2_i32 = arith.constant 2 : i32
    %1 = arith.subi %0, %c2_i32 : i32
    %c16_i32_0 = arith.constant 16 : i32
    %2 = arith.addi %1, %c16_i32_0 : i32
    %c0_i32 = arith.constant 0 : i32
    %c21_i32 = arith.constant 21 : i32
    %3 = arith.maxsi %c0_i32, %2 : i32
    %4 = arith.minsi %c21_i32, %3 : i32
    %c0_i32_1 = arith.constant 0 : i32
    %c0_i32_2 = arith.constant 0 : i32
    %c0_i32_3 = arith.constant 0 : i32
    return %arg0, %4, %c0_i32_1, %c0_i32_2 : i32, i32, i32, i32
  }
  func.func @transform_17(%arg0: i32, %arg1: i32) -> (i32, i32, i32, i32) {
    %c16_i32 = arith.constant 16 : i32
    %0 = arith.muli %c16_i32, %arg1 : i32
    %c2_i32 = arith.constant 2 : i32
    %1 = arith.subi %0, %c2_i32 : i32
    %c17_i32 = arith.constant 17 : i32
    %2 = arith.addi %1, %c17_i32 : i32
    %c0_i32 = arith.constant 0 : i32
    %c21_i32 = arith.constant 21 : i32
    %3 = arith.maxsi %c0_i32, %2 : i32
    %4 = arith.minsi %c21_i32, %3 : i32
    %c0_i32_0 = arith.constant 0 : i32
    %c0_i32_1 = arith.constant 0 : i32
    %c0_i32_2 = arith.constant 0 : i32
    return %arg0, %4, %c0_i32_0, %c0_i32_1 : i32, i32, i32, i32
  }
  func.func @transform_18(%arg0: i32, %arg1: i32) -> (i32, i32, i32, i32) {
    %c16_i32 = arith.constant 16 : i32
    %0 = arith.muli %c16_i32, %arg1 : i32
    %c2_i32 = arith.constant 2 : i32
    %1 = arith.subi %0, %c2_i32 : i32
    %c18_i32 = arith.constant 18 : i32
    %2 = arith.addi %1, %c18_i32 : i32
    %c0_i32 = arith.constant 0 : i32
    %c21_i32 = arith.constant 21 : i32
    %3 = arith.maxsi %c0_i32, %2 : i32
    %4 = arith.minsi %c21_i32, %3 : i32
    %c0_i32_0 = arith.constant 0 : i32
    %c0_i32_1 = arith.constant 0 : i32
    %c0_i32_2 = arith.constant 0 : i32
    return %arg0, %4, %c0_i32_0, %c0_i32_1 : i32, i32, i32, i32
  }
  func.func @transform_19(%arg0: i32, %arg1: i32) -> (i32, i32, i32, i32) {
    %c16_i32 = arith.constant 16 : i32
    %0 = arith.muli %c16_i32, %arg1 : i32
    %c2_i32 = arith.constant 2 : i32
    %1 = arith.subi %0, %c2_i32 : i32
    %c19_i32 = arith.constant 19 : i32
    %2 = arith.addi %1, %c19_i32 : i32
    %c0_i32 = arith.constant 0 : i32
    %c21_i32 = arith.constant 21 : i32
    %3 = arith.maxsi %c0_i32, %2 : i32
    %4 = arith.minsi %c21_i32, %3 : i32
    %c0_i32_0 = arith.constant 0 : i32
    %c0_i32_1 = arith.constant 0 : i32
    %c0_i32_2 = arith.constant 0 : i32
    return %arg0, %4, %c0_i32_0, %c0_i32_1 : i32, i32, i32, i32
  }
  func.func @transform_20(%arg0: i32, %arg1: i32) -> (i32, i32, i32, i32) {
    %c16_i32 = arith.constant 16 : i32
    %0 = arith.muli %c16_i32, %arg1 : i32
    %c2_i32 = arith.constant 2 : i32
    %1 = arith.subi %0, %c2_i32 : i32
    %c20_i32 = arith.constant 20 : i32
    %2 = arith.addi %1, %c20_i32 : i32
    %c0_i32 = arith.constant 0 : i32
    %c21_i32 = arith.constant 21 : i32
    %3 = arith.maxsi %c0_i32, %2 : i32
    %4 = arith.minsi %c21_i32, %3 : i32
    %c0_i32_0 = arith.constant 0 : i32
    %c0_i32_1 = arith.constant 0 : i32
    %c0_i32_2 = arith.constant 0 : i32
    return %arg0, %4, %c0_i32_0, %c0_i32_1 : i32, i32, i32, i32
  }
  func.func @transform_21(%arg0: i32, %arg1: i32) -> (i32, i32, i32, i32) {
    %c16_i32 = arith.constant 16 : i32
    %0 = arith.muli %c16_i32, %arg1 : i32
    %c2_i32 = arith.constant 2 : i32
    %1 = arith.subi %0, %c2_i32 : i32
    %c21_i32 = arith.constant 21 : i32
    %2 = arith.addi %1, %c21_i32 : i32
    %c0_i32 = arith.constant 0 : i32
    %c21_i32_0 = arith.constant 21 : i32
    %3 = arith.maxsi %c0_i32, %2 : i32
    %4 = arith.minsi %c21_i32_0, %3 : i32
    %c0_i32_1 = arith.constant 0 : i32
    %c0_i32_2 = arith.constant 0 : i32
    %c0_i32_3 = arith.constant 0 : i32
    return %arg0, %4, %c0_i32_1, %c0_i32_2 : i32, i32, i32, i32
  }
  func.func @transform_22(%arg0: i32, %arg1: i32) -> (i32, i32, i32, i32) {
    %c16_i32 = arith.constant 16 : i32
    %0 = arith.muli %c16_i32, %arg1 : i32
    %c2_i32 = arith.constant 2 : i32
    %1 = arith.subi %0, %c2_i32 : i32
    %c22_i32 = arith.constant 22 : i32
    %2 = arith.addi %1, %c22_i32 : i32
    %c0_i32 = arith.constant 0 : i32
    %c21_i32 = arith.constant 21 : i32
    %3 = arith.maxsi %c0_i32, %2 : i32
    %4 = arith.minsi %c21_i32, %3 : i32
    %c0_i32_0 = arith.constant 0 : i32
    %c0_i32_1 = arith.constant 0 : i32
    %c0_i32_2 = arith.constant 0 : i32
    return %arg0, %4, %c0_i32_0, %c0_i32_1 : i32, i32, i32, i32
  }
  func.func @transform_23(%arg0: i32, %arg1: i32) -> (i32, i32) {
    %c0_i32 = arith.constant 0 : i32
    %c0_i32_0 = arith.constant 0 : i32
    %c0_i32_1 = arith.constant 0 : i32
    return %c0_i32, %c0_i32_0 : i32, i32
  }
  func.func @transform_24(%arg0: i32, %arg1: i32) -> (i32, i32) {
    %c0_i32 = arith.constant 0 : i32
    %c0_i32_0 = arith.constant 0 : i32
    %c0_i32_1 = arith.constant 0 : i32
    return %c0_i32, %c0_i32_0 : i32, i32
  }
  func.func @transform_25(%arg0: i32, %arg1: i32) -> (i32, i32, i32, i32) {
    %c0_i32 = arith.constant 0 : i32
    %c0_i32_0 = arith.constant 0 : i32
    %c0_i32_1 = arith.constant 0 : i32
    return %arg0, %arg1, %c0_i32, %c0_i32_0 : i32, i32, i32, i32
  }
}

</mosaic_0001>

<bundles_post_ra>
// kernel: tpu_custom_call.1
= control target key start
LH: loop header
LB: loop body
LE: loop exit
PB: predicated region body
PF: predicated region fallthrough
CT: control target
= control target key end

     0   :  { %s3740_s0 = inlined_call_operand.hbm [shape: bf16[2,22,8,28], index: 0, kind: input, shape index: {}]   ;;  %s3741_s1 = inlined_call_operand.hbm [shape: bf16[2,22,8,28], index: 1, kind: input, shape index: {}]   ;;  %s3742_s2 = inlined_call_operand.hbm [shape: bf16[2,22,8,28], index: 2, kind: input, shape index: {}]   ;;  %s3743_s3 = inlined_call_operand.hbm [shape: bf16[2,22,8,28], index: 3, kind: input, shape index: {}]   ;;  %s3744_s4 = inlined_call_operand.hbm [shape: bf16[2,22,8,28], index: 4, kind: input, shape index: {}]   ;;  %s3745_s5 = inlined_call_operand.hbm [shape: bf16[2,22,8,28], index: 5, kind: input, shape index: {}]   ;;  %s3746_s6 = inlined_call_operand.hbm [shape: bf16[2,22,8,28], index: 6, kind: input, shape index: {}]   ;;  %s3747_s7 = inlined_call_operand.hbm [shape: bf16[2,22,8,28], index: 7, kind: input, shape index: {}]   ;;  %s3748_s8 = inlined_call_operand.hbm [shape: bf16[2,22,8,28], index: 8, kind: input, shape index: {}]   ;;  %s3749_s9 = inlined_call_operand.hbm [shape: bf16[2,22,8,28], index: 9, kind: input, shape index: {}]   ;;  %s3750_s10 = inlined_call_operand.hbm [shape: bf16[2,22,8,28], index: 10, kind: input, shape index: {}]   ;;  %s3751_s11 = inlined_call_operand.hbm [shape: bf16[2,22,8,28], index: 11, kind: input, shape index: {}]   ;;  %s3752_s12 = inlined_call_operand.hbm [shape: bf16[2,22,8,28], index: 12, kind: input, shape index: {}]   ;;  %s3753_s13 = inlined_call_operand.hbm [shape: bf16[2,22,8,28], index: 13, kind: input, shape index: {}]   ;;  %s3754_s14 = inlined_call_operand.hbm [shape: bf16[2,22,8,28], index: 14, kind: input, shape index: {}]   ;;  %s3755_s15 = inlined_call_operand.hbm [shape: bf16[2,22,8,28], index: 15, kind: input, shape index: {}]   ;;  %s3756_s16 = inlined_call_operand.hbm [shape: bf16[2,22,8,28], index: 16, kind: input, shape index: {}]   ;;  %s3757_s17 = inlined_call_operand.hbm [shape: bf16[2,22,8,28], index: 17, kind: input, shape index: {}]   ;;  %s3758_s18 = inlined_call_operand.hbm [shape: bf16[2,22,8,28], index: 18, kind: input, shape index: {}]   ;;  %s3759_s19 = inlined_call_operand.hbm [shape: bf16[2,22,8,28], index: 19, kind: input, shape index: {}]   ;;  %s3760_s20 = inlined_call_operand.hbm [shape: bf16[2,22,8,28], index: 20, kind: input, shape index: {}]   ;;  %s3761_s21 = inlined_call_operand.hbm [shape: bf16[2,22,8,28], index: 21, kind: input, shape index: {}]   ;;  %s3762_s22 = inlined_call_operand.hbm [shape: bf16[2,22,8,28], index: 22, kind: input, shape index: {}]   ;;  %s3763_s23 = inlined_call_operand.vmem [shape: bf16[196,8], index: 23, kind: input, shape index: {}]   ;;  %s3764_s24 = inlined_call_operand.vmem [shape: f32[1,8], index: 24, kind: input, shape index: {}]   ;;  %s3765_s25 = inlined_call_operand.hbm [shape: f32[2,4,1,32], index: 25, kind: output, shape index: {}]  }
   0x1   :  { %3767 = sst [smem:[#allocation53_spill]] %s3740_s0 }
   0x2   :  { %3768 = sst [smem:[#allocation54_spill]] %s3741_s1 }
   0x3   :  { %3769 = sst [smem:[#allocation55_spill]] %s3742_s2 }
   0x4   :  { %3770 = sst [smem:[#allocation56_spill]] %s3743_s3 }
   0x5   :  { %3771 = sst [smem:[#allocation57_spill]] %s3744_s4 }
   0x6   :  { %3772 = sst [smem:[#allocation58_spill]] %s3745_s5 }
   0x7   :  { %3773 = sst [smem:[#allocation59_spill]] %s3746_s6 }
   0x8   :  { %3774 = sst [smem:[#allocation60_spill]] %s3747_s7 }
   0x9   :  { %3775 = sst [smem:[#allocation61_spill]] %s3748_s8 }
   0xa   :  { %3776 = sst [smem:[#allocation62_spill]] %s3749_s9 }
   0xb   :  { %3777 = sst [smem:[#allocation63_spill]] %s3763_s23 }
   0xc   :  { %3778 = sst [smem:[#allocation64_spill]] %s3764_s24 }
   0xd   :  { %3779 = sst [smem:[#allocation65_spill]] %s3765_s25 }
   0xe   :  { %30 = vsyncpa [#allocation4], 0 }
   0xf   :  { %31 = vsyncpa [#allocation7], 0 }
  0x10   :  { %32 = vsyncpa [#allocation10], 0 }
  0x11   :  { %33 = vsyncpa [#allocation13], 0 }
  0x12   :  { %34 = vsyncpa [#allocation16], 0 }
  0x13   :  { %35 = vsyncpa [#allocation19], 0 }
  0x14   :  { %36 = vsyncpa [#allocation22], 0 }
  0x15   :  { %37 = vsyncpa [#allocation25], 0 }
  0x16   :  { %38 = vsyncpa [#allocation28], 0 }
  0x17   :  { %39 = vsyncpa [#allocation31], 0 }
  0x18   :  { %40 = vsyncpa [#allocation34], 0 }
  0x19   :  { %41 = vsyncpa [#allocation37], 0 }
  0x1a   :  { %42 = vsyncpa [#allocation5], 0  ;;  %s3780_s6 = sld [smem:[#allocation54_spill]]  ;;  %s2877_s7 = smov [#allocation6]  }
  0x1b   :  { %s78_s3 = sshll.u32 %s2877_s7, 4  ;;  %s3781_s8 = sld [smem:[#allocation56_spill]]  ;;  %s79_s3 = int_to_ptr.vmem [resolvable:$true] %s78_s3 }
  0x1c   :  { %s2878_s28 = smov 1408   ;;  %s2879_s9 = smov 64  }
  0x1d   :  { %s2880_s5 = smov 4   ;;  %s2881_s0 = smov [#allocation9]  }
  0x1e   :  { %s119_s29 = sshll.u32 %s2881_s0, 4  ;;  %s3782_s25 = sld [smem:[#allocation58_spill]]  ;;  %s120_s29 = int_to_ptr.vmem [resolvable:$true] %s119_s29 }
  0x1f   :  { %s2882_s26 = smov [#allocation12]   ;;  %s3783_s23 = sld [smem:[#allocation60_spill]] }
  0x20   :  { %s76_s30 = sshll.u32 %s3780_s6, 4  ;;  %s161_s1 = sshll.u32 %s2882_s26, 4  ;;  %s77_s30 = int_to_ptr.hbm [resolvable:$true] %s76_s30  ;;  %s162_s1 = int_to_ptr.vmem [resolvable:$true] %s161_s1 }
  0x21   :  { %s116_s27 = scalar_lea.hbm %s3781_s8, 4  ;;  %s2892_s6 = smov [#allocation8]  }
  0x22   :  { %s117_s4 = sshll.u32 %s116_s27, 4  ;;  %s3785_s27 = sld [smem:[#allocation53_spill]]  ;;  %s118_s4 = int_to_ptr.hbm [resolvable:$true] %s117_s4 }
  0x23   :  { %84 = dma.hbm_to_vmem [thread:$0]  %s77_s30, 128, %s79_s3, [#allocation7], %s2878_s28, %s2879_s9, %s2880_s5  }
  0x24   :  { %s158_s7 = scalar_lea.hbm %s3782_s25, 12  ;;  %s2883_s25 = smov [#allocation15]  }
  0x25   :  { %s159_s24 = sshll.u32 %s158_s7, 4  ;;  %s200_s30 = scalar_lea.hbm %s3783_s23, 20  ;;  %s160_s24 = int_to_ptr.hbm [resolvable:$true] %s159_s24 }
  0x26   :  { %125 = dma.hbm_to_vmem [thread:$0]  %s118_s4, 128, %s120_s29, [#allocation10], %s2878_s28, %s2879_s9, %s2880_s5  }
  0x27   :  { %s201_s3 = sshll.u32 %s200_s30, 4  ;;  %s203_s0 = sshll.u32 %s2883_s25, 4  ;;  %s202_s3 = int_to_ptr.hbm [resolvable:$true] %s201_s3  ;;  %s204_s0 = int_to_ptr.vmem [resolvable:$true] %s203_s0 }
  0x28   :  { %167 = dma.hbm_to_vmem [thread:$0]  %s160_s24, 128, %s162_s1, [#allocation13], %s2878_s28, %s2879_s9, %s2880_s5  }
  0x29   :  { %s3784_s7 = sld [smem:[#allocation62_spill]]  ;;  %s2884_s23 = smov [#allocation18]  }
  0x2a   :  { %209 = dma.hbm_to_vmem [thread:$0]  %s202_s3, 128, %s204_s0, [#allocation16], %s2878_s28, %s2879_s9, %s2880_s5  }
  0x2b   :  { %s245_s26 = sshll.u32 %s2884_s23, 4  ;;  %s284_s24 = scalar_lea.hbm %s3751_s11, 36  ;;  %s246_s26 = int_to_ptr.vmem [resolvable:$true] %s245_s26 }
  0x2c   :  { %s285_s1 = sshll.u32 %s284_s24, 4  ;;  %s2885_s30 = smov [#allocation21]   ;;  %s286_s1 = int_to_ptr.hbm [resolvable:$true] %s285_s1 }
  0x2d   :  { %s287_s25 = sshll.u32 %s2885_s30, 4  ;;  %s326_s3 = scalar_lea.hbm %s3753_s13, 44  ;;  %s288_s25 = int_to_ptr.vmem [resolvable:$true] %s287_s25 }
  0x2e   :  { %s327_s0 = sshll.u32 %s326_s3, 4  ;;  %s2886_s11 = smov [#allocation24]   ;;  %s328_s0 = int_to_ptr.hbm [resolvable:$true] %s327_s0 }
  0x2f   :  { %s242_s4 = scalar_lea.hbm %s3784_s7, 28  ;;  %s329_s7 = sshll.u32 %s2886_s11, 4  ;;  %s330_s7 = int_to_ptr.vmem [resolvable:$true] %s329_s7 }
  0x30   :  { %s243_s29 = sshll.u32 %s242_s4, 4  ;;  %s2887_s13 = smov [#allocation27]   ;;  %s244_s29 = int_to_ptr.hbm [resolvable:$true] %s243_s29 }
  0x31   :  { %251 = dma.hbm_to_vmem [thread:$0]  %s244_s29, 128, %s246_s26, [#allocation19], %s2878_s28, %s2879_s9, %s2880_s5  }
  0x32   :  { %293 = dma.hbm_to_vmem [thread:$0]  %s286_s1, 128, %s288_s25, [#allocation22], %s2878_s28, %s2879_s9, %s2880_s5  }
  0x33   :  { %s368_s29 = scalar_lea.hbm %s3755_s15, 52  ;;  %s371_s8 = sshll.u32 %s2887_s13, 4  ;;  %s372_s8 = int_to_ptr.vmem [resolvable:$true] %s371_s8 }
  0x34   :  { %s369_s26 = sshll.u32 %s368_s29, 4  ;;  %s410_s1 = scalar_lea.hbm %s3757_s17, 60  ;;  %s370_s26 = int_to_ptr.hbm [resolvable:$true] %s369_s26 }
  0x35   :  { %335 = dma.hbm_to_vmem [thread:$0]  %s328_s0, 128, %s330_s7, [#allocation25], %s2878_s28, %s2879_s9, %s2880_s5  }
  0x36   :  { %s411_s30 = sshll.u32 %s410_s1, 4  ;;  %s2888_s15 = smov [#allocation30]   ;;  %s412_s30 = int_to_ptr.hbm [resolvable:$true] %s411_s30 }
  0x37   :  { %377 = dma.hbm_to_vmem [thread:$0]  %s370_s26, 128, %s372_s8, [#allocation28], %s2878_s28, %s2879_s9, %s2880_s5  }
  0x38   :  { %s413_s25 = sshll.u32 %s2888_s15, 4  ;;  %s452_s3 = scalar_lea.hbm %s3759_s19, 68  ;;  %s414_s25 = int_to_ptr.vmem [resolvable:$true] %s413_s25 }
  0x39   :  { %s453_s0 = sshll.u32 %s452_s3, 4  ;;  %s2889_s17 = smov [#allocation33]   ;;  %s454_s0 = int_to_ptr.hbm [resolvable:$true] %s453_s0 }
  0x3a   :  { %419 = dma.hbm_to_vmem [thread:$0]  %s412_s30, 128, %s414_s25, [#allocation31], %s2878_s28, %s2879_s9, %s2880_s5  }
  0x3b   :  { %s455_s11 = sshll.u32 %s2889_s17, 4  ;;  %s494_s23 = scalar_lea.hbm %s3761_s21, 76  ;;  %s456_s11 = int_to_ptr.vmem [resolvable:$true] %s455_s11 }
  0x3c   :  { %s495_s29 = sshll.u32 %s494_s23, 4  ;;  %s2890_s19 = smov [#allocation36]   ;;  %s496_s29 = int_to_ptr.hbm [resolvable:$true] %s495_s29 }
  0x3d   :  { %461 = dma.hbm_to_vmem [thread:$0]  %s454_s0, 128, %s456_s11, [#allocation34], %s2878_s28, %s2879_s9, %s2880_s5  }
  0x3e   :  { %s497_s26 = sshll.u32 %s2890_s19, 4  ;;  %s55_s24 = sshll.u32 %s3785_s27, 4  ;;  %s498_s26 = int_to_ptr.vmem [resolvable:$true] %s497_s26  ;;  %s56_s24 = int_to_ptr.hbm [resolvable:$true] %s55_s24 }
  0x3f   :  { %503 = dma.hbm_to_vmem [thread:$0]  %s496_s29, 128, %s498_s26, [#allocation37], %s2878_s28, %s2879_s9, %s2880_s5  }
  0x40   :  { %s3786_s30 = sld [smem:[#allocation55_spill]]  ;;  %s2891_s25 = smov [#allocation3]  }
  0x41   :  { %s57_s2 = sshll.u32 %s2891_s25, 4  ;;  %s98_s3 = sshll.u32 %s2892_s6, 4  ;;  %s58_s2 = int_to_ptr.vmem [resolvable:$true] %s57_s2  ;;  %s99_s3 = int_to_ptr.vmem [resolvable:$true] %s98_s3 }
  0x42   :  { %63 = dma.hbm_to_vmem [thread:$0]  %s56_s24, 128, %s58_s2, [#allocation4], %s2878_s28, %s2879_s9, %s2880_s5  }
  0x43   :  { %s3787_s11 = sld [smem:[#allocation57_spill]]  ;;  %s2893_s23 = smov [#allocation11]  }
  0x44   :  { %s140_s29 = sshll.u32 %s2893_s23, 4  ;;  %s3788_s13 = sld [smem:[#allocation59_spill]]  ;;  %s141_s29 = int_to_ptr.vmem [resolvable:$true] %s140_s29 }
  0x45   :  { %s2894_s24 = smov [#allocation14]   ;;  %s3789_s25 = sld [smem:[#allocation61_spill]] }
  0x46   :  { %s96_s15 = sshll.u32 %s3786_s30, 4  ;;  %s182_s21 = sshll.u32 %s2894_s24, 4  ;;  %s97_s15 = int_to_ptr.hbm [resolvable:$true] %s96_s15  ;;  %s183_s21 = int_to_ptr.vmem [resolvable:$true] %s182_s21 }
  0x47   :  { %104 = dma.hbm_to_vmem [thread:$0]  %s97_s15, 128, %s99_s3, [#allocation7], %s2878_s28, %s2879_s9, %s2880_s5  }
  0x48   :  { %s2895_s6 = smov [#allocation17]   ;;  %s305_s26 = scalar_lea.hbm %s3752_s12, 40 }
  0x49   :  { %s137_s7 = scalar_lea.hbm %s3787_s11, 8  ;;  %s224_s3 = sshll.u32 %s2895_s6, 4  ;;  %s225_s3 = int_to_ptr.vmem [resolvable:$true] %s224_s3 }
  0x4a   :  { %s138_s4 = sshll.u32 %s137_s7, 4  ;;  %s179_s8 = scalar_lea.hbm %s3788_s13, 16  ;;  %s139_s4 = int_to_ptr.hbm [resolvable:$true] %s138_s4 }
  0x4b   :  { %s180_s27 = sshll.u32 %s179_s8, 4  ;;  %s221_s15 = scalar_lea.hbm %s3789_s25, 24  ;;  %s181_s27 = int_to_ptr.hbm [resolvable:$true] %s180_s27 }
  0x4c   :  { %146 = dma.hbm_to_vmem [thread:$0]  %s139_s4, 128, %s141_s29, [#allocation10], %s2878_s28, %s2879_s9, %s2880_s5  }
  0x4d   :  { %s222_s2 = sshll.u32 %s221_s15, 4  ;;  %s263_s11 = scalar_lea.hbm %s3750_s10, 32  ;;  %s223_s2 = int_to_ptr.hbm [resolvable:$true] %s222_s2 }
  0x4e   :  { %188 = dma.hbm_to_vmem [thread:$0]  %s181_s27, 128, %s183_s21, [#allocation13], %s2878_s28, %s2879_s9, %s2880_s5  }
  0x4f   :  { %s264_s7 = sshll.u32 %s263_s11, 4  ;;  %s2896_s4 = smov [#allocation20]   ;;  %s265_s7 = int_to_ptr.hbm [resolvable:$true] %s264_s7 }
  0x50   :  { %230 = dma.hbm_to_vmem [thread:$0]  %s223_s2, 128, %s225_s3, [#allocation16], %s2878_s28, %s2879_s9, %s2880_s5  }
  0x51   :  { %s266_s23 = sshll.u32 %s2896_s4, 4  ;;  %s306_s13 = sshll.u32 %s305_s26, 4  ;;  %s267_s23 = int_to_ptr.vmem [resolvable:$true] %s266_s23  ;;  %s307_s13 = int_to_ptr.hbm [resolvable:$true] %s306_s13 }
  0x52   :  { %272 = dma.hbm_to_vmem [thread:$0]  %s265_s7, 128, %s267_s23, [#allocation19], %s2878_s28, %s2879_s9, %s2880_s5  }
  0x53   :  { %s2897_s10 = smov [#allocation23]   ;;  %s347_s21 = scalar_lea.hbm %s3754_s14, 48 }
  0x54   :  { %s308_s8 = sshll.u32 %s2897_s10, 4  ;;  %s348_s1 = sshll.u32 %s347_s21, 4  ;;  %s309_s8 = int_to_ptr.vmem [resolvable:$true] %s308_s8  ;;  %s349_s1 = int_to_ptr.hbm [resolvable:$true] %s348_s1 }
  0x55   :  { %314 = dma.hbm_to_vmem [thread:$0]  %s307_s13, 128, %s309_s8, [#allocation22], %s2878_s28, %s2879_s9, %s2880_s5  }
  0x56   :  { %s2898_s12 = smov [#allocation26]   ;;  %s389_s2 = scalar_lea.hbm %s3756_s16, 56 }
  0x57   :  { %s350_s30 = sshll.u32 %s2898_s12, 4  ;;  %s390_s6 = sshll.u32 %s389_s2, 4  ;;  %s351_s30 = int_to_ptr.vmem [resolvable:$true] %s350_s30  ;;  %s391_s6 = int_to_ptr.hbm [resolvable:$true] %s390_s6 }
  0x58   :  { %356 = dma.hbm_to_vmem [thread:$0]  %s349_s1, 128, %s351_s30, [#allocation25], %s2878_s28, %s2879_s9, %s2880_s5  }
  0x59   :  { %s2899_s14 = smov [#allocation29]   ;;  %s431_s11 = scalar_lea.hbm %s3758_s18, 64 }
  0x5a   :  { %s392_s3 = sshll.u32 %s2899_s14, 4  ;;  %s432_s7 = sshll.u32 %s431_s11, 4  ;;  %s393_s3 = int_to_ptr.vmem [resolvable:$true] %s392_s3  ;;  %s433_s7 = int_to_ptr.hbm [resolvable:$true] %s432_s7 }
  0x5b   :  { %398 = dma.hbm_to_vmem [thread:$0]  %s391_s6, 128, %s393_s3, [#allocation28], %s2878_s28, %s2879_s9, %s2880_s5  }
  0x5c   :  { %s2900_s16 = smov [#allocation32]   ;;  %s473_s19 = scalar_lea.hbm %s3760_s20, 72 }
  0x5d   :  { %s434_s4 = sshll.u32 %s2900_s16, 4  ;;  %s474_s26 = sshll.u32 %s473_s19, 4  ;;  %s435_s4 = int_to_ptr.vmem [resolvable:$true] %s434_s4  ;;  %s475_s26 = int_to_ptr.hbm [resolvable:$true] %s474_s26 }
  0x5e   :  { %440 = dma.hbm_to_vmem [thread:$0]  %s433_s7, 128, %s435_s4, [#allocation31], %s2878_s28, %s2879_s9, %s2880_s5  }
  0x5f   :  { %s2901_s18 = smov [#allocation35]   ;;  %s515_s27 = scalar_lea.hbm %s3762_s22, 80 }
  0x60   :  { %s476_s13 = sshll.u32 %s2901_s18, 4  ;;  %s516_s24 = sshll.u32 %s515_s27, 4  ;;  %s477_s13 = int_to_ptr.vmem [resolvable:$true] %s476_s13  ;;  %s517_s24 = int_to_ptr.hbm [resolvable:$true] %s516_s24 }
  0x61   :  { %482 = dma.hbm_to_vmem [thread:$0]  %s475_s26, 128, %s477_s13, [#allocation34], %s2878_s28, %s2879_s9, %s2880_s5  }
  0x62   :  { %s2902_s20 = smov [#allocation38]  }
  0x63   :  { %s518_s21 = sshll.u32 %s2902_s20, 4  ;;  %s519_s21 = int_to_ptr.vmem [resolvable:$true] %s518_s21 }
  0x64   :  { %524 = dma.hbm_to_vmem [thread:$0]  %s517_s24, 128, %s519_s21, [#allocation37], %s2878_s28, %s2879_s9, %s2880_s5  }
  0x65   :  { %2851 = dma.done.wait [#allocation4], 128  }
  0x66   :  { %2852 = vsyncadd [#allocation4], 4294967168 }
  0x67   :  { %2853 = dma.done.wait [#allocation7], 256  }
  0x68   :  { %2854 = vsyncadd [#allocation7], 4294967040 }
  0x69   :  { %2855 = dma.done.wait [#allocation10], 256  }
  0x6a   :  { %2856 = vsyncadd [#allocation10], 4294967040 }
  0x6b   :  { %2857 = dma.done.wait [#allocation13], 256  }
  0x6c   :  { %2858 = vsyncadd [#allocation13], 4294967040 }
  0x6d   :  { %2859 = dma.done.wait [#allocation16], 256  }
  0x6e   :  { %2860 = vsyncadd [#allocation16], 4294967040 }
  0x6f   :  { %2861 = dma.done.wait [#allocation19], 256  }
  0x70   :  { %2862 = vsyncadd [#allocation19], 4294967040 }
  0x71   :  { %2863 = dma.done.wait [#allocation22], 256  }
  0x72   :  { %2864 = vsyncadd [#allocation22], 4294967040 }
  0x73   :  { %2865 = dma.done.wait [#allocation25], 256  }
  0x74   :  { %2866 = vsyncadd [#allocation25], 4294967040 }
  0x75   :  { %2867 = dma.done.wait [#allocation28], 256  }
  0x76   :  { %2868 = vsyncadd [#allocation28], 4294967040 }
  0x77   :  { %2869 = dma.done.wait [#allocation31], 256  }
  0x78   :  { %2870 = vsyncadd [#allocation31], 4294967040 }
  0x79   :  { %2871 = dma.done.wait [#allocation34], 256  }
  0x7a   :  { %2872 = vsyncadd [#allocation34], 4294967040 }
  0x7b   :  { %2873 = dma.done.wait [#allocation37], 256  }
  0x7c   :  { %2874 = vsyncadd [#allocation37], 4294967040  ;;  %vm1651_vm0 = vcmask 57344   ;;  %v3183_v0 = vld [vmem:[#allocation17] sm:$0xff]  ;;  %v3185_v1 = vld [vmem:[#allocation14] sm:$0xff]  ;;  %v2903_v3 = vmov 0.0  }
  0x7d   :  { %v2206_v2 = vld [vmem:[#allocation12] sm:$0xff]  ;;  %1652 = vst.msk [vmem:[#allocation2] sm:$0x1] %vm1651_vm0, %v2903_v3  ;;  %s2904_s22 = smov 40   ;;  %s2905_s28 = smov 112   ;;  %v2220_v4 = vld [vmem:[#allocation15] sm:$0xff] }
  0x7e   :  { %1016 = vrot.lane.b32.xlu1 %v3183_v0, %s2904_s22  ;;  %1002 = vrot.lane.b32.xlu0 %v3185_v1, %s2905_s28  ;;  %1653 = vst.msk [vmem:[#allocation2 + $0x10] sm:$0x1] %vm1651_vm0, %v2903_v3  ;;  %s2906_s9 = smov 12   ;;  %v3196_v5 = vld [vmem:[#allocation11] sm:$0xff]  ;;  %v2204_v6 = vld [vmem:[#allocation9] sm:$0xff]  ;;  %s2907_s5 = smov 56  }
  0x7f   :  { %811 = vrot.lane.b32.xlu2 %v2206_v2, %s2906_s9  ;;  %s2908_s1 = smov 28   ;;  %s2909_s12 = smov 84   ;;  %v2222_v7 = vld [vmem:[#allocation18] sm:$0xff]  ;;  %v3207_v8 = vld [vmem:[#allocation20] sm:$0xff]  ;;  %v2224_v11 = vld [vmem:[#allocation21] sm:$0xff]  ;;  %vm947_vm1 = vcmask 1041408  }
  0x80   :  { %v3214_v9 = vld [vmem:[#allocation8] sm:$0xff]  ;;  %v2202_v10 = vld [vmem:[#allocation6] sm:$0xff]  ;;  %v3229_v12 = vld [vmem:[#allocation23] sm:$0xff]  ;;  %s3790_s15 = sld [smem:[#allocation63_spill]]  ;;  %vm834_vm2 = vcmask 97280   ;;  %vm837_vm3 = vcmask 326656  }
  0x81   :  { %v3250_v15 = vld [vmem:[#allocation24] sm:$0xff]  ;;  %v3252_v17 = vld [vmem:[#allocation26] sm:$0xff]  ;;  %v3308_v27 = vld [vmem:[#allocation29] sm:$0xff]  ;;  %vm944_vm4 = vcmask 556032   ;;  %vm820_vm5 = vcmask 228352   ;;  %vm824_vm6 = vcmask 457728  }
  0x82   :  { %v3306_v26 = vld [vmem:[#allocation30] sm:$0xff]  ;;  %v3340_v32 = vld [vmem:[#allocation27] sm:$0xff]  ;;  %v2231_v33 = vld [vmem:[#allocation32] sm:$0xff]  ;;  %vm827_vm7 = vcmask 687104   ;;  %vm830_vm8 = vcmask 916480   ;;  %vm1654_vm9 = vcmask 64512  }
  0x83   :  { %v2232_v41 = vld [vmem:[#allocation33] sm:$0xff]  ;;  %v2233_v42 = vld [vmem:[#allocation35] sm:$0xff]  ;;  %v2234_v55 = vld [vmem:[#allocation36] sm:$0xff]  ;;  %vm1736_vm10 = vcmask 130048   ;;  %vm1739_vm11 = vcmask 195584   ;;  %vm1742_vm12 = vcmask 253952  }
  0x84   :  { %v2235_v57 = vld [vmem:[#allocation38] sm:$0xff]  ;;  %s3792_s6 = sld [smem:[#allocation65_spill]]  ;;  %s2913_s3 = smov [#allocation39]  }
  0x85   :  { %s1980_s0 = sshll.u32 %s2913_s3, 4  ;;  %s2914_s17 = smov 1   ;;  %s1981_s0 = int_to_ptr.vmem [resolvable:$true] %s1980_s0 }
  0x86   :  { %1009 = vrot.lane.b32.xlu0 %v2220_v4, %s2906_s9  ;;  %804 = vrot.lane.b32.xlu1 %v3196_v5, %s2905_s28  ;;  %v3241_v13 = vld [vmem:[%s3790_s15 + $0x38] sm:$0xff]  ;;  %v864_v14 = vld [vmem:[%s3790_s15 + $0x60] sm:$0x3] }
  0x87   :  { %818 = vrot.lane.b32.xlu2 %v3185_v1, %s2904_s22  ;;  %1034 = vmatpush.bf16.msra.mxu2 %v3241_v13  ;;  %v918_v16 = vunpack.c.l.b16 %v864_v14  ;;  %v3262_v20 = vld [vmem:[%s3790_s15 + $0x30] sm:$0xff]  ;;  %v3270_v21 = vld [vmem:[%s3790_s15 + $0x58] sm:$0xff]  ;;  %v3277_v22 = vld [vmem:[%s3790_s15 + $0x28] sm:$0xff] }
  0x88   :  { %951 = vmatpush.bf16.msra.mxu0 %v3241_v13  ;;  %v3286_v23 = vld [vmem:[%s3790_s15 + $0x50] sm:$0xff]  ;;  %v3299_v24 = vld [vmem:[%s3790_s15 + $0x20] sm:$0xff]  ;;  %v3304_v25 = vld [vmem:[%s3790_s15 + $0x48] sm:$0xff] }
  0x89   :  { %v931_v18 = vpack.c.b16 %v918_v16, %v918_v16  ;;  %v3316_v28 = vld [vmem:[%s3790_s15 + $0x18] sm:$0xff]  ;;  %v3322_v29 = vld [vmem:[%s3790_s15 + $0x40] sm:$0xff]  ;;  %v3336_v30 = vld [vmem:[%s3790_s15 + $0x10] sm:$0xff] }
  0x8a   :  { %v3347_v34 = vld [vmem:[%s3790_s15 + $0x8] sm:$0xff]  ;;  %v3360_v35 = vld [vmem:[%s3790_s15] sm:$0xff]  ;;  %s1982_s14 = sshll.u32 %s3792_s6, 4  ;;  %s1983_s14 = int_to_ptr.hbm [resolvable:$true] %s1982_s14 }
  0x8b   :  { %v3257_v19 = vsel %vm947_vm1, %v931_v18, 0  ;;  %1035 = vmatpush.bf16.msra.mxu2 %v3262_v20 }
  0x8c   :  { %1051 = vmatpush.bf16.msra.mxu3 %v3257_v19  ;;  %968 = vmatpush.bf16.msra.mxu1 %v3257_v19 }
  0x8d   :  { %952 = vmatpush.bf16.msra.mxu0 %v3262_v20 }
  0x8e   :  { %998 = vrot.lane.b32.xlu1 %v3196_v5, %s2907_s5  ;;  %996 = vrot.lane.b32.xlu0 %v2204_v6, %s2908_s1 }
  0x8f   :  { %1000 = vrot.lane.b32.xlu2 %v2206_v2, %s2909_s12  ;;  %1036 = vmatpush.bf16.msra.mxu2 %v3277_v22 }
  0x90   :  { %1052 = vmatpush.bf16.msra.mxu3 %v3270_v21  ;;  %969 = vmatpush.bf16.msra.mxu1 %v3270_v21 }
  0x91   :  { %953 = vmatpush.bf16.msra.mxu0 %v3277_v22 }
  0x93   :  { %1037 = vmatpush.bf16.msra.mxu2 %v3299_v24 }
  0x94   :  { %1053 = vmatpush.bf16.msra.mxu3 %v3286_v23  ;;  %970 = vmatpush.bf16.msra.mxu1 %v3286_v23 }
  0x95   :  { %954 = vmatpush.bf16.msra.mxu0 %v3299_v24 }
  0x96   :  { %1090 = vrot.lane.b32.xlu1 %v2222_v7, %s2906_s9  ;;  %1083 = vrot.lane.b32.xlu0 %v3183_v0, %s2905_s28 }
  0x97   :  { %1097 = vrot.lane.b32.xlu2 %v3207_v8, %s2904_s22  ;;  %1038 = vmatpush.bf16.msra.mxu2 %v3316_v28 }
  0x98   :  { %1054 = vmatpush.bf16.msra.mxu3 %v3304_v25  ;;  %971 = vmatpush.bf16.msra.mxu1 %v3304_v25 }
  0x99   :  { %955 = vmatpush.bf16.msra.mxu0 %v3316_v28 }
  0x9b   :  { %1039 = vmatpush.bf16.msra.mxu2 %v3336_v30 }
  0x9c   :  { %1055 = vmatpush.bf16.msra.mxu3 %v3322_v29  ;;  %972 = vmatpush.bf16.msra.mxu1 %v3322_v29 }
  0x9d   :  { %956 = vmatpush.bf16.msra.mxu0 %v3336_v30 }
  0x9e   :  { %790 = vrot.lane.b32.xlu1 %v3214_v9, %s2907_s5  ;;  %783 = vrot.lane.b32.xlu0 %v2202_v10, %s2908_s1 }
  0x9f   :  { %797 = vrot.lane.b32.xlu2 %v2204_v6, %s2909_s12  ;;  %1040 = vmatpush.bf16.msra.mxu2 %v3347_v34 }
  0xa0   :  { %1132 = vmatpush.bf16.msrb.mxu3 %v3257_v19  ;;  %1115 = vmatpush.bf16.msrb.mxu1 %v3241_v13 }
  0xa1   :  { %957 = vmatpush.bf16.msra.mxu0 %v3347_v34 }
  0xa3   :  { %1041 = vmatpush.bf16.msra.mxu2 %v3360_v35 }
  0xa4   :  { %1133 = vmatpush.bf16.msrb.mxu3 %v3270_v21  ;;  %1116 = vmatpush.bf16.msrb.mxu1 %v3262_v20 }
  0xa5   :  { %958 = vmatpush.bf16.msra.mxu0 %v3360_v35 }
  0xa6   :  { %1079 = vrot.lane.b32.xlu1 %v3185_v1, %s2907_s5  ;;  %1077 = vrot.lane.b32.xlu0 %v2206_v2, %s2908_s1  ;;  %v2201_v2 = vld [vmem:[#allocation3] sm:$0xff] }
  0xa7   :  { %1081 = vrot.lane.b32.xlu2 %v2220_v4, %s2909_s12  ;;  %1214 = vmatpush.bf16.msrb.mxu2 %v3257_v19 }
  0xa8   :  { %1134 = vmatpush.bf16.msrb.mxu3 %v3286_v23  ;;  %1117 = vmatpush.bf16.msrb.mxu1 %v3277_v22 }
  0xa9   :  { %1197 = vmatpush.bf16.msrb.mxu0 %v3241_v13 }
  0xab   :  { %1215 = vmatpush.bf16.msrb.mxu2 %v3270_v21 }
  0xac   :  { %1135 = vmatpush.bf16.msrb.mxu3 %v3304_v25  ;;  %1118 = vmatpush.bf16.msrb.mxu1 %v3299_v24 }
  0xad   :  { %1198 = vmatpush.bf16.msrb.mxu0 %v3262_v20 }
  0xae   :  { %1243 = vrot.lane.b32.xlu1 %v3207_v8, %s2907_s5  ;;  %1241 = vrot.lane.b32.xlu0 %v2222_v7, %s2908_s1 }
  0xaf   :  { %1165 = vrot.lane.b32.xlu2 %v3207_v8, %s2905_s28  ;;  %1216 = vmatpush.bf16.msrb.mxu2 %v3286_v23 }
  0xb0   :  { %1136 = vmatpush.bf16.msrb.mxu3 %v3322_v29  ;;  %1119 = vmatpush.bf16.msrb.mxu1 %v3316_v28 }
  0xb1   :  { %1199 = vmatpush.bf16.msrb.mxu0 %v3277_v22 }
  0xb3   :  { %1217 = vmatpush.bf16.msrb.mxu2 %v3304_v25 }
  0xb4   :  { %1120 = vmatpush.bf16.msrb.mxu1 %v3336_v30 }
  0xb5   :  { %1200 = vmatpush.bf16.msrb.mxu0 %v3299_v24 }
  0xb6   :  { %1245 = vrot.lane.b32.xlu1 %v2224_v11, %s2909_s12  ;;  %1172 = vrot.lane.b32.xlu0 %v2224_v11, %s2906_s9 }
  0xb7   :  { %1179 = vrot.lane.b32.xlu2 %v3229_v12, %s2904_s22  ;;  %1218 = vmatpush.bf16.msrb.mxu2 %v3322_v29 }
  0xb8   :  { %1121 = vmatpush.bf16.msrb.mxu1 %v3347_v34 }
  0xb9   :  { %1201 = vmatpush.bf16.msrb.mxu0 %v3316_v28 }
  0xbc   :  { %1122 = vmatpush.bf16.msrb.mxu1 %v3360_v35 }
  0xbd   :  { %1202 = vmatpush.bf16.msrb.mxu0 %v3336_v30 }
  0xbe   :  { %1159 = vrot.lane.b32.xlu1 %v2220_v4, %s2908_s1  ;;  %1247 = vrot.lane.b32.xlu0 %v3229_v12, %s2905_s28 }
  0xbf   :  { %1161 = vrot.lane.b32.xlu2 %v3183_v0, %s2907_s5 }
  0xc1   :  { %1203 = vmatpush.bf16.msrb.mxu0 %v3347_v34 }
  0xc5   :  { %1204 = vmatpush.bf16.msrb.mxu0 %v3360_v35 }
  0xc6   :  { %1254 = vrot.lane.b32.xlu1 %v3250_v15, %s2906_s9  ;;  %1163 = vrot.lane.b32.xlu0 %v2222_v7, %s2909_s12 }
  0xc7   :  { %1261 = vrot.lane.b32.xlu2 %v3252_v17, %s2904_s22 }
  0xce   :  { %1325 = vrot.lane.b32.xlu1 %v3229_v12, %s2907_s5  ;;  %1323 = vrot.lane.b32.xlu0 %v2224_v11, %s2908_s1 }
  0xcf   :  { %1327 = vrot.lane.b32.xlu2 %v3250_v15, %s2909_s12 }
  0xd6   :  { %1418 = vrot.lane.b32.xlu1 %v3306_v26, %s2906_s9  ;;  %1411 = vrot.lane.b32.xlu0 %v3308_v27, %s2905_s28 }
  0xd7   :  { %1329 = vrot.lane.b32.xlu2 %v3252_v17, %s2905_s28 }
  0xd9   :  { %v812_v31 = vpop.permute.xlu2 %811 }
  0xde   :  { %1336 = vrot.lane.b32.xlu1 %v3340_v32, %s2906_s9  ;;  %1425 = vrot.lane.b32.xlu0 %v2231_v33, %s2904_s22 }
  0xdf   :  { %1343 = vrot.lane.b32.xlu2 %v3308_v27, %s2904_s22 }
  0xe1   :  { %v819_v36 = vpop.permute.xlu2 %818 }
  0xe6   :  { %1407 = vrot.lane.b32.xlu1 %v3252_v17, %s2907_s5  ;;  %1405 = vrot.lane.b32.xlu0 %v3250_v15, %s2908_s1 }
  0xe7   :  { %1409 = vrot.lane.b32.xlu2 %v3340_v32, %s2909_s12 }
  0xe9   :  { %v1001_v37 = vpop.permute.xlu2 %1000 }
  0xee   :  { %1571 = vrot.lane.b32.xlu1 %v2231_v33, %s2907_s5  ;;  %1569 = vrot.lane.b32.xlu0 %v3306_v26, %s2908_s1 }
  0xef   :  { %1493 = vrot.lane.b32.xlu2 %v2231_v33, %s2905_s28 }
  0xf0   :  { %v1017_v38 = vpop.permute.xlu1 %1016  ;;  %v1003_v39 = vpop.permute.xlu0 %1002 }
  0xf1   :  { %v1098_v40 = vpop.permute.xlu2 %1097 }
  0xf6   :  { %1573 = vrot.lane.b32.xlu1 %v2232_v41, %s2909_s12  ;;  %1500 = vrot.lane.b32.xlu0 %v2232_v41, %s2906_s9 }
  0xf7   :  { %1507 = vrot.lane.b32.xlu2 %v2233_v42, %s2904_s22 }
  0xf8   :  { %v1010_v43 = vpop.permute.xlu0 %1009  ;;  %v805_v44 = vpop.permute.xlu1 %804 }
  0xf9   :  { %v1029_v45 = vsel %vm834_vm2, %v1003_v39, %v1010_v43  ;;  %v836_v46 = vsel %vm834_vm2, %v805_v44, %v812_v31  ;;  %v798_v47 = vpop.permute.xlu2 %797 }
  0xfa   :  { %v1031_v48 = vsel %vm837_vm3, %v1029_v45, %v1017_v38  ;;  %v839_v49 = vsel %vm837_vm3, %v836_v46, %v819_v36 }
  0xfb   :  { %2137 = vmatmul.msk.bf16.vlgmr.msra.gmra.mxu3 %vm944_vm4, %v1031_v48  ;;  %2128 = vmatmul.msk.bf16.vlgmr.msra.gmra.mxu1 %vm944_vm4, %v839_v49 }
  0xfc   :  { %1279 = vmatpush.bf16.msra.mxu3 %v3241_v13  ;;  %1296 = vmatpush.bf16.msra.mxu1 %v3257_v19 }
  0xfe   :  { %1487 = vrot.lane.b32.xlu1 %v3340_v32, %s2908_s1  ;;  %1575 = vrot.lane.b32.xlu0 %v2233_v42, %s2905_s28  ;;  %s2911_s1 = smov 16  }
  0xff   :  { %1489 = vrot.lane.b32.xlu2 %v3308_v27, %s2907_s5  ;;  %s2910_s5 = smov 24  }
 0x100   :  { %v999_v50 = vpop.permute.xlu1 %998  ;;  %v997_v51 = vpop.permute.xlu0 %996  ;;  %1280 = vmatpush.bf16.msra.mxu3 %v3262_v20  ;;  %1297 = vmatpush.bf16.msra.mxu1 %v3270_v21 }
 0x101   :  { %v1020_v52 = vsel %vm820_vm5, %v3214_v9, %v997_v51  ;;  %v1082_v53 = vpop.permute.xlu2 %1081 }
 0x102   :  { %v1022_v54 = vsel %vm824_vm6, %v1020_v52, %v999_v50 }
 0x103   :  { %v1024_v56 = vsel %vm827_vm7, %v1022_v54, %v1001_v37 }
 0x104   :  { %v1026_v58 = vsel %vm830_vm8, %v1024_v56, %v1003_v39  ;;  %1281 = vmatpush.bf16.msra.mxu3 %v3277_v22  ;;  %1298 = vmatpush.bf16.msra.mxu1 %v3286_v23 }
 0x105   :  { %1042 = vmatmul.bf16.vlgmr.msra.gmra.mxu2 %v1026_v58 }
 0x106   :  { %1582 = vrot.lane.b32.xlu1 %v2234_v55, %s2906_s9  ;;  %1491 = vrot.lane.b32.xlu0 %v3306_v26, %s2909_s12  ;;  %s3791_s9 = sld [smem:[#allocation64_spill]]  ;;  %s2912_s12 = smov 8  }
 0x107   :  { %1589 = vrot.lane.b32.xlu2 %v2235_v57, %s2904_s22  ;;  %1361 = vmatpush.bf16.msra.mxu2 %v3241_v13 }
 0x108   :  { %v1091_v59 = vpop.permute.xlu1 %1090  ;;  %v1084_v60 = vpop.permute.xlu0 %1083  ;;  %1282 = vmatpush.bf16.msra.mxu3 %v3299_v24  ;;  %1299 = vmatpush.bf16.msra.mxu1 %v3304_v25 }
 0x109   :  { %v1110_v61 = vsel %vm834_vm2, %v1084_v60, %v1091_v59  ;;  %v3433_v63 = vpop.permute.xlu2 %1165 }
 0x10a   :  { %v1112_v62 = vsel %vm837_vm3, %v1110_v61, %v1098_v40 }
 0x10b   :  { %2146 = vmatmul.msk.bf16.vlgmr.msrb.gmra.mxu3 %vm944_vm4, %v1112_v62  ;;  %1362 = vmatpush.bf16.msra.mxu2 %v3262_v20 }
 0x10c   :  { %1283 = vmatpush.bf16.msra.mxu3 %v3316_v28  ;;  %1300 = vmatpush.bf16.msra.mxu1 %v3322_v29 }
 0x10f   :  { %1363 = vmatpush.bf16.msra.mxu2 %v3277_v22 }
 0x110   :  { %v791_v4 = vpop.permute.xlu1 %790  ;;  %v784_v6 = vpop.permute.xlu0 %783  ;;  %1284 = vmatpush.bf16.msra.mxu3 %v3336_v30 }
 0x111   :  { %v823_v7 = vsel %vm820_vm5, %v2201_v2, %v784_v6  ;;  %v1180_v14 = vpop.permute.xlu2 %1179 }
 0x112   :  { %v826_v9 = vsel %vm824_vm6, %v823_v7, %v791_v4 }
 0x113   :  { %v829_v10 = vsel %vm827_vm7, %v826_v9, %v798_v47  ;;  %1364 = vmatpush.bf16.msra.mxu2 %v3299_v24 }
 0x114   :  { %v832_v11 = vsel %vm830_vm8, %v829_v10, %v805_v44  ;;  %1285 = vmatpush.bf16.msra.mxu3 %v3347_v34 }
 0x115   :  { %959 = vmatmul.bf16.vlgmr.msra.gmra.mxu0 %v832_v11 }
 0x116   :  { %1378 = vmatpush.bf16.msra.mxu0 %v3257_v19 }
 0x117   :  { %1365 = vmatpush.bf16.msra.mxu2 %v3316_v28 }
 0x118   :  { %v1080_v15 = vpop.permute.xlu1 %1079  ;;  %v1078_v16 = vpop.permute.xlu0 %1077  ;;  %1286 = vmatpush.bf16.msra.mxu3 %v3360_v35 }
 0x119   :  { %v1101_v18 = vsel %vm820_vm5, %v3196_v5, %v1078_v16  ;;  %v1162_v5 = vpop.permute.xlu2 %1161 }
 0x11a   :  { %v1103_v26 = vsel %vm824_vm6, %v1101_v18, %v1080_v15  ;;  %1379 = vmatpush.bf16.msra.mxu0 %v3270_v21 }
 0x11b   :  { %v1105_v31 = vsel %vm827_vm7, %v1103_v26, %v1082_v53  ;;  %1366 = vmatpush.bf16.msra.mxu2 %v3336_v30 }
 0x11c   :  { %1460 = vmatpush.bf16.msrb.mxu3 %v3257_v19  ;;  %v1107_v32 = vsel %vm830_vm8, %v1105_v31, %v1084_v60 }
 0x11d   :  { %1123 = vmatmul.bf16.vlgmr.msrb.gmra.mxu1 %v1107_v32 }
 0x11e   :  { %1443 = vmatpush.bf16.msrb.mxu1 %v3241_v13  ;;  %1380 = vmatpush.bf16.msra.mxu0 %v3286_v23 }
 0x11f   :  { %1367 = vmatpush.bf16.msra.mxu2 %v3347_v34 }
 0x120   :  { %1461 = vmatpush.bf16.msrb.mxu3 %v3270_v21  ;;  %v1244_v33 = vpop.permute.xlu1 %1243  ;;  %v1242_v36 = vpop.permute.xlu0 %1241 }
 0x121   :  { %v1262_v40 = vpop.permute.xlu2 %1261  ;;  %v1265_v42 = vsel %vm820_vm5, %v3183_v0, %v1242_v36 }
 0x122   :  { %1444 = vmatpush.bf16.msrb.mxu1 %v3262_v20  ;;  %1381 = vmatpush.bf16.msra.mxu0 %v3304_v25  ;;  %v1267_v43 = vsel %vm824_vm6, %v1265_v42, %v1244_v33 }
 0x123   :  { %1368 = vmatpush.bf16.msra.mxu2 %v3360_v35 }
 0x124   :  { %1462 = vmatpush.bf16.msrb.mxu3 %v3286_v23 }
 0x126   :  { %1445 = vmatpush.bf16.msrb.mxu1 %v3277_v22  ;;  %1382 = vmatpush.bf16.msra.mxu0 %v3322_v29 }
 0x128   :  { %1463 = vmatpush.bf16.msrb.mxu3 %v3304_v25  ;;  %v1246_v37 = vpop.permute.xlu1 %1245  ;;  %v1173_v38 = vpop.permute.xlu0 %1172 }
 0x129   :  { %v1192_v39 = vsel %vm834_vm2, %v3433_v63, %v1173_v38  ;;  %v1269_v44 = vsel %vm827_vm7, %v1267_v43, %v1246_v37  ;;  %v1328_v48 = vpop.permute.xlu2 %1327 }
 0x12a   :  { %v1194_v41 = vsel %vm837_vm3, %v1192_v39, %v1180_v14  ;;  %1446 = vmatpush.bf16.msrb.mxu1 %v3299_v24 }
 0x12b   :  { %2155 = vmatmul.msk.bf16.vlgmr.msrb.gmra.mxu2 %vm944_vm4, %v1194_v41 }
 0x12c   :  { %1464 = vmatpush.bf16.msrb.mxu3 %v3322_v29  ;;  %1542 = vmatpush.bf16.msrb.mxu2 %v3257_v19 }
 0x12e   :  { %1447 = vmatpush.bf16.msrb.mxu1 %v3316_v28 }
 0x130   :  { %v1160_v45 = vpop.permute.xlu1 %1159  ;;  %v1248_v46 = vpop.permute.xlu0 %1247  ;;  %1543 = vmatpush.bf16.msrb.mxu2 %v3270_v21 }
 0x131   :  { %v1271_v47 = vsel %vm830_vm8, %v1269_v44, %v1248_v46  ;;  %v1183_v0 = vsel %vm820_vm5, %v3185_v1, %v1160_v45  ;;  %v1330_v1 = vpop.permute.xlu2 %1329  ;;  %v3550_v45 = vld [vmem:[#allocation2] ss:$8 sm:$0x1] }
 0x132   :  { %1287 = vmatmul.bf16.vlgmr.msra.gmra.mxu3 %v1271_v47  ;;  %1448 = vmatpush.bf16.msrb.mxu1 %v3336_v30  ;;  %v1185_v50 = vsel %vm824_vm6, %v1183_v0, %v1162_v5  ;;  %1749 = vst.msk [vmem:[#allocation2] sm:$0x1] %vm1651_vm0, %v2903_v3 }
 0x133   :  { %1607 = vmatpush.bf16.msra.mxu3 %v3241_v13 }
 0x134   :  { %1544 = vmatpush.bf16.msrb.mxu2 %v3286_v23 }
 0x136   :  { %1449 = vmatpush.bf16.msrb.mxu1 %v3347_v34 }
 0x137   :  { %1608 = vmatpush.bf16.msra.mxu3 %v3262_v20 }
 0x138   :  { %v1255_v49 = vpop.permute.xlu1 %1254  ;;  %v1164_v51 = vpop.permute.xlu0 %1163  ;;  %1545 = vmatpush.bf16.msrb.mxu2 %v3304_v25 }
 0x139   :  { %v1274_v52 = vsel %vm834_vm2, %v1248_v46, %v1255_v49  ;;  %v1187_v53 = vsel %vm827_vm7, %v1185_v50, %v1164_v51  ;;  %v3557_v46 = vld [vmem:[%s3791_s9] ss:$0 sm:$0xff] }
 0x13a   :  { %v1276_v54 = vsel %vm837_vm3, %v1274_v52, %v1262_v40  ;;  %v1189_v55 = vsel %vm830_vm8, %v1187_v53, %v3433_v63  ;;  %1450 = vmatpush.bf16.msrb.mxu1 %v3360_v35  ;;  %v3561_v52 = vld [vmem:[#allocation2 + $0x10] ss:$8 sm:$0x1] }
 0x13b   :  { %1205 = vmatmul.bf16.vlgmr.msrb.gmra.mxu0 %v1189_v55  ;;  %2164 = vmatmul.msk.bf16.vlgmr.msra.gmra.mxu1 %vm944_vm4, %v1276_v54  ;;  %1750 = vst.msk [vmem:[#allocation2 + $0x10] sm:$0x1] %vm1651_vm0, %v2903_v3 }
 0x13c   :  { %1609 = vmatpush.bf16.msra.mxu3 %v3277_v22  ;;  %1525 = vmatpush.bf16.msrb.mxu0 %v3241_v13 }
 0x13d   :  { %1546 = vmatpush.bf16.msrb.mxu2 %v3322_v29 }
 0x13e   :  { %1624 = vmatpush.bf16.msra.mxu1 %v3257_v19  ;;  %v1344_v19 = vpop.permute.xlu2 %1343 }
 0x140   :  { %v1326_v56 = vpop.permute.xlu1 %1325  ;;  %v1324_v57 = vpop.permute.xlu0 %1323  ;;  %1610 = vmatpush.bf16.msra.mxu3 %v3299_v24  ;;  %1526 = vmatpush.bf16.msrb.mxu0 %v3262_v20 }
 0x141   :  { %v1347_v58 = vsel %vm820_vm5, %v3207_v8, %v1324_v57 }
 0x142   :  { %1625 = vmatpush.bf16.msra.mxu1 %v3270_v21  ;;  %v1349_v59 = vsel %vm824_vm6, %v1347_v58, %v1326_v56 }
 0x143   :  { %v1351_v13 = vsel %vm827_vm7, %v1349_v59, %v1328_v48 }
 0x144   :  { %v1353_v60 = vsel %vm830_vm8, %v1351_v13, %v1330_v1  ;;  %1611 = vmatpush.bf16.msra.mxu3 %v3316_v28  ;;  %1527 = vmatpush.bf16.msrb.mxu0 %v3277_v22 }
 0x145   :  { %1369 = vmatmul.bf16.vlgmr.msra.gmra.mxu2 %v1353_v60 }
 0x146   :  { %1626 = vmatpush.bf16.msra.mxu1 %v3286_v23  ;;  %v1410_v8 = vpop.permute.xlu2 %1409 }
 0x148   :  { %v1419_v20 = vpop.permute.xlu1 %1418  ;;  %v1412_v61 = vpop.permute.xlu0 %1411  ;;  %1612 = vmatpush.bf16.msra.mxu3 %v3336_v30  ;;  %1528 = vmatpush.bf16.msrb.mxu0 %v3299_v24 }
 0x149   :  { %v1438_v21 = vsel %vm834_vm2, %v1412_v61, %v1419_v20 }
 0x14a   :  { %1627 = vmatpush.bf16.msra.mxu1 %v3304_v25 }
 0x14c   :  { %1613 = vmatpush.bf16.msra.mxu3 %v3347_v34  ;;  %1529 = vmatpush.bf16.msrb.mxu0 %v3316_v28 }
 0x14e   :  { %1628 = vmatpush.bf16.msra.mxu1 %v3322_v29 }
 0x150   :  { %v1337_v22 = vpop.permute.xlu1 %1336  ;;  %v1426_v62 = vpop.permute.xlu0 %1425  ;;  %1614 = vmatpush.bf16.msra.mxu3 %v3360_v35  ;;  %1530 = vmatpush.bf16.msrb.mxu0 %v3336_v30 }
 0x151   :  { %v1356_v23 = vsel %vm834_vm2, %v1330_v1, %v1337_v22  ;;  %v1440_v24 = vsel %vm837_vm3, %v1438_v21, %v1426_v62  ;;  %v1494_v30 = vpop.permute.xlu2 %1493 }
 0x152   :  { %v1358_v25 = vsel %vm837_vm3, %v1356_v23, %v1344_v19  ;;  %2182 = vmatmul.msk.bf16.vlgmr.msrb.gmra.mxu3 %vm944_vm4, %v1440_v24 }
 0x153   :  { %2173 = vmatmul.msk.bf16.vlgmr.msra.gmra.mxu0 %vm944_vm4, %v1358_v25 }
 0x154   :  { %1531 = vmatpush.bf16.msrb.mxu0 %v3347_v34 }
 0x158   :  { %v1408_v28 = vpop.permute.xlu1 %1407  ;;  %v1406_v29 = vpop.permute.xlu0 %1405  ;;  %1532 = vmatpush.bf16.msrb.mxu0 %v3360_v35 }
 0x159   :  { %v1429_v63 = vsel %vm820_vm5, %v3229_v12, %v1406_v29  ;;  %v1508_v10 = vpop.permute.xlu2 %1507 }
 0x15a   :  { %v1431_v2 = vsel %vm824_vm6, %v1429_v63, %v1408_v28 }
 0x15b   :  { %v1433_v4 = vsel %vm827_vm7, %v1431_v2, %v1410_v8 }
 0x15c   :  { %v1435_v6 = vsel %vm830_vm8, %v1433_v4, %v1412_v61 }
 0x15d   :  { %1451 = vmatmul.bf16.vlgmr.msrb.gmra.mxu1 %v1435_v6 }
 0x160   :  { %v1572_v7 = vpop.permute.xlu1 %1571  ;;  %v1570_v9 = vpop.permute.xlu0 %1569 }
 0x161   :  { %v1593_v12 = vsel %vm820_vm5, %v3308_v27, %v1570_v9  ;;  %v1490_v15 = vpop.permute.xlu2 %1489 }
 0x162   :  { %v1595_v16 = vsel %vm824_vm6, %v1593_v12, %v1572_v7 }
 0x168   :  { %v1574_v11 = vpop.permute.xlu1 %1573  ;;  %v1501_v34 = vpop.permute.xlu0 %1500 }
 0x169   :  { %v1520_v14 = vsel %vm834_vm2, %v1494_v30, %v1501_v34  ;;  %v1597_v18 = vsel %vm827_vm7, %v1595_v16, %v1574_v11  ;;  %v1590_v33 = vpop.permute.xlu2 %1589 }
 0x16a   :  { %v1522_v35 = vsel %vm837_vm3, %v1520_v14, %v1508_v10 }
 0x16b   :  { %2191 = vmatmul.msk.bf16.vlgmr.msrb.gmra.mxu2 %vm944_vm4, %v1522_v35 }
 0x170   :  { %v1488_v26 = vpop.permute.xlu1 %1487  ;;  %v1576_v31 = vpop.permute.xlu0 %1575 }
 0x171   :  { %v1599_v32 = vsel %vm830_vm8, %v1597_v18, %v1576_v31  ;;  %v1511_v5 = vsel %vm820_vm5, %v3252_v17, %v1488_v26 }
 0x172   :  { %1615 = vmatmul.bf16.vlgmr.msra.gmra.mxu3 %v1599_v32  ;;  %v1513_v37 = vsel %vm824_vm6, %v1511_v5, %v1490_v15 }
 0x178   :  { %v1583_v36 = vpop.permute.xlu1 %1582  ;;  %v1492_v27 = vpop.permute.xlu0 %1491 }
 0x179   :  { %v1602_v38 = vsel %vm834_vm2, %v1576_v31, %v1583_v36  ;;  %v1515_v39 = vsel %vm827_vm7, %v1513_v37, %v1492_v27  ;;  %v974_v43 = vpop.f32.mrf.mxu1  ;;  %v3588_v31 = vld [vmem:[#allocation2] ss:$8 sm:$0x1] }
 0x17a   :  { %v1604_v40 = vsel %vm837_vm3, %v1602_v38, %v1590_v33  ;;  %v1517_v41 = vsel %vm830_vm8, %v1515_v39, %v1494_v30  ;;  %1826 = vst.msk [vmem:[#allocation2] sm:$0x1] %vm1651_vm0, %v2903_v3 }
 0x17b   :  { %2200 = vmatmul.msk.bf16.vlgmr.msra.gmra.mxu1 %vm944_vm4, %v1604_v40  ;;  %1533 = vmatmul.bf16.vlgmr.msrb.gmra.mxu0 %v1517_v41 }
 0x17e   :  { %v1057_v42 = vpop.f32.mrf.mxu3 }
 0x181   :  { %v976_v47 = vpop.f32.mrf.mxu1 }
 0x186   :  { %v1059_v44 = vpop.f32.mrf.mxu3 }
 0x188   :  { %v1043_v17 = vpop.f32.mrf.mxu2 }
 0x189   :  { %v1044_v49 = vadd.f32 %v3557_v46, %v1043_v17 }
 0x18b   :  { %v1058_v53 = vadd.f32 %v1057_v42, %v1044_v49 }
 0x18d   :  { %v1062_v13 = vmax.f32 %v1058_v53, 0.0 }
 0x18e   :  { %v1138_v54 = vpop.f32.mrf.mxu3 }
 0x190   :  { %v1045_v55 = vpop.f32.mrf.mxu2 }
 0x191   :  { %v1046_v60 = vadd.f32 %v3557_v46, %v1045_v55 }
 0x192   :  { %v960_v48 = vpop.f32.mrf.mxu0 }
 0x193   :  { %v961_v0 = vadd.f32 %v3557_v46, %v960_v48  ;;  %v1060_v22 = vadd.f32 %v1059_v44, %v1046_v60 }
 0x195   :  { %v975_v50 = vadd.f32 %v974_v43, %v961_v0  ;;  %v1063_v29 = vmax.f32 %v1060_v22, 0.0 }
 0x196   :  { %v1140_v28 = vpop.f32.mrf.mxu3 }
 0x197   :  { %v979_v51 = vmax.f32 %v975_v50, 0.0 }
 0x199   :  { %v990_v57 = vmul.f32 0.0, %v979_v51  ;;  %v1756_v51 = vld [vmem:[#allocation2 + $0x10] ss:$8 sm:$0x1] }
 0x19a   :  { %v962_v1 = vpop.f32.mrf.mxu0  ;;  %v1124_v56 = vpop.f32.mrf.mxu1  ;;  %1827 = vst.msk [vmem:[#allocation2 + $0x10] sm:$0x1] %vm1651_vm0, %v2903_v3 }
 0x19b   :  { %v963_v58 = vadd.f32 %v3557_v46, %v962_v1  ;;  %v1125_v59 = vadd.f32 %v3557_v46, %v1124_v56  ;;  %v1647_v61 = vmax.f32 %v990_v57, %v1062_v13 }
 0x19d   :  { %v977_v19 = vadd.f32 %v976_v47, %v963_v58  ;;  %v3568_v20 = vadd.f32 %v1138_v54, %v1125_v59 }
 0x19f   :  { %v980_v8 = vmax.f32 %v977_v19, 0.0  ;;  %v1143_v21 = vmax.f32 %v3568_v20, 0.0 }
 0x1a1   :  { %v1649_v62 = vmax.f32 %v1647_v61, %v1143_v21  ;;  %v991_v24 = vmul.f32 0.0, %v980_v8 }
 0x1a2   :  { %v1126_v23 = vpop.f32.mrf.mxu1 }
 0x1a3   :  { %1655 = vst.msk [vmem:[#allocation2 + $0x1] sm:$0xff] %vm1654_vm9, %v1649_v62  ;;  %v1127_v25 = vadd.f32 %v3557_v46, %v1126_v23  ;;  %v1648_v30 = vmax.f32 %v991_v24, %v1063_v29 }
 0x1a5   :  { %v3575_v63 = vadd.f32 %v1140_v28, %v1127_v25 }
 0x1a7   :  { %v1144_v2 = vmax.f32 %v3575_v63, 0.0 }
 0x1a9   :  { %v1650_v4 = vmax.f32 %v1648_v30, %v1144_v2 }
 0x1aa   :  { %v3580_v6 = vld [vmem:[#allocation2 + $0x1] ss:$8 sm:$0x1]  ;;  %v1691_v7 = vld [vmem:[#allocation2 + $0x6] ss:$8 sm:$0x1] }
 0x1ab   :  { %1656 = vst.msk [vmem:[#allocation2 + $0x11] sm:$0xff] %vm1654_vm9, %v1650_v4  ;;  %v1699_v9 = vld [vmem:[#allocation2 + $0x7] ss:$8 sm:$0x1]  ;;  %v1670_v10 = vmax.f32 %v3550_v45, %v3580_v6 }
 0x1ac   :  { %v1703_v11 = vld [vmem:[#allocation2 + $0x8] ss:$8 sm:$0x1]  ;;  %v1706_v34 = vmax.f32 %v1691_v7, %v1699_v9  ;;  %v1679_v14 = vld [vmem:[#allocation2 + $0x4] ss:$8 sm:$0x1] }
 0x1ad   :  { %v1687_v35 = vld [vmem:[#allocation2 + $0x5] ss:$8 sm:$0x1]  ;;  %v3585_v12 = vld [vmem:[#allocation2 + $0x2] ss:$8 sm:$0x1] }
 0x1ae   :  { %v1708_v15 = vmax.f32 %v1706_v34, %v1703_v11  ;;  %v1694_v16 = vmax.f32 %v1679_v14, %v1687_v35  ;;  %v1675_v18 = vld [vmem:[#allocation2 + $0x3] ss:$8 sm:$0x1]  ;;  %v1220_v0 = vpop.f32.mrf.mxu2 }
 0x1af   :  { %v1682_v26 = vmax.f32 %v3585_v12, %v1675_v18 }
 0x1b0   :  { %1728 = vrot.lane.b32.xlu1 %v1708_v15, %s2910_s5  ;;  %v1696_v32 = vmax.f32 %v1694_v16, %v1691_v7 }
 0x1b1   :  { %v1684_v5 = vmax.f32 %v1682_v26, %v1679_v14 }
 0x1b2   :  { %v3593_v33 = vld [vmem:[#allocation2 + $0x11] ss:$8 sm:$0x1]  ;;  %1720 = vrot.lane.b32.xlu2 %v1696_v32, %s2911_s1  ;;  %v3596_v36 = vld [vmem:[#allocation2 + $0x12] ss:$8 sm:$0x1] }
 0x1b3   :  { %1712 = vrot.lane.b32.xlu0 %v1684_v5, %s2912_s12  ;;  %v1677_v37 = vld [vmem:[#allocation2 + $0x13] ss:$8 sm:$0x1]  ;;  %v1681_v38 = vld [vmem:[#allocation2 + $0x14] ss:$8 sm:$0x1]  ;;  %v1671_v27 = vmax.f32 %v3561_v52, %v3593_v33 }
 0x1b4   :  { %v1683_v39 = vmax.f32 %v3596_v36, %v1677_v37  ;;  %v1693_v40 = vld [vmem:[#allocation2 + $0x16] ss:$8 sm:$0x1]  ;;  %v1701_v41 = vld [vmem:[#allocation2 + $0x17] ss:$8 sm:$0x1] }
 0x1b5   :  { %v1288_v42 = vpop.f32.mrf.mxu3  ;;  %v1707_v43 = vmax.f32 %v1693_v40, %v1701_v41  ;;  %v1689_v44 = vld [vmem:[#allocation2 + $0x15] ss:$8 sm:$0x1]  ;;  %v1705_v47 = vld [vmem:[#allocation2 + $0x18] ss:$8 sm:$0x1] }
 0x1b6   :  { %v1685_v17 = vmax.f32 %v1683_v39, %v1681_v38  ;;  %v1695_v48 = vmax.f32 %v1681_v38, %v1689_v44  ;;  %v1289_v49 = vadd.f32 %v3557_v46, %v1288_v42  ;;  %v1222_v23 = vpop.f32.mrf.mxu2 }
 0x1b7   :  { %v1709_v50 = vmax.f32 %v1707_v43, %v1705_v47 }
 0x1b8   :  { %1714 = vrot.lane.b32.xlu1 %v1685_v17, %s2912_s12  ;;  %v1697_v53 = vmax.f32 %v1695_v48, %v1693_v40  ;;  %v1206_v54 = vpop.f32.mrf.mxu0  ;;  %v1302_v55 = vpop.f32.mrf.mxu1 }
 0x1b9   :  { %v1207_v1 = vadd.f32 %v3557_v46, %v1206_v54  ;;  %v3609_v57 = vadd.f32 %v1302_v55, %v1289_v49 }
 0x1ba   :  { %1730 = vrot.lane.b32.xlu2 %v1709_v50, %s2910_s5  ;;  %v3639_v50 = vld [vmem:[#allocation2 + $0x10] ss:$8 sm:$0x1] }
 0x1bb   :  { %1722 = vrot.lane.b32.xlu0 %v1697_v53, %s2911_s1  ;;  %v1221_v56 = vadd.f32 %v1220_v0, %v1207_v1  ;;  %v1307_v13 = vmax.f32 %v3609_v57, 0.0  ;;  %1904 = vst.msk [vmem:[#allocation2 + $0x10] sm:$0x1] %vm1651_vm0, %v2903_v3 }
 0x1bd   :  { %v1225_v58 = vmax.f32 %v1221_v56, 0.0  ;;  %v1290_v59 = vpop.f32.mrf.mxu3 }
 0x1be   :  { %v1291_v19 = vadd.f32 %v3557_v46, %v1290_v59 }
 0x1bf   :  { %v1745_v60 = vmax.f32 %v1143_v21, %v1225_v58 }
 0x1c0   :  { %v1208_v61 = vpop.f32.mrf.mxu0  ;;  %v1304_v8 = vpop.f32.mrf.mxu1 }
 0x1c1   :  { %v1747_v22 = vmax.f32 %v1745_v60, %v1307_v13  ;;  %v1209_v62 = vadd.f32 %v3557_v46, %v1208_v61  ;;  %v3619_v25 = vadd.f32 %v1304_v8, %v1291_v19 }
 0x1c3   :  { %1751 = vst.msk [vmem:[#allocation2 + $0x1] sm:$0xff] %vm1654_vm9, %v1747_v22  ;;  %v1223_v24 = vadd.f32 %v1222_v23, %v1209_v62  ;;  %v1308_v29 = vmax.f32 %v3619_v25, 0.0 }
 0x1c5   :  { %v1226_v28 = vmax.f32 %v1223_v24, 0.0 }
 0x1c7   :  { %v1746_v20 = vmax.f32 %v1144_v2, %v1226_v28  ;;  %v3631_v2 = vld [vmem:[#allocation2] ss:$8 sm:$0x1] }
 0x1c8   :  { %v1370_v18 = vpop.f32.mrf.mxu2  ;;  %1903 = vst.msk [vmem:[#allocation2] sm:$0x1] %vm1651_vm0, %v2903_v3 }
 0x1c9   :  { %v1748_v21 = vmax.f32 %v1746_v20, %v1308_v29  ;;  %v1371_v42 = vadd.f32 %v3557_v46, %v1370_v18 }
 0x1ca   :  { %v1767_v30 = vld [vmem:[#allocation2 + $0x4] ss:$8 sm:$0x1]  ;;  %v1773_v4 = vld [vmem:[#allocation2 + $0x5] ss:$8 sm:$0x1] }
 0x1cb   :  { %1752 = vst.msk [vmem:[#allocation2 + $0x11] sm:$0xff] %vm1654_vm9, %v1748_v21  ;;  %v1775_v7 = vld [vmem:[#allocation2 + $0x6] ss:$8 sm:$0x1]  ;;  %v1777_v9 = vmax.f32 %v1767_v30, %v1773_v4 }
 0x1cc   :  { %v1757_v11 = vld [vmem:[#allocation2 + $0x1] ss:$8 sm:$0x1]  ;;  %v1759_v34 = vld [vmem:[#allocation2 + $0x2] ss:$8 sm:$0x1] }
 0x1cd   :  { %v1779_v14 = vmax.f32 %v1777_v9, %v1775_v7  ;;  %v1765_v35 = vld [vmem:[#allocation2 + $0x3] ss:$8 sm:$0x1]  ;;  %v1761_v15 = vmax.f32 %v3588_v31, %v1757_v11  ;;  %v1781_v32 = vld [vmem:[#allocation2 + $0x7] ss:$8 sm:$0x1] }
 0x1ce   :  { %v1769_v16 = vmax.f32 %v1759_v34, %v1765_v35  ;;  %v1785_v41 = vmax.f32 %v1775_v7, %v1781_v32  ;;  %v1783_v47 = vld [vmem:[#allocation2 + $0x8] ss:$8 sm:$0x1] }
 0x1cf   :  { %1799 = vrot.lane.b32.xlu2 %v1779_v14, %s2911_s1  ;;  %v3629_v63 = vmax.f32 %v1761_v15, %v1759_v34 }
 0x1d0   :  { %v1771_v26 = vmax.f32 %v1769_v16, %v1767_v30  ;;  %v1384_v5 = vpop.f32.mrf.mxu0  ;;  %v1787_v53 = vmax.f32 %v1785_v41, %v1783_v47 }
 0x1d1   :  { %v1385_v0 = vadd.f32 %v1384_v5, %v1371_v42 }
 0x1d2   :  { %1791 = vrot.lane.b32.xlu0 %v1771_v26, %s2912_s12  ;;  %v1758_v37 = vld [vmem:[#allocation2 + $0x11] ss:$8 sm:$0x1]  ;;  %v1760_v38 = vld [vmem:[#allocation2 + $0x12] ss:$8 sm:$0x1] }
 0x1d3   :  { %v1766_v39 = vld [vmem:[#allocation2 + $0x13] ss:$8 sm:$0x1]  ;;  %v1762_v31 = vmax.f32 %v1756_v51, %v1758_v37  ;;  %v1768_v43 = vld [vmem:[#allocation2 + $0x14] ss:$8 sm:$0x1]  ;;  %v1372_v51 = vpop.f32.mrf.mxu2 }
 0x1d4   :  { %v1770_v40 = vmax.f32 %v1760_v38, %v1766_v39  ;;  %v1776_v48 = vld [vmem:[#allocation2 + $0x16] ss:$8 sm:$0x1]  ;;  %v1782_v49 = vld [vmem:[#allocation2 + $0x17] ss:$8 sm:$0x1]  ;;  %v1373_v61 = vadd.f32 %v3557_v46, %v1372_v51 }
 0x1d5   :  { %v3637_v44 = vmax.f32 %v1762_v31, %v1760_v38  ;;  %v1774_v54 = vld [vmem:[#allocation2 + $0x15] ss:$8 sm:$0x1]  ;;  %v1466_v55 = vpop.f32.mrf.mxu3  ;;  %v1786_v56 = vmax.f32 %v1776_v48, %v1782_v49  ;;  %v1389_v58 = vmax.f32 %v1385_v0, 0.0 }
 0x1d6   :  { %v1772_v17 = vmax.f32 %v1770_v40, %v1768_v43  ;;  %v1778_v19 = vmax.f32 %v1768_v43, %v1774_v54  ;;  %v1784_v22 = vld [vmem:[#allocation2 + $0x18] ss:$8 sm:$0x1] }
 0x1d7   :  { %v1788_v62 = vmax.f32 %v1786_v56, %v1784_v22  ;;  %v1822_v3 = vmax.f32 %v1307_v13, %v1389_v58 }
 0x1d8   :  { %1793 = vrot.lane.b32.xlu1 %v1772_v17, %s2912_s12  ;;  %v1386_v60 = vpop.f32.mrf.mxu0  ;;  %v1780_v28 = vmax.f32 %v1778_v19, %v1776_v48 }
 0x1d9   :  { %v1387_v23 = vadd.f32 %v1386_v60, %v1373_v61 }
 0x1da   :  { %1807 = vrot.lane.b32.xlu0 %v1787_v53, %s2910_s5  ;;  %v1452_v1 = vpop.f32.mrf.mxu1 }
 0x1db   :  { %v1453_v59 = vadd.f32 %v3557_v46, %v1452_v1  ;;  %v1390_v30 = vmax.f32 %v1387_v23, 0.0 }
 0x1dd   :  { %v3647_v8 = vadd.f32 %v1466_v55, %v1453_v59  ;;  %v1468_v7 = vpop.f32.mrf.mxu3  ;;  %v1823_v57 = vmax.f32 %v1308_v29, %v1390_v30 }
 0x1df   :  { %v1471_v24 = vmax.f32 %v3647_v8, 0.0 }
 0x1e0   :  { %1809 = vrot.lane.b32.xlu1 %v1788_v62, %s2910_s5 }
 0x1e1   :  { %v1824_v20 = vmax.f32 %v1822_v3, %v1471_v24 }
 0x1e2   :  { %1801 = vrot.lane.b32.xlu0 %v1780_v28, %s2911_s1  ;;  %v1454_v21 = vpop.f32.mrf.mxu1 }
 0x1e3   :  { %1828 = vst.msk [vmem:[#allocation2 + $0x1] sm:$0xff] %vm1654_vm9, %v1824_v20  ;;  %v1455_v4 = vadd.f32 %v3557_v46, %v1454_v21 }
 0x1e5   :  { %v1469_v9 = vadd.f32 %v1468_v7, %v1455_v4 }
 0x1e7   :  { %v1472_v13 = vmax.f32 %v1469_v9, 0.0 }
 0x1e9   :  { %v1825_v11 = vmax.f32 %v1823_v57, %v1472_v13 }
 0x1ea   :  { %v1844_v34 = vld [vmem:[#allocation2 + $0x4] ss:$8 sm:$0x1]  ;;  %v1850_v14 = vld [vmem:[#allocation2 + $0x5] ss:$8 sm:$0x1] }
 0x1eb   :  { %1829 = vst.msk [vmem:[#allocation2 + $0x11] sm:$0xff] %vm1654_vm9, %v1825_v11  ;;  %v1852_v35 = vld [vmem:[#allocation2 + $0x6] ss:$8 sm:$0x1]  ;;  %v1854_v15 = vmax.f32 %v1844_v34, %v1850_v14 }
 0x1ec   :  { %v1836_v16 = vld [vmem:[#allocation2 + $0x2] ss:$8 sm:$0x1]  ;;  %v1842_v18 = vld [vmem:[#allocation2 + $0x3] ss:$8 sm:$0x1] }
 0x1ed   :  { %v1856_v26 = vmax.f32 %v1854_v15, %v1852_v35  ;;  %v1846_v32 = vmax.f32 %v1836_v16, %v1842_v18  ;;  %v1858_v5 = vld [vmem:[#allocation2 + $0x7] ss:$8 sm:$0x1]  ;;  %v1834_v37 = vld [vmem:[#allocation2 + $0x1] ss:$8 sm:$0x1] }
 0x1ee   :  { %v1838_v25 = vmax.f32 %v3631_v2, %v1834_v37  ;;  %v1862_v29 = vmax.f32 %v1852_v35, %v1858_v5  ;;  %v1860_v42 = vld [vmem:[#allocation2 + $0x8] ss:$8 sm:$0x1]  ;;  %v1548_v1 = vpop.f32.mrf.mxu2 }
 0x1ef   :  { %1876 = vrot.lane.b32.xlu2 %v1856_v26, %s2911_s1  ;;  %v1848_v38 = vmax.f32 %v1846_v32, %v1844_v34 }
 0x1f0   :  { %v3662_v39 = vmax.f32 %v1838_v25, %v1836_v16  ;;  %v1864_v0 = vmax.f32 %v1862_v29, %v1860_v42 }
 0x1f1   :  { %1868 = vrot.lane.b32.xlu1 %v1848_v38, %s2912_s12 }
 0x1f2   :  { %v1845_v31 = vld [vmem:[#allocation2 + $0x14] ss:$8 sm:$0x1]  ;;  %v1851_v40 = vld [vmem:[#allocation2 + $0x15] ss:$8 sm:$0x1] }
 0x1f3   :  { %v1855_v41 = vmax.f32 %v1845_v31, %v1851_v40  ;;  %v1853_v43 = vld [vmem:[#allocation2 + $0x16] ss:$8 sm:$0x1]  ;;  %v1835_v17 = vld [vmem:[#allocation2 + $0x11] ss:$8 sm:$0x1] }
 0x1f4   :  { %v1839_v49 = vmax.f32 %v3639_v50, %v1835_v17  ;;  %v1837_v53 = vld [vmem:[#allocation2 + $0x12] ss:$8 sm:$0x1]  ;;  %v1843_v51 = vld [vmem:[#allocation2 + $0x13] ss:$8 sm:$0x1] }
 0x1f5   :  { %v1616_v47 = vpop.f32.mrf.mxu3  ;;  %v1857_v48 = vmax.f32 %v1855_v41, %v1853_v43  ;;  %v1847_v58 = vmax.f32 %v1837_v53, %v1843_v51  ;;  %v1859_v14 = vld [vmem:[#allocation2 + $0x17] ss:$8 sm:$0x1]  ;;  %v1861_v35 = vld [vmem:[#allocation2 + $0x18] ss:$8 sm:$0x1] }
 0x1f6   :  { %v3667_v2 = vmax.f32 %v1839_v49, %v1837_v53  ;;  %v1617_v54 = vadd.f32 %v3557_v46, %v1616_v47  ;;  %v1550_v30 = vpop.f32.mrf.mxu2  ;;  %v1863_v25 = vmax.f32 %v1853_v43, %v1859_v14 }
 0x1f7   :  { %1878 = vrot.lane.b32.xlu0 %v1857_v48, %s2911_s1  ;;  %1884 = vrot.lane.b32.xlu2 %v1864_v0, %s2910_s5  ;;  %v1849_v50 = vmax.f32 %v1847_v58, %v1845_v31 }
 0x1f8   :  { %v1630_v55 = vpop.f32.mrf.mxu1  ;;  %v1534_v56 = vpop.f32.mrf.mxu0  ;;  %v1865_v47 = vmax.f32 %v1863_v25, %v1861_v35 }
 0x1f9   :  { %v1535_v59 = vadd.f32 %v3557_v46, %v1534_v56  ;;  %v1631_v19 = vadd.f32 %v1630_v55, %v1617_v54 }
 0x1fb   :  { %v1549_v60 = vadd.f32 %v1548_v1, %v1535_v59  ;;  %v1635_v22 = vmax.f32 %v1631_v19, 0.0  ;;  %v1672_v59 = vmax.f32 %v1670_v10, %v3585_v12 }
 0x1fd   :  { %v1618_v61 = vpop.f32.mrf.mxu3  ;;  %v1553_v8 = vmax.f32 %v1549_v60, 0.0 }
 0x1fe   :  { %v1619_v3 = vadd.f32 %v3557_v46, %v1618_v61 }
 0x1ff   :  { %1870 = vrot.lane.b32.xlu2 %v1849_v50, %s2912_s12  ;;  %v1899_v62 = vmax.f32 %v1471_v24, %v1553_v8  ;;  %v1673_v8 = vmax.f32 %v1671_v27, %v3596_v36 }
 0x200   :  { %v1536_v23 = vpop.f32.mrf.mxu0  ;;  %v1632_v28 = vpop.f32.mrf.mxu1 }
 0x201   :  { %v1901_v20 = vmax.f32 %v1899_v62, %v1635_v22  ;;  %v1537_v21 = vadd.f32 %v3557_v46, %v1536_v23  ;;  %v1633_v7 = vadd.f32 %v1632_v28, %v1619_v3 }
 0x203   :  { %v1551_v4 = vadd.f32 %v1550_v30, %v1537_v21  ;;  %1905 = vst.msk [vmem:[#allocation2 + $0x1] sm:$0xff] %vm1654_vm9, %v1901_v20  ;;  %v1636_v57 = vmax.f32 %v1633_v7, 0.0 }
 0x205   :  { %v1554_v9 = vmax.f32 %v1551_v4, 0.0 }
 0x207   :  { %v1900_v11 = vmax.f32 %v1472_v13, %v1554_v9 }
 0x209   :  { %v1902_v34 = vmax.f32 %v1900_v11, %v1636_v57 }
 0x20a   :  { %v1921_v15 = vld [vmem:[#allocation2 + $0x4] ss:$8 sm:$0x1]  ;;  %v1927_v24 = vld [vmem:[#allocation2 + $0x5] ss:$8 sm:$0x1] }
 0x20b   :  { %v1929_v16 = vld [vmem:[#allocation2 + $0x6] ss:$8 sm:$0x1]  ;;  %v1931_v18 = vmax.f32 %v1921_v15, %v1927_v24  ;;  %v3675_v26 = vld [vmem:[#allocation2 + $0x2] ss:$8 sm:$0x1] }
 0x20c   :  { %v1919_v32 = vld [vmem:[#allocation2 + $0x3] ss:$8 sm:$0x1]  ;;  %1906 = vst.msk [vmem:[#allocation2 + $0x11] sm:$0xff] %vm1654_vm9, %v1902_v34  ;;  %v1721_v58 = vpop.permute.xlu2 %1720 }
 0x20d   :  { %v1933_v46 = vmax.f32 %v1931_v18, %v1929_v16  ;;  %v1923_v5 = vmax.f32 %v3675_v26, %v1919_v32  ;;  %v1935_v49 = vld [vmem:[#allocation2 + $0x7] ss:$8 sm:$0x1]  ;;  %v1937_v55 = vld [vmem:[#allocation2 + $0x8] ss:$8 sm:$0x1] }
 0x20e   :  { %v1939_v43 = vmax.f32 %v1929_v16, %v1935_v49  ;;  %v1910_v18 = vld [vmem:[#allocation2 + $0x10] ss:$8 sm:$0x1] }
 0x20f   :  { %1953 = vrot.lane.b32.xlu1 %v1933_v46, %s2911_s1  ;;  %v1925_v37 = vmax.f32 %v1923_v5, %v1921_v15  ;;  %v1909_v5 = vld [vmem:[#allocation2] ss:$8 sm:$0x1] }
 0x210   :  { %v1941_v1 = vmax.f32 %v1939_v43, %v1937_v55 }
 0x211   :  { %1945 = vrot.lane.b32.xlu0 %v1925_v37, %s2912_s12  ;;  %v1911_v37 = vld [vmem:[#allocation2 + $0x1] ss:$8 sm:$0x1] }
 0x213   :  { %v1922_v13 = vld [vmem:[#allocation2 + $0x14] ss:$8 sm:$0x1]  ;;  %v1928_v38 = vld [vmem:[#allocation2 + $0x15] ss:$8 sm:$0x1] }
 0x214   :  { %v1932_v29 = vmax.f32 %v1922_v13, %v1928_v38  ;;  %v3681_v31 = vld [vmem:[#allocation2 + $0x12] ss:$8 sm:$0x1]  ;;  %v1930_v40 = vld [vmem:[#allocation2 + $0x16] ss:$8 sm:$0x1]  ;;  %v1731_v10 = vpop.permute.xlu2 %1730  ;;  %v1915_v38 = vmax.f32 %v1909_v5, %v1911_v37 }
 0x215   :  { %v1920_v41 = vld [vmem:[#allocation2 + $0x13] ss:$8 sm:$0x1]  ;;  %v1936_v48 = vld [vmem:[#allocation2 + $0x17] ss:$8 sm:$0x1] }
 0x216   :  { %v1934_v42 = vmax.f32 %v1932_v29, %v1930_v40  ;;  %v1924_v17 = vmax.f32 %v3681_v31, %v1920_v41  ;;  %v1940_v53 = vmax.f32 %v1930_v40, %v1936_v48  ;;  %v1938_v51 = vld [vmem:[#allocation2 + $0x18] ss:$8 sm:$0x1]  ;;  %v1912_v32 = vld [vmem:[#allocation2 + $0x11] ss:$8 sm:$0x1]  ;;  %v1917_v48 = vmax.f32 %v1915_v38, %v3675_v26 }
 0x217   :  { %v1916_v46 = vmax.f32 %v1910_v18, %v1912_v32 }
 0x218   :  { %1955 = vrot.lane.b32.xlu2 %v1934_v42, %s2911_s1  ;;  %v1926_v0 = vmax.f32 %v1924_v17, %v1922_v13  ;;  %v1942_v54 = vmax.f32 %v1940_v53, %v1938_v51 }
 0x219   :  { %1886 = vrot.lane.b32.xlu0 %v1865_v47, %s2910_s5  ;;  %v1918_v25 = vmax.f32 %v1916_v46, %v3681_v31 }
 0x21a   :  { %1947 = vrot.lane.b32.xlu1 %v1926_v0, %s2912_s12 }
 0x220   :  { %1963 = vrot.lane.b32.xlu2 %v1942_v54, %s2910_s5 }
 0x222   :  { %v1729_v56 = vpop.permute.xlu1 %1728  ;;  %1961 = vrot.lane.b32.xlu1 %v1941_v1, %s2910_s5 }
 0x225   :  { %v1713_v60 = vpop.permute.xlu0 %1712 }
 0x226   :  { %v1734_v19 = vsel %vm1654_vm9, %v1672_v59, %v1713_v60 }
 0x227   :  { %v1737_v61 = vsel %vm1736_vm10, %v1734_v19, %v1721_v58 }
 0x228   :  { %v1740_v50 = vsel %vm1739_vm11, %v1737_v61, %v1729_v56 }
 0x229   :  { %1743 = vst.msk [vmem:[#allocation39] sm:$0x1] %vm1742_vm12, %v1740_v50  ;;  %v1800_v20 = vpop.permute.xlu2 %1799 }
 0x22a   :  { %v1715_v22 = vpop.permute.xlu1 %1714 }
 0x22b   :  { %v1735_v45 = vsel %vm1654_vm9, %v1673_v8, %v1715_v22 }
 0x22d   :  { %v1723_v6 = vpop.permute.xlu0 %1722 }
 0x22e   :  { %v1738_v12 = vsel %vm1736_vm10, %v1735_v45, %v1723_v6 }
 0x22f   :  { %v1741_v62 = vsel %vm1739_vm11, %v1738_v12, %v1731_v10 }
 0x230   :  { %1744 = vst.msk [vmem:[#allocation39 + $0x4] sm:$0x1] %vm1742_vm12, %v1741_v62 }
 0x244   :  { %v1792_v3 = vpop.permute.xlu0 %1791 }
 0x245   :  { %v1813_v23 = vsel %vm1654_vm9, %v3629_v63, %v1792_v3 }
 0x246   :  { %v1815_v52 = vsel %vm1736_vm10, %v1813_v23, %v1800_v20 }
 0x249   :  { %v1877_v63 = vpop.permute.xlu2 %1876 }
 0x24a   :  { %v1794_v28 = vpop.permute.xlu1 %1793 }
 0x24b   :  { %v1814_v27 = vsel %vm1654_vm9, %v3637_v44, %v1794_v28 }
 0x24c   :  { %v1808_v21 = vpop.permute.xlu0 %1807 }
 0x24d   :  { %v1817_v33 = vsel %vm1739_vm11, %v1815_v52, %v1808_v21 }
 0x24e   :  { %1820 = vst.msk [vmem:[#allocation39 + $0x1] sm:$0x1] %vm1742_vm12, %v1817_v33 }
 0x251   :  { %v1885_v11 = vpop.permute.xlu2 %1884 }
 0x252   :  { %v1810_v36 = vpop.permute.xlu1 %1809 }
 0x254   :  { %v1802_v30 = vpop.permute.xlu0 %1801 }
 0x255   :  { %v1816_v4 = vsel %vm1736_vm10, %v1814_v27, %v1802_v30 }
 0x256   :  { %v1818_v7 = vsel %vm1739_vm11, %v1816_v4, %v1810_v36 }
 0x257   :  { %1821 = vst.msk [vmem:[#allocation39 + $0x5] sm:$0x1] %vm1742_vm12, %v1818_v7 }
 0x259   :  { %v1871_v35 = vpop.permute.xlu2 %1870 }
 0x263   :  { %v1869_v9 = vpop.permute.xlu1 %1868 }
 0x264   :  { %v1890_v57 = vsel %vm1654_vm9, %v3662_v39, %v1869_v9  ;;  %v1891_v39 = vsel %vm1654_vm9, %v3667_v2, %v1871_v35 }
 0x265   :  { %v1892_v34 = vsel %vm1736_vm10, %v1890_v57, %v1877_v63 }
 0x266   :  { %v1894_v14 = vsel %vm1739_vm11, %v1892_v34, %v1885_v11 }
 0x267   :  { %1897 = vst.msk [vmem:[#allocation39 + $0x2] sm:$0x1] %vm1742_vm12, %v1894_v14 }
 0x269   :  { %v1879_v44 = vpop.permute.xlu0 %1878 }
 0x26a   :  { %v1893_v13 = vsel %vm1736_vm10, %v1891_v39, %v1879_v44 }
 0x272   :  { %v1956_v16 = vpop.permute.xlu2 %1955 }
 0x27a   :  { %v1964_v17 = vpop.permute.xlu2 %1963 }
 0x281   :  { %v1954_v15 = vpop.permute.xlu1 %1953 }
 0x283   :  { %v1946_v24 = vpop.permute.xlu0 %1945 }
 0x284   :  { %v1967_v31 = vsel %vm1654_vm9, %v1917_v48, %v1946_v24 }
 0x285   :  { %v1969_v49 = vsel %vm1736_vm10, %v1967_v31, %v1954_v15 }
 0x28b   :  { %v1887_v29 = vpop.permute.xlu0 %1886 }
 0x28c   :  { %v1948_v40 = vpop.permute.xlu1 %1947  ;;  %v1895_v41 = vsel %vm1739_vm11, %v1893_v13, %v1887_v29 }
 0x28d   :  { %v1968_v42 = vsel %vm1654_vm9, %v1918_v25, %v1948_v40  ;;  %1898 = vst.msk [vmem:[#allocation39 + $0x6] sm:$0x1] %vm1742_vm12, %v1895_v41 }
 0x28e   :  { %v1970_v47 = vsel %vm1736_vm10, %v1968_v42, %v1956_v16 }
 0x28f   :  { %v1972_v2 = vsel %vm1739_vm11, %v1970_v47, %v1964_v17 }
 0x290   :  { %1975 = vst.msk [vmem:[#allocation39 + $0x7] sm:$0x1] %vm1742_vm12, %v1972_v2 }
 0x294   :  { %v1962_v0 = vpop.permute.xlu1 %1961 }
 0x295   :  { %v1971_v53 = vsel %vm1739_vm11, %v1969_v49, %v1962_v0 }
 0x296   :  { %1974 = vst.msk [vmem:[#allocation39 + $0x3] sm:$0x1] %vm1742_vm12, %v1971_v53 }
 0x297   :  { %1988 = dma.vmem_to_hbm [thread:$0]  %s1981_s0, 128, %s1983_s14, [#allocation5], %s2911_s1, %s2911_s1, %s2914_s17  }
 0x298   :  { %2875 = dma.done.wait [#allocation5], 128  }
 0x299   :  { %2876 = vsyncadd [#allocation5], 4294967168 }
 0x29a   :  { %1993 = vsyncpa [#allocation4], 1 }
 0x29b   :  { %1994 = vsyncpa [#allocation7], 1 }
 0x29c   :  { %1995 = vsyncpa [#allocation10], 1 }
 0x29d   :  { %1996 = vsyncpa [#allocation13], 1 }
 0x29e   :  { %1997 = vsyncpa [#allocation16], 1 }
 0x29f   :  { %1998 = vsyncpa [#allocation19], 1 }
 0x2a0   :  { %1999 = vsyncpa [#allocation22], 1 }
 0x2a1   :  { %2000 = vsyncpa [#allocation25], 1 }
 0x2a2   :  { %2001 = vsyncpa [#allocation28], 1 }
 0x2a3   :  { %2002 = vsyncpa [#allocation31], 1 }
 0x2a4   :  { %2003 = vsyncpa [#allocation34], 1 }
 0x2a5   :  { %2004 = vsyncpa [#allocation37], 1 }
 0x2a6   :  { %2005 = vsyncpa [#allocation5], 1 }

</bundles_post_ra>
